<compile_context>
chip_gen: v5e
topology: v5e:2x2
jax: 0.10.0
libtpu: 0.0.40
codegen_flags: <defaults>
</compile_context>

<pallas_src>
import jax
import jax.numpy as jnp
from jax.experimental import pallas as pl
from jax.experimental.pallas import tpu as pltpu


GAP = 128    # zero lanes before / between / after the packed images
PADX = 128   # extra zero lanes on each side of the window staging buffer


def _make_segnet_kernel(N, H, W, c_in_pad, c1, c_out_pad):
    P = H * W
    stride = P + GAP
    L = GAP + N * stride

    def kernel(x_ref, w1_ref, b1_ref, w2_ref, b2_ref, out_ref):
        # x_ref  : (c_in_pad, L)     whole batch packed on lanes, zero gaps
        # w1_ref : (c1, 9*c_in_pad)  columns: tap-major ((ky+1)*3+(kx+1)), then in-channel
        # b1_ref : (c1, 1)
        # w2_ref : (c_out_pad, 9*c1)
        # b2_ref : (c_out_pad, 1)
        # out_ref: (N, c_out_pad, P)

        # ---- edge / image-membership masks, built in-kernel (no extra operand) ----
        lane = jax.lax.broadcasted_iota(jnp.int32, (1, L), 1)
        rel = lane - GAP
        m = rel % stride
        in_img = jnp.logical_and(rel >= 0, m < P)
        col = m % W
        mask_img = in_img.astype(jnp.float32)                               # 1 on image lanes
        mask_l = jnp.logical_and(in_img, col >= 1).astype(jnp.float32)      # valid for kx = -1
        mask_r = jnp.logical_and(in_img, col <= W - 2).astype(jnp.float32)  # valid for kx = +1

        def conv3x3(a, w_ref, b_ref, taps_per_dot):
            # a: (c, L) with zeros on gap lanes -> (c_out, L); 3x3 "same" conv + bias.
            c = a.shape[0]
            c_out = w_ref.shape[0]
            z = jnp.zeros((c, PADX), jnp.float32)
            # Lane padding so every statically shifted window is an in-bounds slice;
            # vertical out-of-image taps read the zero gaps between images.
            ap = jnp.concatenate([z, a, z], axis=1)              # (c, L + 2*PADX)
            acc = jnp.broadcast_to(b_ref[...], (c_out, L))       # start from bias
            wins = []
            t = 0
            for ky in (-1, 0, 1):
                for kx in (-1, 0, 1):
                    s = ky * W + kx
                    win = ap[:, PADX + s: PADX + s + L]          # value at p + s
                    if kx == -1:
                        win = win * mask_l
                    elif kx == 1:
                        win = win * mask_r
                    wins.append(win)
                    t += 1
                    if len(wins) == taps_per_dot:
                        k0 = (t - taps_per_dot) * c
                        wk = w_ref[:, k0: k0 + taps_per_dot * c]       # (c_out, K)
                        stacked = jnp.concatenate(wins, axis=0)        # (K, L), sublane-aligned
                        acc = acc + jnp.dot(wk, stacked,
                                            preferred_element_type=jnp.float32)
                        wins = []
            return acc

        x = x_ref[...]                                            # (c_in_pad, L)
        # conv1: three K = 3*c_in_pad (=24) dots; ReLU; zero the gap lanes so
        # conv2's vertical taps read true zeros there.
        h = jnp.maximum(conv3x3(x, w1_ref, b1_ref, 3), 0.0) * mask_img     # (c1, L)
        # conv2: three K = 3*c1 (=48) dots (keeps the stacked window well under
        # the vreg budget at 896 lanes).  On v7x the per-tap MRB-accumulate
        # would also be fine; K-stacking mainly pays on v5e/v6e (MRF).
        y = conv3x3(h, w2_ref, b2_ref, 3)                                  # (c_out_pad, L)
        for n in range(N):
            off = GAP + n * stride                                # multiple of 128 here
            out_ref[n] = y[:, off: off + P]                       # lane-dense (c_out_pad, P)

    return kernel


def random_seg_net(x_nchw, w1_hwio, b1, w2_hwio, b2):
    """Forward pass of RandomSegNet. x_nchw: (N, Cin, H, W) float32 -> (N, Cout, H, W)."""
    x_nchw = x_nchw.astype(jnp.float32)
    N, Cin, H, W = x_nchw.shape
    C1 = w1_hwio.shape[3]
    Cout = w2_hwio.shape[3]
    P = H * W

    # The zero gaps double as the conv's vertical padding: the largest tap shift
    # (W + 1) must fit inside a gap / the staging pad, or rows would bleed.
    assert W + 1 <= GAP and W + 1 <= PADX, "tap shift must fit inside the zero gap"
    # TODO(synk): for large H*W, tile P in 128-lane multiples with a +-(W+1) halo
    # in the index_map and set vmem_limit_bytes (re-derive against v7x's 64 MiB VMEM).

    CIN_PAD = max(8, -(-Cin // 8) * 8)
    COUT_PAD = max(8, -(-Cout // 8) * 8)
    stride = P + GAP
    L = GAP + N * stride

    # Pack the whole batch onto the lane axis: [gap | img0 | gap | img1 | ... | gap].
    # Tiny (tens of KB) host-side shuffle; the big win is a single grid step.
    x_flat = x_nchw.reshape(N, Cin, P)
    zgap = jnp.zeros((CIN_PAD, GAP), jnp.float32)
    segs = [zgap]
    for n in range(N):
        img = jnp.pad(x_flat[n], ((0, CIN_PAD - Cin), (0, 0)))    # (CIN_PAD, P)
        segs += [img, zgap]
    x_packed = jnp.concatenate(segs, axis=1)                      # (CIN_PAD, L)

    # Lane-dense 2-D weight slabs; column index = tap*(padded in-channels) + channel.
    w1_t = jnp.transpose(w1_hwio, (3, 0, 1, 2)).astype(jnp.float32)        # (C1,3,3,Cin)
    w1_t = jnp.pad(w1_t, ((0, 0), (0, 0), (0, 0), (0, CIN_PAD - Cin)))
    w1_packed = w1_t.reshape(C1, 9 * CIN_PAD)                              # (16, 72)
    w2_t = jnp.transpose(w2_hwio, (3, 0, 1, 2)).astype(jnp.float32).reshape(Cout, 9 * C1)
    w2_packed = jnp.pad(w2_t, ((0, COUT_PAD - Cout), (0, 0)))              # (8, 144)
    b1r = b1.reshape(C1, 1).astype(jnp.float32)
    b2r = jnp.pad(b2.astype(jnp.float32), (0, COUT_PAD - Cout)).reshape(COUT_PAD, 1)

    flops = 2 * 9 * (Cin * C1 + C1 * Cout) * P * N
    bytes_accessed = 4 * (x_packed.size + w1_packed.size + b1r.size
                          + w2_packed.size + b2r.size + N * COUT_PAD * P)

    out = pl.pallas_call(
        _make_segnet_kernel(N, H, W, CIN_PAD, C1, COUT_PAD),
        out_shape=jax.ShapeDtypeStruct((N, COUT_PAD, P), jnp.float32),
        grid_spec=pltpu.PrefetchScalarGridSpec(
            num_scalar_prefetch=0,
            grid=(1,),   # single step: problem is launch/step-overhead bound
            in_specs=[
                pl.BlockSpec((CIN_PAD, L), lambda i: (0, 0)),
                pl.BlockSpec((C1, 9 * CIN_PAD), lambda i: (0, 0)),
                pl.BlockSpec((C1, 1), lambda i: (0, 0)),
                pl.BlockSpec((COUT_PAD, 9 * C1), lambda i: (0, 0)),
                pl.BlockSpec((COUT_PAD, 1), lambda i: (0, 0)),
            ],
            out_specs=pl.BlockSpec((N, COUT_PAD, P), lambda i: (0, 0, 0)),
        ),
        compiler_params=pltpu.CompilerParams(
            dimension_semantics=("arbitrary",)),
        cost_estimate=pl.CostEstimate(
            flops=flops, transcendentals=0, bytes_accessed=bytes_accessed),
    )(x_packed, w1_packed, b1r, w2_packed, b2r)

    return out[:, :Cout].reshape(N, Cout, H, W)


def _ref_forward(x_nchw, w1, b1, w2, b2):
    """Pure-JAX reference (same semantics as the PyTorch module)."""
    x = jnp.transpose(x_nchw, (0, 2, 3, 1))
    dn = ("NHWC", "HWIO", "NHWC")
    h = jax.lax.conv_general_dilated(
        x, w1, (1, 1), "SAME", dimension_numbers=dn) + b1
    h = jnp.maximum(h, 0.0)
    y = jax.lax.conv_general_dilated(
        h, w2, (1, 1), "SAME", dimension_numbers=dn) + b2
    return jnp.transpose(y, (0, 3, 1, 2))


if __name__ == "__main__":
    in_channels, out_channels = 3, 6
    c_hidden = 16
    N, H, W = 2, 16, 16

    key = jax.random.PRNGKey(0)
    k_x, k_w1, k_b1, k_w2, k_b2 = jax.random.split(key, 5)

    # Deterministic synthetic parameters (nn.Conv2d shapes, stored as HWIO).
    x = jax.random.normal(k_x, (N, in_channels, H, W), dtype=jnp.float32)
    w1 = jax.random.normal(k_w1, (3, 3, in_channels, c_hidden),
                           dtype=jnp.float32) * 0.1
    b1 = jax.random.normal(k_b1, (c_hidden,), dtype=jnp.float32) * 0.1
    w2 = jax.random.normal(k_w2, (3, 3, c_hidden, out_channels),
                           dtype=jnp.float32) * 0.1
    b2 = jax.random.normal(k_b2, (out_channels,), dtype=jnp.float32) * 0.1

    y = jax.block_until_ready(random_seg_net(x, w1, b1, w2, b2))
    y_ref = jax.block_until_ready(_ref_forward(x, w1, b1, w2, b2))

    assert y.shape == (N, out_channels, H, W), y.shape
    assert jnp.allclose(y, y_ref, atol=1e-4, rtol=1e-4), float(
        jnp.max(jnp.abs(y - y_ref)))

    print("KERNEL_OK")
</pallas_src>

<mosaic_0001>
module attributes {stable_mosaic.version = 11 : i64} {
  func.func @kernel(%arg0: i32, %arg1: memref<8x896xf32, #tpu.memory_space<vmem>>, %arg2: memref<16x72xf32, #tpu.memory_space<vmem>>, %arg3: memref<16x1xf32, #tpu.memory_space<vmem>>, %arg4: memref<8x144xf32, #tpu.memory_space<vmem>>, %arg5: memref<8x1xf32, #tpu.memory_space<vmem>>, %arg6: memref<2x8x256xf32, #tpu.memory_space<vmem>>) attributes {dimension_semantics = [#tpu.dimension_semantics<arbitrary>], iteration_bounds = array<i64: 1>, scalar_prefetch = 0 : i64, scratch_operands = 0 : i64, tpu.core_type = #tpu.core_type<tc>, window_params = [{pipeline_mode = #tpu.pipeline_mode<synchronous>, transform_indices = @transform_0, window_bounds = array<i64: 8, 896>}, {pipeline_mode = #tpu.pipeline_mode<synchronous>, transform_indices = @transform_1, window_bounds = array<i64: 16, 72>}, {pipeline_mode = #tpu.pipeline_mode<synchronous>, transform_indices = @transform_2, window_bounds = array<i64: 16, 1>}, {pipeline_mode = #tpu.pipeline_mode<synchronous>, transform_indices = @transform_3, window_bounds = array<i64: 8, 144>}, {pipeline_mode = #tpu.pipeline_mode<synchronous>, transform_indices = @transform_4, window_bounds = array<i64: 8, 1>}, {pipeline_mode = #tpu.pipeline_mode<synchronous>, transform_indices = @transform_5, window_bounds = array<i64: 2, 8, 256>}]} {
    %0 = tpu.iota {dimensions = array<i32: 1>} : vector<1x896xi32>
    %c128_i32 = arith.constant 128 : i32
    %1 = vector.broadcast %c128_i32 : i32 to vector<1x896xi32>
    %2 = arith.subi %0, %1 : vector<1x896xi32>
    %c384_i32 = arith.constant 384 : i32
    %c0_i32 = arith.constant 0 : i32
    %3 = arith.cmpi eq, %c384_i32, %c0_i32 : i32
    %c1_i32 = arith.constant 1 : i32
    %4 = arith.select %3, %c1_i32, %c384_i32 : i32
    %5 = vector.broadcast %4 : i32 to vector<1x896xi32>
    %6 = arith.remsi %2, %5 : vector<1x896xi32>
    %c0_i32_0 = arith.constant 0 : i32
    %7 = vector.broadcast %c0_i32_0 : i32 to vector<1x896xi32>
    %8 = arith.cmpi ne, %6, %7 : vector<1x896xi32>
    %c0_i32_1 = arith.constant 0 : i32
    %9 = vector.broadcast %c0_i32_1 : i32 to vector<1x896xi32>
    %10 = arith.cmpi slt, %6, %9 : vector<1x896xi32>
    %c0_i32_2 = arith.constant 0 : i32
    %11 = arith.cmpi slt, %4, %c0_i32_2 : i32
    %12 = vector.broadcast %11 : i1 to vector<1x896xi1>
    %13 = vector.broadcast %12 : vector<1x896xi1> to vector<1x896xi1>
    %14 = arith.xori %10, %13 : vector<1x896xi1>
    %15 = arith.andi %14, %8 : vector<1x896xi1>
    %16 = vector.broadcast %4 : i32 to vector<1x896xi32>
    %17 = arith.addi %6, %16 : vector<1x896xi32>
    %18 = arith.select %15, %17, %6 : vector<1x896xi1>, vector<1x896xi32>
    %c0_i32_3 = arith.constant 0 : i32
    %19 = vector.broadcast %c0_i32_3 : i32 to vector<1x896xi32>
    %20 = arith.cmpi sge, %2, %19 : vector<1x896xi32>
    %c256_i32 = arith.constant 256 : i32
    %21 = vector.broadcast %c256_i32 : i32 to vector<1x896xi32>
    %22 = arith.cmpi slt, %18, %21 : vector<1x896xi32>
    %23 = arith.andi %20, %22 : vector<1x896xi1>
    %c16_i32 = arith.constant 16 : i32
    %c0_i32_4 = arith.constant 0 : i32
    %24 = arith.cmpi eq, %c16_i32, %c0_i32_4 : i32
    %c1_i32_5 = arith.constant 1 : i32
    %25 = arith.select %24, %c1_i32_5, %c16_i32 : i32
    %26 = vector.broadcast %25 : i32 to vector<1x896xi32>
    %27 = arith.remsi %18, %26 : vector<1x896xi32>
    %c0_i32_6 = arith.constant 0 : i32
    %28 = vector.broadcast %c0_i32_6 : i32 to vector<1x896xi32>
    %29 = arith.cmpi ne, %27, %28 : vector<1x896xi32>
    %c0_i32_7 = arith.constant 0 : i32
    %30 = vector.broadcast %c0_i32_7 : i32 to vector<1x896xi32>
    %31 = arith.cmpi slt, %27, %30 : vector<1x896xi32>
    %c0_i32_8 = arith.constant 0 : i32
    %32 = arith.cmpi slt, %25, %c0_i32_8 : i32
    %33 = vector.broadcast %32 : i1 to vector<1x896xi1>
    %34 = vector.broadcast %33 : vector<1x896xi1> to vector<1x896xi1>
    %35 = arith.xori %31, %34 : vector<1x896xi1>
    %36 = arith.andi %35, %29 : vector<1x896xi1>
    %37 = vector.broadcast %25 : i32 to vector<1x896xi32>
    %38 = arith.addi %27, %37 : vector<1x896xi32>
    %39 = arith.select %36, %38, %27 : vector<1x896xi1>, vector<1x896xi32>
    %40 = arith.extui %23 : vector<1x896xi1> to vector<1x896xi32>
    %41 = arith.sitofp %40 : vector<1x896xi32> to vector<1x896xf32>
    %c1_i32_9 = arith.constant 1 : i32
    %42 = vector.broadcast %c1_i32_9 : i32 to vector<1x896xi32>
    %43 = arith.cmpi sge, %39, %42 : vector<1x896xi32>
    %44 = arith.andi %23, %43 : vector<1x896xi1>
    %45 = arith.extui %44 : vector<1x896xi1> to vector<1x896xi32>
    %46 = arith.sitofp %45 : vector<1x896xi32> to vector<1x896xf32>
    %c14_i32 = arith.constant 14 : i32
    %47 = vector.broadcast %c14_i32 : i32 to vector<1x896xi32>
    %48 = arith.cmpi sle, %39, %47 : vector<1x896xi32>
    %49 = arith.andi %23, %48 : vector<1x896xi1>
    %50 = arith.extui %49 : vector<1x896xi1> to vector<1x896xi32>
    %51 = arith.sitofp %50 : vector<1x896xi32> to vector<1x896xf32>
    %c0 = arith.constant 0 : index
    %c0_10 = arith.constant 0 : index
    %52 = vector.load %arg1[%c0, %c0_10] : memref<8x896xf32, #tpu.memory_space<vmem>>, vector<8x896xf32>
    %cst = arith.constant 0.000000e+00 : f32
    %53 = vector.broadcast %cst : f32 to vector<8x128xf32>
    %54 = tpu.concatenate %53, %52, %53 in 1 : vector<8x128xf32>, vector<8x896xf32>, vector<8x128xf32> -> vector<8x1152xf32>
    %c0_11 = arith.constant 0 : index
    %c0_12 = arith.constant 0 : index
    %55 = vector.load %arg3[%c0_11, %c0_12] : memref<16x1xf32, #tpu.memory_space<vmem>>, vector<16x1xf32>
    %56 = vector.shape_cast %55 : vector<16x1xf32> to vector<16x1xf32>
    %57 = vector.broadcast %56 : vector<16x1xf32> to vector<16x896xf32>
    %58 = vector.extract_strided_slice %54 {offsets = [0, 111], sizes = [8, 896], strides = [1, 1]} : vector<8x1152xf32> to vector<8x896xf32>
    %59 = vector.broadcast %46 : vector<1x896xf32> to vector<8x896xf32>
    %60 = arith.mulf %58, %59 : vector<8x896xf32>
    %61 = vector.extract_strided_slice %54 {offsets = [0, 112], sizes = [8, 896], strides = [1, 1]} : vector<8x1152xf32> to vector<8x896xf32>
    %62 = vector.extract_strided_slice %54 {offsets = [0, 113], sizes = [8, 896], strides = [1, 1]} : vector<8x1152xf32> to vector<8x896xf32>
    %63 = vector.broadcast %51 : vector<1x896xf32> to vector<8x896xf32>
    %64 = arith.mulf %62, %63 : vector<8x896xf32>
    %c0_13 = arith.constant 0 : index
    %c0_14 = arith.constant 0 : index
    %65 = vector.load %arg2[%c0_13, %c0_14] : memref<16x72xf32, #tpu.memory_space<vmem>>, vector<16x24xf32>
    %66 = tpu.concatenate %60, %61, %64 in 0 : vector<8x896xf32>, vector<8x896xf32>, vector<8x896xf32> -> vector<24x896xf32>
    %cst_15 = arith.constant dense<0.000000e+00> : vector<16x896xf32>
    %67 = tpu.matmul %65, %66, %cst_15 {dimension_numbers = #tpu.dot_dimension_numbers<[1], [0], [0], [1], [0, 0, 1, 1], [], []>} : vector<16x24xf32>, vector<24x896xf32>, vector<16x896xf32> -> vector<16x896xf32>
    %68 = arith.addf %57, %67 : vector<16x896xf32>
    %69 = vector.extract_strided_slice %54 {offsets = [0, 127], sizes = [8, 896], strides = [1, 1]} : vector<8x1152xf32> to vector<8x896xf32>
    %70 = vector.broadcast %46 : vector<1x896xf32> to vector<8x896xf32>
    %71 = arith.mulf %69, %70 : vector<8x896xf32>
    %72 = vector.extract_strided_slice %54 {offsets = [0, 128], sizes = [8, 896], strides = [1, 1]} : vector<8x1152xf32> to vector<8x896xf32>
    %73 = vector.extract_strided_slice %54 {offsets = [0, 129], sizes = [8, 896], strides = [1, 1]} : vector<8x1152xf32> to vector<8x896xf32>
    %74 = vector.broadcast %51 : vector<1x896xf32> to vector<8x896xf32>
    %75 = arith.mulf %73, %74 : vector<8x896xf32>
    %c0_16 = arith.constant 0 : index
    %c24 = arith.constant 24 : index
    %76 = vector.load %arg2[%c0_16, %c24] : memref<16x72xf32, #tpu.memory_space<vmem>>, vector<16x24xf32>
    %77 = tpu.concatenate %71, %72, %75 in 0 : vector<8x896xf32>, vector<8x896xf32>, vector<8x896xf32> -> vector<24x896xf32>
    %cst_17 = arith.constant dense<0.000000e+00> : vector<16x896xf32>
    %78 = tpu.matmul %76, %77, %cst_17 {dimension_numbers = #tpu.dot_dimension_numbers<[1], [0], [0], [1], [0, 0, 1, 1], [], []>} : vector<16x24xf32>, vector<24x896xf32>, vector<16x896xf32> -> vector<16x896xf32>
    %79 = arith.addf %68, %78 : vector<16x896xf32>
    %80 = vector.extract_strided_slice %54 {offsets = [0, 143], sizes = [8, 896], strides = [1, 1]} : vector<8x1152xf32> to vector<8x896xf32>
    %81 = vector.broadcast %46 : vector<1x896xf32> to vector<8x896xf32>
    %82 = arith.mulf %80, %81 : vector<8x896xf32>
    %83 = vector.extract_strided_slice %54 {offsets = [0, 144], sizes = [8, 896], strides = [1, 1]} : vector<8x1152xf32> to vector<8x896xf32>
    %84 = vector.extract_strided_slice %54 {offsets = [0, 145], sizes = [8, 896], strides = [1, 1]} : vector<8x1152xf32> to vector<8x896xf32>
    %85 = vector.broadcast %51 : vector<1x896xf32> to vector<8x896xf32>
    %86 = arith.mulf %84, %85 : vector<8x896xf32>
    %c0_18 = arith.constant 0 : index
    %c48 = arith.constant 48 : index
    %87 = vector.load %arg2[%c0_18, %c48] : memref<16x72xf32, #tpu.memory_space<vmem>>, vector<16x24xf32>
    %88 = tpu.concatenate %82, %83, %86 in 0 : vector<8x896xf32>, vector<8x896xf32>, vector<8x896xf32> -> vector<24x896xf32>
    %cst_19 = arith.constant dense<0.000000e+00> : vector<16x896xf32>
    %89 = tpu.matmul %87, %88, %cst_19 {dimension_numbers = #tpu.dot_dimension_numbers<[1], [0], [0], [1], [0, 0, 1, 1], [], []>} : vector<16x24xf32>, vector<24x896xf32>, vector<16x896xf32> -> vector<16x896xf32>
    %90 = arith.addf %79, %89 : vector<16x896xf32>
    %cst_20 = arith.constant 0.000000e+00 : f32
    %91 = vector.broadcast %cst_20 : f32 to vector<16x896xf32>
    %92 = arith.maximumf %90, %91 : vector<16x896xf32>
    %93 = vector.broadcast %41 : vector<1x896xf32> to vector<16x896xf32>
    %94 = arith.mulf %92, %93 : vector<16x896xf32>
    %cst_21 = arith.constant 0.000000e+00 : f32
    %95 = vector.broadcast %cst_21 : f32 to vector<16x128xf32>
    %96 = tpu.concatenate %95, %94, %95 in 1 : vector<16x128xf32>, vector<16x896xf32>, vector<16x128xf32> -> vector<16x1152xf32>
    %c0_22 = arith.constant 0 : index
    %c0_23 = arith.constant 0 : index
    %97 = vector.load %arg5[%c0_22, %c0_23] : memref<8x1xf32, #tpu.memory_space<vmem>>, vector<8x1xf32>
    %98 = vector.shape_cast %97 : vector<8x1xf32> to vector<8x1xf32>
    %99 = vector.broadcast %98 : vector<8x1xf32> to vector<8x896xf32>
    %100 = vector.extract_strided_slice %96 {offsets = [0, 111], sizes = [16, 896], strides = [1, 1]} : vector<16x1152xf32> to vector<16x896xf32>
    %101 = vector.broadcast %46 : vector<1x896xf32> to vector<16x896xf32>
    %102 = arith.mulf %100, %101 : vector<16x896xf32>
    %103 = vector.extract_strided_slice %96 {offsets = [0, 112], sizes = [16, 896], strides = [1, 1]} : vector<16x1152xf32> to vector<16x896xf32>
    %104 = vector.extract_strided_slice %96 {offsets = [0, 113], sizes = [16, 896], strides = [1, 1]} : vector<16x1152xf32> to vector<16x896xf32>
    %105 = vector.broadcast %51 : vector<1x896xf32> to vector<16x896xf32>
    %106 = arith.mulf %104, %105 : vector<16x896xf32>
    %c0_24 = arith.constant 0 : index
    %c0_25 = arith.constant 0 : index
    %107 = vector.load %arg4[%c0_24, %c0_25] : memref<8x144xf32, #tpu.memory_space<vmem>>, vector<8x48xf32>
    %108 = tpu.concatenate %102, %103, %106 in 0 : vector<16x896xf32>, vector<16x896xf32>, vector<16x896xf32> -> vector<48x896xf32>
    %cst_26 = arith.constant dense<0.000000e+00> : vector<8x896xf32>
    %109 = tpu.matmul %107, %108, %cst_26 {dimension_numbers = #tpu.dot_dimension_numbers<[1], [0], [0], [1], [0, 0, 1, 1], [], []>} : vector<8x48xf32>, vector<48x896xf32>, vector<8x896xf32> -> vector<8x896xf32>
    %110 = arith.addf %99, %109 : vector<8x896xf32>
    %111 = vector.extract_strided_slice %96 {offsets = [0, 127], sizes = [16, 896], strides = [1, 1]} : vector<16x1152xf32> to vector<16x896xf32>
    %112 = vector.broadcast %46 : vector<1x896xf32> to vector<16x896xf32>
    %113 = arith.mulf %111, %112 : vector<16x896xf32>
    %114 = vector.extract_strided_slice %96 {offsets = [0, 128], sizes = [16, 896], strides = [1, 1]} : vector<16x1152xf32> to vector<16x896xf32>
    %115 = vector.extract_strided_slice %96 {offsets = [0, 129], sizes = [16, 896], strides = [1, 1]} : vector<16x1152xf32> to vector<16x896xf32>
    %116 = vector.broadcast %51 : vector<1x896xf32> to vector<16x896xf32>
    %117 = arith.mulf %115, %116 : vector<16x896xf32>
    %c0_27 = arith.constant 0 : index
    %c48_28 = arith.constant 48 : index
    %118 = vector.load %arg4[%c0_27, %c48_28] : memref<8x144xf32, #tpu.memory_space<vmem>>, vector<8x48xf32>
    %119 = tpu.concatenate %113, %114, %117 in 0 : vector<16x896xf32>, vector<16x896xf32>, vector<16x896xf32> -> vector<48x896xf32>
    %cst_29 = arith.constant dense<0.000000e+00> : vector<8x896xf32>
    %120 = tpu.matmul %118, %119, %cst_29 {dimension_numbers = #tpu.dot_dimension_numbers<[1], [0], [0], [1], [0, 0, 1, 1], [], []>} : vector<8x48xf32>, vector<48x896xf32>, vector<8x896xf32> -> vector<8x896xf32>
    %121 = arith.addf %110, %120 : vector<8x896xf32>
    %122 = vector.extract_strided_slice %96 {offsets = [0, 143], sizes = [16, 896], strides = [1, 1]} : vector<16x1152xf32> to vector<16x896xf32>
    %123 = vector.broadcast %46 : vector<1x896xf32> to vector<16x896xf32>
    %124 = arith.mulf %122, %123 : vector<16x896xf32>
    %125 = vector.extract_strided_slice %96 {offsets = [0, 144], sizes = [16, 896], strides = [1, 1]} : vector<16x1152xf32> to vector<16x896xf32>
    %126 = vector.extract_strided_slice %96 {offsets = [0, 145], sizes = [16, 896], strides = [1, 1]} : vector<16x1152xf32> to vector<16x896xf32>
    %127 = vector.broadcast %51 : vector<1x896xf32> to vector<16x896xf32>
    %128 = arith.mulf %126, %127 : vector<16x896xf32>
    %c0_30 = arith.constant 0 : index
    %c96 = arith.constant 96 : index
    %129 = vector.load %arg4[%c0_30, %c96] : memref<8x144xf32, #tpu.memory_space<vmem>>, vector<8x48xf32>
    %130 = tpu.concatenate %124, %125, %128 in 0 : vector<16x896xf32>, vector<16x896xf32>, vector<16x896xf32> -> vector<48x896xf32>
    %cst_31 = arith.constant dense<0.000000e+00> : vector<8x896xf32>
    %131 = tpu.matmul %129, %130, %cst_31 {dimension_numbers = #tpu.dot_dimension_numbers<[1], [0], [0], [1], [0, 0, 1, 1], [], []>} : vector<8x48xf32>, vector<48x896xf32>, vector<8x896xf32> -> vector<8x896xf32>
    %132 = arith.addf %121, %131 : vector<8x896xf32>
    %133 = vector.extract_strided_slice %132 {offsets = [0, 128], sizes = [8, 256], strides = [1, 1]} : vector<8x896xf32> to vector<8x256xf32>
    %c0_32 = arith.constant 0 : index
    %c0_33 = arith.constant 0 : index
    %c0_34 = arith.constant 0 : index
    %134 = vector.load %arg6[%c0_32, %c0_33, %c0_34] : memref<2x8x256xf32, #tpu.memory_space<vmem>>, vector<1x8x256xf32>
    %135 = vector.shape_cast %134 : vector<1x8x256xf32> to vector<8x256xf32>
    %136 = vector.shape_cast %133 : vector<8x256xf32> to vector<1x8x256xf32>
    tpu.vector_store %arg6[%c0_32, %c0_33, %c0_34], %136 {strides = array<i32>} : memref<2x8x256xf32, #tpu.memory_space<vmem>>, vector<1x8x256xf32>,
    %137 = vector.extract_strided_slice %132 {offsets = [0, 512], sizes = [8, 256], strides = [1, 1]} : vector<8x896xf32> to vector<8x256xf32>
    %c1 = arith.constant 1 : index
    %c0_35 = arith.constant 0 : index
    %c0_36 = arith.constant 0 : index
    %138 = vector.load %arg6[%c1, %c0_35, %c0_36] : memref<2x8x256xf32, #tpu.memory_space<vmem>>, vector<1x8x256xf32>
    %139 = vector.shape_cast %138 : vector<1x8x256xf32> to vector<8x256xf32>
    %140 = vector.shape_cast %137 : vector<8x256xf32> to vector<1x8x256xf32>
    tpu.vector_store %arg6[%c1, %c0_35, %c0_36], %140 {strides = array<i32>} : memref<2x8x256xf32, #tpu.memory_space<vmem>>, vector<1x8x256xf32>,
    return
  }
  func.func @transform_0(%arg0: i32) -> (i32, i32) {
    %c0_i32 = arith.constant 0 : i32
    %c0_i32_0 = arith.constant 0 : i32
    %c0_i32_1 = arith.constant 0 : i32
    return %c0_i32, %c0_i32_0 : i32, i32
  }
  func.func @transform_1(%arg0: i32) -> (i32, i32) {
    %c0_i32 = arith.constant 0 : i32
    %c0_i32_0 = arith.constant 0 : i32
    %c0_i32_1 = arith.constant 0 : i32
    return %c0_i32, %c0_i32_0 : i32, i32
  }
  func.func @transform_2(%arg0: i32) -> (i32, i32) {
    %c0_i32 = arith.constant 0 : i32
    %c0_i32_0 = arith.constant 0 : i32
    %c0_i32_1 = arith.constant 0 : i32
    return %c0_i32, %c0_i32_0 : i32, i32
  }
  func.func @transform_3(%arg0: i32) -> (i32, i32) {
    %c0_i32 = arith.constant 0 : i32
    %c0_i32_0 = arith.constant 0 : i32
    %c0_i32_1 = arith.constant 0 : i32
    return %c0_i32, %c0_i32_0 : i32, i32
  }
  func.func @transform_4(%arg0: i32) -> (i32, i32) {
    %c0_i32 = arith.constant 0 : i32
    %c0_i32_0 = arith.constant 0 : i32
    %c0_i32_1 = arith.constant 0 : i32
    return %c0_i32, %c0_i32_0 : i32, i32
  }
  func.func @transform_5(%arg0: i32) -> (i32, i32, i32) {
    %c0_i32 = arith.constant 0 : i32
    %c0_i32_0 = arith.constant 0 : i32
    %c0_i32_1 = arith.constant 0 : i32
    %c0_i32_2 = arith.constant 0 : i32
    return %c0_i32, %c0_i32_0, %c0_i32_1 : i32, i32, i32
  }
}

</mosaic_0001>

<bundles_post_ra>
// kernel: tpu_custom_call.1
= control target key start
LH: loop header
LB: loop body
LE: loop exit
PB: predicated region body
PF: predicated region fallthrough
CT: control target
= control target key end

     0   :  { %10 = vsyncpa [#allocation3], 0  ;;  %s5878_s0 = inlined_call_operand.hbm [shape: f32[8,896], index: 0, kind: input, shape index: {}]   ;;  %s5879_s1 = inlined_call_operand.vmem [shape: f32[16,72], index: 1, kind: input, shape index: {}]   ;;  %s5880_s2 = inlined_call_operand.vmem [shape: f32[16,1], index: 2, kind: input, shape index: {}]   ;;  %s5881_s3 = inlined_call_operand.hbm [shape: f32[8,144], index: 3, kind: input, shape index: {}]   ;;  %s5882_s4 = inlined_call_operand.vmem [shape: f32[8,1], index: 4, kind: input, shape index: {}]   ;;  %s5883_s5 = inlined_call_operand.hbm [shape: f32[2,8,256], index: 5, kind: output, shape index: {}]  }
   0x1   :  { %11 = vsyncpa [#allocation6], 0 }
   0x2   :  { %12 = vsyncpa [#allocation4], 0  ;;  %s18_s20 = sshll.u32 %s5878_s0, 4  ;;  %s3659_s21 = smov [#allocation2]   ;;  %s19_s20 = int_to_ptr.hbm [resolvable:$true] %s18_s20 }
   0x3   :  { %s20_s22 = sshll.u32 %s3659_s21, 4  ;;  %s33_s25 = sshll.u32 %s5881_s3, 4  ;;  %s21_s22 = int_to_ptr.vmem [resolvable:$true] %s20_s22  ;;  %s34_s25 = int_to_ptr.hbm [resolvable:$true] %s33_s25 }
   0x4   :  { %23 = dma.hbm_to_vmem [thread:$0]  %s19_s20, 896, %s21_s22, [#allocation3]  }
   0x5   :  { %s3660_s26 = smov [#allocation5]  }
   0x6   :  { %s35_s27 = sshll.u32 %s3660_s26, 4  ;;  %s36_s27 = int_to_ptr.vmem [resolvable:$true] %s35_s27 }
   0x7   :  { %38 = dma.hbm_to_vmem [thread:$0]  %s34_s25, 256, %s36_s27, [#allocation6]  }
   0x8   :  { %3653 = dma.done.wait [#allocation3], 896  }
   0x9   :  { %3654 = vsyncadd [#allocation3], 4294966400 }
   0xa   :  { %3655 = dma.done.wait [#allocation6], 256  }
   0xb   :  { %3656 = vsyncadd [#allocation6], 4294967040  ;;  %v49_v0 = vlaneseq  ;;  %v3661_v1 = vmov 0   ;;  %v482_v11 = vld [vmem:[%s5880_s2] sm:$0xff]  ;;  %v5884_v17 = vmov 0.0   ;;  %v3735_v19 = vld [vmem:[#allocation2 + $0x18] sm:$0xff] }
   0xc   :  { %2814 = vset.pattern.permute.xlu0 %v3661_v1  ;;  %3165 = vset.pattern.permute.xlu1 %v3661_v1  ;;  %v3724_v12 = vld [vmem:[#allocation2] sm:$0xff]  ;;  %v3743_v25 = vld [vmem:[#allocation2 + $0x28] sm:$0xff]  ;;  %v3745_v26 = vld [vmem:[#allocation2 + $0x30] sm:$0xff]  ;;  %s3663_s28 = smov 127   ;;  %s3665_s6 = smov 111  }
   0xd   :  { %v3714_v2 = vand.u32 127, %v49_v0  ;;  %486 = vperm.xlu0 %2814, %v482_v11   ;;  %v2815_v18 = vpack.i.bf16 %v3724_v12, %v5884_v17  ;;  %v3737_v20 = vld [vmem:[#allocation2 + $0x20] sm:$0xff]  ;;  %v2830_v37 = vpack.i.bf16 %v3745_v26, %v3743_v25  ;;  %v483_v40 = vld [vmem:[%s5880_s2 + $0x8] sm:$0xff]  ;;  %v3764_v63 = vld [vmem:[#allocation2 + $0x10] sm:$0xff]  ;;  %s3664_s2 = smov 113   ;;  %s3666_s7 = smov 1  }
   0xe   :  { %v2825_v24 = vpack.i.bf16 %v3737_v20, %v3735_v19  ;;  %v3762_v62 = vld [vmem:[#allocation2 + $0x8] sm:$0xff]  ;;  %s3667_s10 = smov 104   ;;  %s3668_s11 = smov 15  }
   0xf   :  { %v94_v3 = vand.u32 65535, %v3714_v2  ;;  %v95_v4 = vshrl.u32 %v3714_v2, 16  ;;  %v51_v5 = vadd.s32 256, %v3714_v2  ;;  %v52_v6 = vadd.s32 384, %v3714_v2  ;;  %2816 = vrot.lane.b32.xlu1 %v2815_v18, %s3663_s28  ;;  %s3669_s14 = smov 17   ;;  %s3670_s15 = smov 126  }
  0x10   :  { %v55_v7 = vadd.s32 768, %v3714_v2  ;;  %v3731_v16 = vadd.s32 512, %v3714_v2  ;;  %s3671_s16 = smov 80   ;;  %s3673_s22 = smov [#allocation7]  }
  0x11   :  { %v97_v8 = vmul.u32 43691, %v94_v3  ;;  %v98_v9 = vmul.u32 43690, %v94_v3  ;;  %v99_v10 = vmul.u32 43691, %v95_v4  ;;  %v100_v13 = vmul.u32 43690, %v95_v4  ;;  %s2700_s23 = sshll.u32 %s3673_s22, 4  ;;  %s2702_s26 = sshll.u32 %s5883_s5, 4  ;;  %s2701_s23 = int_to_ptr.vmem [resolvable:$true] %s2700_s23  ;;  %s2703_s26 = int_to_ptr.hbm [resolvable:$true] %s2702_s26 }
  0x12   :  { %v3726_v14 = vadd.s32 4294967168, %v51_v5  ;;  %v3728_v15 = vadd.s32 4294967168, %v52_v6  ;;  %v3739_v23 = vadd.s32 4294967168, %v55_v7  ;;  %v2820_v7 = vpack.i.bf16 %v3764_v63, %v3762_v62  ;;  %s3674_s27 = smov 256   ;;  %s3675_s0 = smov 16  }
  0x13   :  { %v101_v21 = vshll.u32 %v98_v9, 16  ;;  %v103_v22 = vshll.u32 %v99_v10, 16  ;;  %v102_v27 = vshrl.u32 %v98_v9, 16  ;;  %v104_v30 = vshrl.u32 %v99_v10, 16 }
  0x14   :  { %v123_v28 = vand.u32 65535, %v3726_v14  ;;  %v124_v29 = vshrl.u32 %v3726_v14, 16  ;;  %v152_v32 = vand.u32 65535, %v3728_v15  ;;  %v153_v39 = vshrl.u32 %v3728_v15, 16  ;;  %2821 = vrot.lane.b32.xlu2 %v2820_v7, %s3663_s28 }
  0x15   :  { %vm105_vm0 = vc.u32 %v97_v8, %v101_v21  ;;  %v107_v31 = vadd.s32 %v101_v21, %v97_v8  ;;  %491 = vperm.xlu0 %2814, %v483_v40   ;;  %v239_v4 = vand.u32 65535, %v3739_v23  ;;  %v240_v5 = vshrl.u32 %v3739_v23, 16 }
  0x16   :  { %v106_v33 = vsel %vm105_vm0, 1, %v3661_v1  ;;  %v126_v34 = vmul.u32 43691, %v123_v28  ;;  %v127_v35 = vmul.u32 43690, %v123_v28  ;;  %v128_v36 = vmul.u32 43691, %v124_v29 }
  0x17   :  { %v108_v38 = vadd.s32 %v106_v33, %v100_v13  ;;  %vm109_vm1 = vc.u32 %v107_v31, %v103_v22  ;;  %v129_v42 = vmul.u32 43690, %v124_v29  ;;  %v155_v47 = vmul.u32 43691, %v152_v32  ;;  %2831 = vrot.lane.b32.xlu1 %v2830_v37, %s3663_s28 }
  0x18   :  { %v110_v41 = vsel %vm109_vm1, 1, %v3661_v1  ;;  %v130_v43 = vshll.u32 %v127_v35, 16  ;;  %v132_v44 = vshll.u32 %v128_v36, 16  ;;  %v131_v46 = vshrl.u32 %v127_v35, 16 }
  0x19   :  { %v112_v45 = vadd.s32 %v110_v41, %v108_v38  ;;  %v156_v48 = vmul.u32 43690, %v152_v32  ;;  %v133_v49 = vshrl.u32 %v128_v36, 16  ;;  %v157_v51 = vmul.u32 43691, %v153_v39 }
  0x1a   :  { %vm134_vm2 = vc.u32 %v126_v34, %v130_v43  ;;  %v136_v50 = vadd.s32 %v130_v43, %v126_v34  ;;  %v158_v54 = vmul.u32 43690, %v153_v39  ;;  %v242_v11 = vmul.u32 43691, %v239_v4 }
  0x1b   :  { %v113_v52 = vadd.s32 %v112_v45, %v102_v27  ;;  %v135_v53 = vsel %vm134_vm2, 1, %v3661_v1  ;;  %v159_v55 = vshll.u32 %v156_v48, 16  ;;  %v160_v57 = vshrl.u32 %v156_v48, 16 }
  0x1c   :  { %v137_v56 = vadd.s32 %v135_v53, %v129_v42  ;;  %vm138_vm3 = vc.u32 %v136_v50, %v132_v44  ;;  %v161_v58 = vshll.u32 %v157_v51, 16  ;;  %v243_v13 = vmul.u32 43690, %v239_v4 }
  0x1d   :  { %v114_v59 = vadd.s32 %v113_v52, %v104_v30  ;;  %v139_v60 = vsel %vm138_vm3, 1, %v3661_v1  ;;  %vm163_vm4 = vc.u32 %v155_v47, %v159_v55  ;;  %v165_v61 = vadd.s32 %v159_v55, %v155_v47  ;;  %2826 = vrot.lane.b32.xlu0 %v2825_v24, %s3663_s28 }
  0x1e   :  { %v141_v0 = vadd.s32 %v139_v60, %v137_v56  ;;  %v164_v3 = vsel %vm163_vm4, 1, %v3661_v1  ;;  %v162_v21 = vshrl.u32 %v157_v51, 16  ;;  %v244_v27 = vmul.u32 43691, %v240_v5 }
  0x1f   :  { %v115_v6 = vshrl.u32 %v114_v59, 8  ;;  %v166_v8 = vadd.s32 %v164_v3, %v158_v54  ;;  %vm167_vm5 = vc.u32 %v165_v61, %v161_v58  ;;  %v246_v29 = vshll.u32 %v243_v13, 16 }
  0x20   :  { %v142_v9 = vadd.s32 %v141_v0, %v131_v46  ;;  %v168_v10 = vsel %vm167_vm5, 1, %v3661_v1  ;;  %v54_v30 = vadd.s32 640, %v3714_v2  ;;  %v3775_v31 = vadd.s32 4294967168, %v3731_v16 }
  0x21   :  { %v116_v18 = vmul.u32 384, %v115_v6  ;;  %v170_v22 = vadd.s32 %v168_v10, %v166_v8  ;;  %v245_v34 = vmul.u32 43690, %v240_v5  ;;  %v248_v35 = vshll.u32 %v244_v27, 16 }
  0x22   :  { %v143_v28 = vadd.s32 %v142_v9, %v133_v49  ;;  %v247_v37 = vshrl.u32 %v243_v13, 16  ;;  %vm250_vm6 = vc.u32 %v242_v11, %v246_v29  ;;  %v252_v38 = vadd.s32 %v246_v29, %v242_v11 }
  0x23   :  { %v117_v32 = vsub.s32 %v3714_v2, %v116_v18  ;;  %v171_v33 = vadd.s32 %v170_v22, %v160_v57  ;;  %v251_v41 = vsel %vm250_vm6, 1, %v3661_v1  ;;  %v181_v24 = vand.u32 65535, %v3775_v31 }
  0x24   :  { %v144_v36 = vshrl.u32 %v143_v28, 8  ;;  %vm254_vm10 = vc.u32 %v252_v38, %v248_v35  ;;  %v253_v43 = vadd.s32 %v251_v41, %v245_v34  ;;  %v249_v47 = vshrl.u32 %v244_v27, 16 }
  0x25   :  { %vm266_vm7 = vcmp.ne.s32.totalorder %v117_v32, 0  ;;  %vm273_vm8 = vcmp.lt.s32.totalorder %v117_v32, 0  ;;  %v287_v39 = vadd.s32 384, %v117_v32  ;;  %v172_v40 = vadd.s32 %v171_v33, %v162_v21 }
  0x26   :  { %vm280_vm9 = vmand %vm273_vm8, %vm266_vm7  ;;  %v145_v16 = vmul.u32 384, %v144_v36  ;;  %v255_v44 = vsel %vm254_vm10, 1, %v3661_v1  ;;  %v3790_v50 = vadd.s32 4294967168, %v54_v30  ;;  %v182_v51 = vshrl.u32 %v3775_v31, 16 }
  0x27   :  { %v3784_v42 = vsel %vm280_vm9, %v287_v39, %v117_v32  ;;  %v173_v2 = vshrl.u32 %v172_v40, 8  ;;  %v257_v49 = vadd.s32 %v255_v44, %v253_v43  ;;  %v184_v58 = vmul.u32 43691, %v181_v24 }
  0x28   :  { %6016 = vst [vmem:[#allocation11_spill] sm:$0xff] %v3784_v42  ;;  %vm328_vm11 = vcmp.lt.s32.totalorder %v3784_v42, 0  ;;  %v329_v45 = vsub.s32 0, %v3784_v42  ;;  %v146_v46 = vsub.s32 %v3726_v14, %v145_v16  ;;  %v3797_v14 = vmul.u32 43690, %v181_v24 }
  0x29   :  { %v174_v48 = vmul.u32 384, %v173_v2  ;;  %v258_v56 = vadd.s32 %v257_v49, %v247_v37  ;;  %vm308_vm15 = vcmp.lt.s32.totalorder %v3784_v42, 256  ;;  %v3802_v59 = vmul.u32 43691, %v182_v51 }
  0x2a   :  { %v330_v52 = vsel %vm328_vm11, %v329_v45, %v3784_v42  ;;  %vm267_vm12 = vcmp.ne.s32.totalorder %v146_v46, 0  ;;  %vm274_vm13 = vcmp.lt.s32.totalorder %v146_v46, 0  ;;  %v288_v53 = vadd.s32 384, %v146_v46 }
  0x2b   :  { %v332_v54 = vand.u32 15, %v330_v52  ;;  %v175_v55 = vsub.s32 %v3728_v15, %v174_v48  ;;  %vm281_vm14 = vmand %vm274_vm13, %vm267_vm12  ;;  %v259_v0 = vadd.s32 %v258_v56, %v249_v47  ;;  %v187_v3 = vmul.u32 43690, %v182_v51 }
  0x2c   :  { %v3800_v57 = vsel %vm281_vm14, %v288_v53, %v146_v46  ;;  %v188_v6 = vshll.u32 %v3797_v14, 16  ;;  %v210_v7 = vand.u32 65535, %v3790_v50  ;;  %v189_v9 = vshrl.u32 %v3797_v14, 16 }
  0x2d   :  { %6017 = vst [vmem:[#allocation12_spill] sm:$0xff] %v3800_v57  ;;  %v333_v60 = vsub.s32 0, %v332_v54  ;;  %vm268_vm0 = vcmp.ne.s32.totalorder %v175_v55, 0  ;;  %vm275_vm1 = vcmp.lt.s32.totalorder %v175_v55, 0  ;;  %v289_v61 = vadd.s32 384, %v175_v55 }
  0x2e   :  { %vm282_vm2 = vmand %vm275_vm1, %vm268_vm0  ;;  %vm335_vm3 = vcmp.lt.s32.totalorder %v3800_v57, 0  ;;  %v336_v15 = vsub.s32 0, %v3800_v57  ;;  %vm309_vm7 = vcmp.lt.s32.totalorder %v3800_v57, 256  ;;  %v260_v13 = vshrl.u32 %v259_v0, 8 }
  0x2f   :  { %v334_v4 = vsel %vm328_vm11, %v333_v60, %v332_v54  ;;  %v3808_v5 = vsel %vm282_vm2, %v289_v61, %v175_v55  ;;  %v190_v22 = vshll.u32 %v3802_v59, 16  ;;  %v191_v32 = vshrl.u32 %v3802_v59, 16 }
  0x30   :  { %6018 = vst [vmem:[#allocation13_spill] sm:$0xff] %v3808_v5  ;;  %vm371_vm4 = vcmp.ne.s32.totalorder %v334_v4, 0  ;;  %vm378_vm5 = vcmp.lt.s32.totalorder %v334_v4, 0  ;;  %v392_v8 = vadd.s32 16, %v334_v4  ;;  %v337_v10 = vsel %vm335_vm3, %v336_v15, %v3800_v57 }
  0x31   :  { %vm385_vm6 = vmand %vm378_vm5, %vm371_vm4  ;;  %vm342_vm8 = vcmp.lt.s32.totalorder %v3808_v5, 0  ;;  %v343_v11 = vsub.s32 0, %v3808_v5  ;;  %vm310_vm9 = vcmp.lt.s32.totalorder %v3808_v5, 256  ;;  %v339_v21 = vand.u32 15, %v337_v10 }
  0x32   :  { %v399_v18 = vsel %vm385_vm6, %v392_v8, %v334_v4  ;;  %v261_v28 = vmul.u32 384, %v260_v13  ;;  %vm192_vm13 = vc.u32 %v184_v58, %v188_v6  ;;  %v194_v36 = vadd.s32 %v188_v6, %v184_v58 }
  0x33   :  { %vm448_vm10 = vcmp.le.s32.totalorder %v399_v18, 14  ;;  %vm420_vm11 = vcmp.ge.s32.totalorder %v399_v18, 1  ;;  %v344_v27 = vsel %vm342_vm8, %v343_v11, %v3808_v5  ;;  %v340_v29 = vsub.s32 0, %v339_v21 }
  0x34   :  { %vm455_vm12 = vmand %vm308_vm15, %vm448_vm10  ;;  %v346_v30 = vand.u32 15, %v344_v27  ;;  %v262_v34 = vsub.s32 %v3739_v23, %v261_v28  ;;  %v193_v35 = vsel %vm192_vm13, 1, %v3661_v1  ;;  %v211_v40 = vshrl.u32 %v3790_v50, 16 }
  0x35   :  { %v3828_v33 = vsel %vm455_vm12, 1.0, %v5884_v17  ;;  %vm427_vm14 = vmand %vm308_vm15, %vm420_vm11  ;;  %v341_v38 = vsel %vm335_vm3, %v340_v29, %v339_v21  ;;  %v195_v43 = vadd.s32 %v193_v35, %v187_v3  ;;  %vm196_vm12 = vc.u32 %v194_v36, %v190_v22 }
  0x36   :  { %v3835_v37 = vsel %vm427_vm14, 1.0, %v5884_v17  ;;  %v347_v39 = vsub.s32 0, %v346_v30  ;;  %vm372_vm0 = vcmp.ne.s32.totalorder %v341_v38, 0  ;;  %vm379_vm1 = vcmp.lt.s32.totalorder %v341_v38, 0  ;;  %2841 = vrot.lane.b32.xlu0 %v3828_v33, %s3664_s2 }
  0x37   :  { %vm386_vm2 = vmand %vm379_vm1, %vm372_vm0  ;;  %v393_v16 = vadd.s32 16, %v341_v38  ;;  %vm271_vm4 = vcmp.ne.s32.totalorder %v262_v34, 0  ;;  %vm278_vm5 = vcmp.lt.s32.totalorder %v262_v34, 0  ;;  %2836 = vrot.lane.b32.xlu1 %v3835_v37, %s3665_s6  ;;  %v292_v24 = vadd.s32 384, %v262_v34 }
  0x38   :  { %v348_v23 = vsel %vm342_vm8, %v347_v39, %v346_v30  ;;  %vm285_vm10 = vmand %vm278_vm5, %vm271_vm4  ;;  %v213_v47 = vmul.u32 43691, %v210_v7  ;;  %v197_v49 = vsel %vm196_vm12, 1, %v3661_v1  ;;  %v214_v51 = vmul.u32 43690, %v210_v7 }
  0x39   :  { %vm373_vm3 = vcmp.ne.s32.totalorder %v348_v23, 0  ;;  %vm380_vm6 = vcmp.lt.s32.totalorder %v348_v23, 0  ;;  %v394_v41 = vadd.s32 16, %v348_v23  ;;  %v400_v2 = vsel %vm386_vm2, %v393_v16, %v341_v38 }
  0x3a   :  { %vm387_vm11 = vmand %vm380_vm6, %vm373_vm3  ;;  %vm421_vm13 = vcmp.ge.s32.totalorder %v400_v2, 1  ;;  %v3846_v45 = vsel %vm285_vm10, %v292_v24, %v262_v34  ;;  %vm449_vm8 = vcmp.le.s32.totalorder %v400_v2, 14  ;;  %v199_v54 = vadd.s32 %v197_v49, %v195_v43 }
  0x3b   :  { %v401_v44 = vsel %vm387_vm11, %v394_v41, %v348_v23  ;;  %6019 = vst [vmem:[#allocation14_spill] sm:$0xff] %v3846_v45  ;;  %vm428_vm0 = vmand %vm309_vm7, %vm421_vm13  ;;  %vm363_vm1 = vcmp.lt.s32.totalorder %v3846_v45, 0  ;;  %v364_v46 = vsub.s32 0, %v3846_v45  ;;  %v215_v55 = vmul.u32 43691, %v211_v40 }
  0x3c   :  { %vm422_vm14 = vcmp.ge.s32.totalorder %v401_v44, 1  ;;  %v2729_v48 = vsel %vm428_vm0, 1.0, %v5884_v17  ;;  %vm450_vm4 = vcmp.le.s32.totalorder %v401_v44, 14  ;;  %vm456_vm5 = vmand %vm309_vm7, %vm449_vm8  ;;  %v200_v59 = vadd.s32 %v199_v54, %v189_v9 }
  0x3d   :  { %vm429_vm2 = vmand %vm310_vm9, %vm422_vm14  ;;  %v365_v53 = vsel %vm363_vm1, %v364_v46, %v3846_v45  ;;  %v217_v60 = vshll.u32 %v214_v51, 16  ;;  %v2735_v15 = vsel %vm456_vm5, 1.0, %v5884_v17  ;;  %v216_v0 = vmul.u32 43690, %v211_v40 }
  0x3e   :  { %v2730_v52 = vsel %vm429_vm2, 1.0, %v5884_v17  ;;  %v367_v58 = vand.u32 15, %v365_v53  ;;  %vm457_vm3 = vmand %vm310_vm9, %vm450_vm4  ;;  %2846 = vrot.lane.b32.xlu0 %v3835_v37, %s3663_s28  ;;  %v219_v3 = vshll.u32 %v215_v55, 16  ;;  %v201_v6 = vadd.s32 %v200_v59, %v191_v32 }
  0x3f   :  { %v3866_v56 = vpack.i.bf16 %v2730_v52, %v2729_v48  ;;  %v2736_v4 = vsel %vm457_vm3, 1.0, %v5884_v17  ;;  %vm221_vm6 = vc.u32 %v213_v47, %v217_v60  ;;  %v223_v7 = vadd.s32 %v217_v60, %v213_v47 }
  0x40   :  { %v368_v61 = vsub.s32 0, %v367_v58  ;;  %vm313_vm10 = vcmp.lt.s32.totalorder %v3846_v45, 256  ;;  %v222_v8 = vsel %vm221_vm6, 1, %v3661_v1  ;;  %v202_v10 = vshrl.u32 %v201_v6, 8  ;;  %v4246_v45 = vld [vmem:[#allocation2 + $0x30] sm:$0xff] }
  0x41   :  { %2851 = vrot.lane.b32.xlu1 %v3866_v56, %s3665_s6  ;;  %v3882_v11 = vpack.i.bf16 %v2736_v4, %v2735_v15  ;;  %v218_v13 = vshrl.u32 %v214_v51, 16  ;;  %v224_v18 = vadd.s32 %v222_v8, %v216_v0  ;;  %vm225_vm8 = vc.u32 %v223_v7, %v219_v3  ;;  %v3939_v0 = vld [vmem:[%s5879_s1] sm:$0xff]  ;;  %v3950_v3 = vld [vmem:[%s5879_s1 + $0x8] sm:$0xff] }
  0x42   :  { %v369_v14 = vsel %vm363_vm1, %v368_v61, %v367_v58  ;;  %v203_v22 = vmul.u32 384, %v202_v10  ;;  %v226_v27 = vsel %vm225_vm8, 1, %v3661_v1  ;;  %v220_v28 = vshrl.u32 %v215_v55, 16 }
  0x43   :  { %vm376_vm11 = vcmp.ne.s32.totalorder %v369_v14, 0  ;;  %vm383_vm12 = vcmp.lt.s32.totalorder %v369_v14, 0  ;;  %v397_v9 = vadd.s32 16, %v369_v14  ;;  %v228_v29 = vadd.s32 %v226_v27, %v224_v18 }
  0x44   :  { %vm390_vm13 = vmand %vm383_vm12, %vm376_vm11  ;;  %v204_v30 = vsub.s32 %v3775_v31, %v203_v22 }
  0x45   :  { %v404_v21 = vsel %vm390_vm13, %v397_v9, %v369_v14  ;;  %v229_v34 = vadd.s32 %v228_v29, %v218_v13 }
  0x46   :  { %vm453_vm14 = vcmp.le.s32.totalorder %v404_v21, 14  ;;  %vm425_vm1 = vcmp.ge.s32.totalorder %v404_v21, 1  ;;  %vm269_vm2 = vcmp.ne.s32.totalorder %v204_v30, 0  ;;  %vm276_vm4 = vcmp.lt.s32.totalorder %v204_v30, 0 }
  0x47   :  { %vm460_vm0 = vmand %vm313_vm10, %vm453_vm14  ;;  %v290_v1 = vadd.s32 384, %v204_v30  ;;  %v230_v35 = vadd.s32 %v229_v34, %v220_v28 }
  0x48   :  { %v3889_v32 = vsel %vm460_vm0, 1.0, %v5884_v17  ;;  %vm283_vm5 = vmand %vm276_vm4, %vm269_vm2 }
  0x49   :  { %2861 = vrot.lane.b32.xlu1 %v3882_v11, %s3664_s2  ;;  %557 = vrot.lane.b32.xlu0 %v3889_v32, %s3664_s2  ;;  %vm432_vm3 = vmand %vm313_vm10, %vm425_vm1  ;;  %v3897_v31 = vsel %vm283_vm5, %v290_v1, %v204_v30  ;;  %v231_v36 = vshrl.u32 %v230_v35, 8 }
  0x4a   :  { %6020 = vst [vmem:[#allocation15_spill] sm:$0xff] %v3897_v31  ;;  %vm349_vm6 = vcmp.lt.s32.totalorder %v3897_v31, 0  ;;  %v350_v38 = vsub.s32 0, %v3897_v31  ;;  %v3902_v39 = vsel %vm432_vm3, 1.0, %v5884_v17  ;;  %vm311_vm2 = vcmp.lt.s32.totalorder %v3897_v31, 256 }
  0x4b   :  { %v232_v40 = vmul.u32 384, %v231_v36 }
  0x4c   :  { %v351_v23 = vsel %vm349_vm6, %v350_v38, %v3897_v31 }
  0x4d   :  { %v353_v16 = vand.u32 15, %v351_v23  ;;  %v233_v41 = vsub.s32 %v3790_v50, %v232_v40 }
  0x4f   :  { %v354_v24 = vsub.s32 0, %v353_v16  ;;  %vm270_vm11 = vcmp.ne.s32.totalorder %v233_v41, 0  ;;  %vm277_vm12 = vcmp.lt.s32.totalorder %v233_v41, 0  ;;  %v291_v2 = vadd.s32 384, %v233_v41 }
  0x50   :  { %vm284_vm13 = vmand %vm277_vm12, %vm270_vm11 }
  0x51   :  { %2871 = vrot.lane.b32.xlu1 %v3866_v56, %s3663_s28  ;;  %941 = vrot.lane.b32.xlu0 %v3902_v39, %s3663_s28  ;;  %v355_v43 = vsel %vm349_vm6, %v354_v24, %v353_v16  ;;  %v3910_v44 = vsel %vm284_vm13, %v291_v2, %v233_v41 }
  0x52   :  { %6021 = vst [vmem:[#allocation16_spill] sm:$0xff] %v3910_v44  ;;  %vm374_vm8 = vcmp.ne.s32.totalorder %v355_v43, 0  ;;  %vm381_vm14 = vcmp.lt.s32.totalorder %v355_v43, 0  ;;  %v395_v46 = vadd.s32 16, %v355_v43  ;;  %vm356_vm0 = vcmp.lt.s32.totalorder %v3910_v44, 0 }
  0x53   :  { %v357_v50 = vsub.s32 0, %v3910_v44  ;;  %vm388_vm1 = vmand %vm381_vm14, %vm374_vm8  ;;  %vm312_vm12 = vcmp.lt.s32.totalorder %v3910_v44, 256 }
  0x54   :  { %v402_v48 = vsel %vm388_vm1, %v395_v46, %v355_v43 }
  0x55   :  { %v358_v47 = vsel %vm356_vm0, %v357_v50, %v3910_v44  ;;  %vm423_vm4 = vcmp.ge.s32.totalorder %v402_v48, 1  ;;  %vm451_vm11 = vcmp.le.s32.totalorder %v402_v48, 14 }
  0x56   :  { %v360_v49 = vand.u32 15, %v358_v47  ;;  %vm430_vm6 = vmand %vm311_vm2, %vm423_vm4 }
  0x57   :  { %v2731_v55 = vsel %vm430_vm6, 1.0, %v5884_v17  ;;  %vm458_vm1 = vmand %vm311_vm2, %vm451_vm11  ;;  %vm515_vm6 = vcmask 908288   ;;  %vm979_vm11 = vcmask 7168  }
  0x58   :  { %v361_v51 = vsub.s32 0, %v360_v49  ;;  %v2737_v60 = vsel %vm458_vm1, 1.0, %v5884_v17  ;;  %vm747_vm1 = vcmask 195584  }
  0x59   :  { %2881 = vrot.lane.b32.xlu1 %v3828_v33, %s3666_s7 }
  0x5a   :  { %v362_v52 = vsel %vm356_vm0, %v361_v51, %v360_v49 }
  0x5b   :  { %vm375_vm5 = vcmp.ne.s32.totalorder %v362_v52, 0  ;;  %vm382_vm3 = vcmp.lt.s32.totalorder %v362_v52, 0  ;;  %v396_v53 = vadd.s32 16, %v362_v52 }
  0x5c   :  { %vm389_vm13 = vmand %vm382_vm3, %vm375_vm5  ;;  %vm608_vm5 = vcmask 1039360   ;;  %vm559_vm3 = vcmask 924672  }
  0x5d   :  { %v403_v54 = vsel %vm389_vm13, %v396_v53, %v362_v52  ;;  %vm1328_vm13 = vcmask 121856  }
  0x5e   :  { %vm424_vm8 = vcmp.ge.s32.totalorder %v403_v54, 1  ;;  %vm452_vm14 = vcmp.le.s32.totalorder %v403_v54, 14 }
  0x5f   :  { %vm431_vm0 = vmand %vm312_vm12, %vm424_vm8  ;;  %vm704_vm8 = vcmask 138240  }
  0x60   :  { %v2732_v58 = vsel %vm431_vm0, 1.0, %v5884_v17  ;;  %vm459_vm4 = vmand %vm312_vm12, %vm452_vm14  ;;  %vm640_vm14 = vcmask 1031168  }
  0x61   :  { %v2855_v59 = vpack.i.bf16 %v2732_v58, %v2731_v55  ;;  %v2738_v61 = vsel %vm459_vm4, 1.0, %v5884_v17  ;;  %1035 = vrot.lane.b32.xlu1 %v3950_v3, %s3667_s10 }
  0x62   :  { %v3931_v15 = vpack.i.bf16 %v2738_v61, %v2737_v60 }
  0x63   :  { %2856 = vrot.lane.b32.xlu2 %v2855_v59, %s3665_s6 }
  0x64   :  { %2891 = vrot.lane.b32.xlu0 %v3931_v15, %s3666_s7 }
  0x69   :  { %2906 = vrot.lane.b32.xlu1 %v2855_v59, %s3668_s11 }
  0x6b   :  { %513 = vrot.lane.b32.xlu2 %v3902_v39, %s3665_s6 }
  0x6c   :  { %1033 = vrot.lane.b32.xlu0 %v3939_v0, %s3667_s10 }
  0x6e   :  { %v2822_v7 = vpop.permute.xlu2 %2821 }
  0x6f   :  { %v2824_v8 = vunpack.i.h.bf16 %v2822_v7  ;;  %v2823_v9 = vunpack.i.l.bf16 %v2822_v7 }
  0x71   :  { %v611_v22 = vsel %vm608_vm5, %v2823_v9, %v2824_v8  ;;  %2916 = vrot.lane.b32.xlu1 %v3882_v11, %s3669_s14 }
  0x73   :  { %2866 = vrot.lane.b32.xlu2 %v3931_v15, %s3664_s2 }
  0x74   :  { %2901 = vrot.lane.b32.xlu0 %v3866_v56, %s3668_s11 }
  0x7b   :  { %2876 = vrot.lane.b32.xlu2 %v2855_v59, %s3663_s28 }
  0x7c   :  { %2911 = vrot.lane.b32.xlu0 %v3828_v33, %s3669_s14 }
  0x7f   :  { %v3956_v4 = vpop.permute.xlu0 %486 }
  0x81   :  { %v2817_v56 = vpop.permute.xlu1 %2816 }
  0x82   :  { %v3973_v1 = vunpack.i.h.bf16 %v2817_v56  ;;  %v4016_v59 = vunpack.i.l.bf16 %v2817_v56 }
  0x83   :  { %2886 = vrot.lane.b32.xlu2 %v3882_v11, %s3666_s7 }
  0x84   :  { %v610_v38 = vsel %vm608_vm5, %v3973_v1, %v2823_v9  ;;  %6024 = vst [vmem:[#allocation19_spill] sm:$0xff] %v4016_v59 }
  0x87   :  { %v3960_v6 = vpop.permute.xlu0 %491 }
  0x89   :  { %v2832_v14 = vpop.permute.xlu1 %2831 }
  0x8a   :  { %v2833_v10 = vunpack.i.l.bf16 %v2832_v14  ;;  %v3963_v18 = vunpack.i.h.bf16 %v2832_v14  ;;  %v609_v14 = vsel %vm608_vm5, %v4016_v59, %v3973_v1 }
  0x8b   :  { %2896 = vrot.lane.b32.xlu2 %v3835_v37, %s3668_s11 }
  0x8c   :  { %v615_v30 = vsel %vm608_vm5, %v2833_v10, %v3963_v18 }
  0x8f   :  { %v2827_v13 = vpop.permute.xlu0 %2826 }
  0x90   :  { %v2829_v33 = vunpack.i.h.bf16 %v2827_v13  ;;  %v2828_v21 = vunpack.i.l.bf16 %v2827_v13 }
  0x92   :  { %v613_v27 = vsel %vm608_vm5, %v2828_v21, %v2829_v33  ;;  %v614_v28 = vsel %vm608_vm5, %v2829_v33, %v2833_v10  ;;  %v612_v37 = vsel %vm608_vm5, %v2824_v8, %v2828_v21  ;;  %v2925_v10 = vpack.i.bf16 %v610_v38, %v609_v14 }
  0x93   :  { %1326 = vrot.lane.b32.xlu2 %v3902_v39, %s3668_s11  ;;  %v2935_v29 = vpack.i.bf16 %v614_v28, %v613_v27  ;;  %v2930_v34 = vpack.i.bf16 %v612_v37, %v611_v22  ;;  %v3975_v35 = vpack.i.bf16 %v613_v27, %v612_v37  ;;  %v3977_v36 = vpack.i.bf16 %v615_v30, %v614_v28 }
  0x94   :  { %v3982_v39 = vpack.i.bf16 %v611_v22, %v610_v38  ;;  %v2940_v37 = vpack.i.bf16 %v3963_v18, %v615_v30 }
  0x95   :  { %2936 = vrot.lane.b32.xlu0 %v2935_v29, %s3669_s14 }
  0x9b   :  { %2931 = vrot.lane.b32.xlu2 %v2930_v34, %s3669_s14 }
  0x9d   :  { %2946 = vrot.lane.b32.xlu0 %v3982_v39, %s3666_s7 }
  0xa3   :  { %2956 = vrot.lane.b32.xlu2 %v3977_v36, %s3666_s7 }
  0xa8   :  { %v2842_v40 = vpop.permute.xlu0 %2841 }
  0xa9   :  { %v2844_v23 = vunpack.i.h.bf16 %v2842_v40  ;;  %v2843_v16 = vunpack.i.l.bf16 %v2842_v40  ;;  %v3990_v41 = vpop.permute.xlu1 %2836 }
  0xaa   :  { %v2839_v24 = vunpack.i.h.bf16 %v3990_v41  ;;  %v2838_v2 = vunpack.i.l.bf16 %v3990_v41 }
  0xab   :  { %v3995_v43 = vsel %vm559_vm3, %v2843_v16, %v2844_v23  ;;  %v574_v46 = vmul.f32 0.0, %v2843_v16 }
  0xac   :  { %6022 = vst [vmem:[#allocation17_spill] sm:$0xff] %v3995_v43  ;;  %v4000_v11 = vsel %vm515_vm6, %v2838_v2, %v2839_v24  ;;  %v530_v50 = vmul.f32 0.0, %v2838_v2  ;;  %v575_v47 = vmul.f32 %v3995_v43, %v3724_v12 }
  0xad   :  { %6023 = vst [vmem:[#allocation18_spill] sm:$0xff] %v4000_v11  ;;  %v531_v48 = vmul.f32 %v4000_v11, %v3724_v12 }
  0xae   :  { %v2960_v49 = vpack.i.bf16 %v575_v47, %v574_v46 }
  0xaf   :  { %v2965_v51 = vpack.i.bf16 %v531_v48, %v530_v50 }
  0xb0   :  { %v4006_v52 = vpop.permute.xlu0 %2846  ;;  %2961 = vrot.lane.b32.xlu2 %v2960_v49, %s3670_s15 }
  0xb1   :  { %v5886_v53 = vunpack.i.l.bf16 %v4006_v52  ;;  %2966 = vrot.lane.b32.xlu0 %v2965_v51, %s3669_s14 }
  0xb3   :  { %v4010_v54 = vpop.permute.xlu1 %2851  ;;  %v957_v55 = vmul.f32 0.0, %v5886_v53 }
  0xb4   :  { %v2853_v14 = vunpack.i.l.bf16 %v4010_v54 }
  0xb5   :  { %v2920_v58 = vpack.i.bf16 %v957_v55, %v3889_v32 }
  0xb7   :  { %2921 = vrot.lane.b32.xlu1 %v2920_v58, %s3666_s7 }
  0xbb   :  { %v2862_v60 = vpop.permute.xlu1 %2861  ;;  %v4036_v28 = vpop.permute.xlu0 %557 }
  0xbc   :  { %v2864_v61 = vunpack.i.h.bf16 %v2862_v60  ;;  %v2863_v7 = vunpack.i.l.bf16 %v2862_v60  ;;  %6027 = vst [vmem:[#allocation22_spill] sm:$0xff] %v4036_v28 }
  0xbd   :  { %v2857_v33 = vpop.permute.xlu2 %2856 }
  0xbe   :  { %v4023_v8 = vsel %vm559_vm3, %v2844_v23, %v2863_v7  ;;  %v4026_v9 = vsel %vm559_vm3, %v2863_v7, %v2864_v61  ;;  %v2859_v27 = vunpack.i.h.bf16 %v2857_v33 }
  0xbf   :  { %6025 = vst [vmem:[#allocation20_spill] sm:$0xff] %v4023_v8  ;;  %v576_v56 = vmul.f32 %v4023_v8, %v3762_v62  ;;  %v577_v13 = vmul.f32 %v4026_v9, %v3764_v63  ;;  %2926 = vrot.lane.b32.xlu1 %v2925_v10, %s3669_s14 }
  0xc0   :  { %6026 = vst [vmem:[#allocation21_spill] sm:$0xff] %v4026_v9 }
  0xc1   :  { %v2980_v21 = vpack.i.bf16 %v577_v13, %v576_v56 }
  0xc3   :  { %v4033_v22 = vpop.permute.xlu1 %2871  ;;  %2981 = vrot.lane.b32.xlu0 %v2980_v21, %s3670_s15  ;;  %v942_v55 = vpop.permute.xlu0 %941 }
  0xc4   :  { %v964_v13 = vmul.f32 %v942_v55, %v3745_v26 }
  0xc5   :  { %v514_v29 = vpop.permute.xlu2 %513 }
  0xc6   :  { %v4040_v34 = vsel %vm515_vm6, %v2859_v27, %v514_v29  ;;  %v537_v38 = vmul.f32 %v514_v29, %v3745_v26 }
  0xc7   :  { %6028 = vst [vmem:[#allocation23_spill] sm:$0xff] %v4040_v34  ;;  %2941 = vrot.lane.b32.xlu1 %v2940_v37, %s3669_s14  ;;  %v536_v40 = vmul.f32 %v4040_v34, %v3743_v25 }
  0xc9   :  { %v3005_v46 = vpack.i.bf16 %v537_v38, %v536_v40 }
  0xcb   :  { %v2882_v23 = vpop.permute.xlu1 %2881  ;;  %3006 = vrot.lane.b32.xlu0 %v3005_v46, %s3669_s14 }
  0xcc   :  { %v2884_v16 = vunpack.i.h.bf16 %v2882_v23  ;;  %v4046_v2 = vunpack.i.l.bf16 %v2882_v23 }
  0xcd   :  { %v2867_v48 = vpop.permute.xlu2 %2866 }
  0xce   :  { %6029 = vst [vmem:[#allocation24_spill] sm:$0xff] %v4046_v2  ;;  %v4050_v30 = vsel %vm979_vm11, %v4046_v2, %v2884_v16  ;;  %v994_v50 = vmul.f32 %v4046_v2, %v3724_v12  ;;  %v2869_v49 = vunpack.i.h.bf16 %v2867_v48  ;;  %v2868_v51 = vunpack.i.l.bf16 %v2867_v48 }
  0xcf   :  { %6030 = vst [vmem:[#allocation25_spill] sm:$0xff] %v4050_v30  ;;  %v995_v47 = vmul.f32 %v4050_v30, %v3762_v62  ;;  %2951 = vrot.lane.b32.xlu1 %v3975_v35, %s3666_s7  ;;  %v2854_v12 = vunpack.i.h.bf16 %v4010_v54  ;;  %v2975_v54 = vpack.i.bf16 %v3973_v1, %v964_v13 }
  0xd0   :  { %v4060_v60 = vsel %vm559_vm3, %v2868_v51, %v2869_v49  ;;  %v4063_v7 = vsel %vm559_vm3, %v2864_v61, %v2868_v51  ;;  %v4076_v61 = vsel %vm515_vm6, %v2839_v24, %v2853_v14  ;;  %v4087_v40 = vsel %vm559_vm3, %v2869_v49, %v4036_v28 }
  0xd1   :  { %v2970_v58 = vpack.i.bf16 %v995_v47, %v994_v50  ;;  %6031 = vst [vmem:[#allocation26_spill] sm:$0xff] %v4060_v60  ;;  %v578_v10 = vmul.f32 %v4063_v7, %v3735_v19  ;;  %v579_v56 = vmul.f32 %v4060_v60, %v3737_v20  ;;  %v4079_v37 = vsel %vm515_vm6, %v2853_v14, %v2854_v12 }
  0xd2   :  { %6032 = vst [vmem:[#allocation27_spill] sm:$0xff] %v4063_v7  ;;  %v532_v23 = vmul.f32 %v4076_v61, %v3762_v62  ;;  %v533_v46 = vmul.f32 %v4079_v37, %v3764_v63  ;;  %v2858_v50 = vunpack.i.l.bf16 %v2857_v33  ;;  %v580_v1 = vmul.f32 %v4087_v40, %v3743_v25 }
  0xd3   :  { %2971 = vrot.lane.b32.xlu2 %v2970_v58, %s3670_s15  ;;  %v2985_v21 = vpack.i.bf16 %v579_v56, %v578_v10  ;;  %6033 = vst [vmem:[#allocation28_spill] sm:$0xff] %v4076_v61  ;;  %v581_v47 = vmul.f32 %v4036_v28, %v3745_v26  ;;  %v2874_v33 = vunpack.i.h.bf16 %v4033_v22  ;;  %v6052_v7 = vunpack.i.l.bf16 %v4033_v22 }
  0xd4   :  { %6034 = vst [vmem:[#allocation29_spill] sm:$0xff] %v4079_v37  ;;  %v2995_v49 = vpack.i.bf16 %v533_v46, %v532_v23  ;;  %v4106_v51 = vsel %vm515_vm6, %v2858_v50, %v2859_v27  ;;  %v4109_v58 = vsel %vm515_vm6, %v2854_v12, %v2858_v50  ;;  %v5893_v23 = vunpack.i.l.bf16 %v4033_v22 }
  0xd5   :  { %v2877_v29 = vpop.permute.xlu2 %2876  ;;  %6035 = vst [vmem:[#allocation30_spill] sm:$0xff] %v4087_v40  ;;  %v2990_v26 = vpack.i.bf16 %v581_v47, %v580_v1  ;;  %v534_v1 = vmul.f32 %v4109_v58, %v3735_v19 }
  0xd6   :  { %v4083_v38 = vpop.permute.xlu0 %2891  ;;  %6037 = vst [vmem:[#allocation32_spill] sm:$0xff] %v4106_v51  ;;  %v2878_v10 = vunpack.i.l.bf16 %v2877_v29 }
  0xd7   :  { %2986 = vrot.lane.b32.xlu1 %v2985_v21, %s3670_s15  ;;  %v5887_v41 = vunpack.i.h.bf16 %v4083_v38  ;;  %v2893_v24 = vunpack.i.l.bf16 %v4083_v38  ;;  %6038 = vst [vmem:[#allocation33_spill] sm:$0xff] %v4109_v58 }
  0xd9   :  { %v4103_v48 = vsel %vm979_vm11, %v2893_v24, %v5887_v41 }
  0xda   :  { %6036 = vst [vmem:[#allocation31_spill] sm:$0xff] %v4103_v48  ;;  %v999_v27 = vmul.f32 %v4103_v48, %v3743_v25 }
  0xdb   :  { %2976 = vrot.lane.b32.xlu2 %v2975_v54, %s3666_s7  ;;  %v2879_v54 = vunpack.i.h.bf16 %v2877_v29 }
  0xdd   :  { %v2887_v14 = vpop.permute.xlu2 %2886 }
  0xde   :  { %v2889_v56 = vunpack.i.h.bf16 %v2887_v14  ;;  %v2888_v13 = vunpack.i.l.bf16 %v2887_v14  ;;  %v4113_v21 = vpop.permute.xlu0 %1033  ;;  %v4144_v14 = vsel %vm608_vm5, %v5893_v23, %v2874_v33 }
  0xdf   :  { %2996 = vrot.lane.b32.xlu1 %v2995_v49, %s3669_s14  ;;  %6043 = vst [vmem:[#allocation38_spill] sm:$0xff] %v4144_v14  ;;  %v960_v53 = vmul.f32 %v4144_v14, %v3764_v63 }
  0xe0   :  { %v4119_v12 = vsel %vm979_vm11, %v2888_v13, %v2889_v56  ;;  %v4122_v46 = vsel %vm979_vm11, %v2884_v16, %v2888_v13  ;;  %v4125_v50 = vsel %vm979_vm11, %v2889_v56, %v2893_v24  ;;  %v535_v16 = vmul.f32 %v4106_v51, %v3737_v20 }
  0xe1   :  { %6039 = vst [vmem:[#allocation34_spill] sm:$0xff] %v4119_v12  ;;  %v996_v29 = vmul.f32 %v4122_v46, %v3764_v63  ;;  %v997_v47 = vmul.f32 %v4119_v12, %v3735_v19  ;;  %v998_v49 = vmul.f32 %v4125_v50, %v3737_v20  ;;  %v4139_v24 = vsel %vm608_vm5, %v2874_v33, %v2878_v10 }
  0xe2   :  { %6040 = vst [vmem:[#allocation35_spill] sm:$0xff] %v4122_v46  ;;  %v4147_v56 = vsel %vm608_vm5, %v2879_v54, %v942_v55  ;;  %v4150_v13 = vsel %vm608_vm5, %v2878_v10, %v2879_v54  ;;  %v961_v41 = vmul.f32 %v4139_v24, %v3735_v19  ;;  %v3000_v33 = vpack.i.bf16 %v535_v16, %v534_v1 }
  0xe3   :  { %6041 = vst [vmem:[#allocation36_spill] sm:$0xff] %v4125_v50  ;;  %2991 = vrot.lane.b32.xlu2 %v2990_v26, %s3670_s15  ;;  %v3010_v26 = vpack.i.bf16 %v997_v47, %v996_v29  ;;  %v3015_v17 = vpack.i.bf16 %v999_v27, %v998_v49  ;;  %v962_v54 = vmul.f32 %v4150_v13, %v3737_v20  ;;  %v4180_v47 = vpop.permute.xlu1 %1035  ;;  %v6050_v51 = vunpack.i.h.bf16 %v4083_v38 }
  0xe4   :  { %6042 = vst [vmem:[#allocation37_spill] sm:$0xff] %v4139_v24  ;;  %v963_v27 = vmul.f32 %v4147_v56, %v3743_v25  ;;  %v2849_v50 = vunpack.i.h.bf16 %v4006_v52 }
  0xe5   :  { %6044 = vst [vmem:[#allocation39_spill] sm:$0xff] %v4147_v56  ;;  %3011 = vrot.lane.b32.xlu0 %v3010_v26, %s3670_s15  ;;  %v4157_v28 = vpop.permute.xlu2 %2896 }
  0xe6   :  { %6045 = vst [vmem:[#allocation40_spill] sm:$0xff] %v4150_v13  ;;  %v2899_v55 = vunpack.i.h.bf16 %v4157_v28  ;;  %v5890_v10 = vunpack.i.l.bf16 %v4157_v28  ;;  %v4166_v63 = vpop.permute.xlu0 %2901  ;;  %v3035_v20 = vpack.i.bf16 %v963_v27, %v962_v54  ;;  %v4196_v27 = vld [vmem:[#allocation2] sm:$0xff]  ;;  %v4255_v38 = vsel %vm608_vm5, %v2849_v50, %v6052_v7 }
  0xe7   :  { %3016 = vrot.lane.b32.xlu1 %v3015_v17, %s3670_s15  ;;  %v5891_v19 = vunpack.i.l.bf16 %v4166_v63  ;;  %v3030_v17 = vpack.i.bf16 %v961_v41, %v960_v53  ;;  %v5898_v53 = vunpack.i.h.bf16 %v4166_v63  ;;  %6053 = vst [vmem:[#allocation46_spill] sm:$0xff] %v4255_v38  ;;  %v959_v22 = vmul.f32 %v4255_v38, %v3762_v62 }
  0xe8   :  { %v4172_v1 = vsel %vm1328_vm13, %v5890_v10, %v2899_v55  ;;  %v6059_v11 = vunpack.i.h.bf16 %v4166_v63  ;;  %v6060_v57 = vunpack.i.l.bf16 %v4166_v63 }
  0xe9   :  { %6046 = vst [vmem:[#allocation41_spill] sm:$0xff] %v4172_v1  ;;  %v4178_v29 = vsel %vm1328_vm13, %v2899_v55, %v5891_v19 }
  0xeb   :  { %3001 = vrot.lane.b32.xlu2 %v3000_v33, %s3669_s14  ;;  %v2907_v41 = vpop.permute.xlu1 %2906 }
  0xec   :  { %v2909_v33 = vunpack.i.h.bf16 %v2907_v41  ;;  %v2908_v55 = vunpack.i.l.bf16 %v2907_v41 }
  0xed   :  { %3031 = vrot.lane.b32.xlu0 %v3030_v17, %s3666_s7  ;;  %v4194_v54 = vpop.permute.xlu2 %1326 }
  0xee   :  { %v4184_v25 = vpop.permute.xlu0 %2911  ;;  %v4206_v10 = vsel %vm1328_vm13, %v5898_v53, %v2908_v55  ;;  %v4209_v19 = vsel %vm1328_vm13, %v2908_v55, %v2909_v33 }
  0xef   :  { %3036 = vrot.lane.b32.xlu1 %v3035_v20, %s3666_s7  ;;  %v5892_v49 = vunpack.i.h.bf16 %v4184_v25  ;;  %v2913_v16 = vunpack.i.l.bf16 %v4184_v25  ;;  %v4201_v20 = vsel %vm1328_vm13, %v2909_v33, %v4194_v54  ;;  %6048 = vst [vmem:[#allocation43_spill] sm:$0xff] %v4206_v10 }
  0xf0   :  { %6049 = vst [vmem:[#allocation44_spill] sm:$0xff] %v4209_v19 }
  0xf1   :  { %v4192_v26 = vsel %vm704_vm8, %v2913_v16, %v5892_v49  ;;  %v1379_v17 = vmul.f32 %v4196_v27, %v2913_v16 }
  0xf2   :  { %6047 = vst [vmem:[#allocation42_spill] sm:$0xff] %v4192_v26  ;;  %v1380_v41 = vmul.f32 %v4192_v26, %v3762_v62 }
  0xf4   :  { %v3060_v49 = vpack.i.bf16 %v1380_v41, %v1379_v17  ;;  %v4229_v17 = vpop.permute.xlu1 %2916 }
  0xf5   :  { %v4214_v23 = vpop.permute.xlu2 %2931  ;;  %v5958_v8 = vunpack.i.h.bf16 %v4229_v17 }
  0xf6   :  { %v5908_v56 = vunpack.i.h.bf16 %v4214_v23 }
  0xf7   :  { %3061 = vrot.lane.b32.xlu1 %v3060_v49, %s3670_s15 }
  0xfd   :  { %v4227_v55 = vpop.permute.xlu2 %2956 }
  0xfe   :  { %v5951_v43 = vunpack.i.l.bf16 %v4227_v55 }
 0x107   :  { %v4216_v16 = vpop.permute.xlu0 %2936 }
 0x108   :  { %v5907_v40 = vunpack.i.l.bf16 %v4216_v16  ;;  %v5943_v46 = vunpack.i.h.bf16 %v4216_v16 }
 0x10a   :  { %v4225_v33 = vsel %vm704_vm8, %v5908_v56, %v5907_v40  ;;  %v2962_v49 = vpop.permute.xlu2 %2961 }
 0x10b   :  { %v2964_v12 = vunpack.i.h.bf16 %v2962_v49 }
 0x10f   :  { %v4231_v41 = vpop.permute.xlu0 %2946 }
 0x123   :  { %v4236_v34 = vpop.permute.xlu0 %2966 }
 0x129   :  { %v4233_v53 = vpop.permute.xlu1 %2921 }
 0x12a   :  { %v2923_v48 = vunpack.i.l.bf16 %v4233_v53 }
 0x12c   :  { %v4243_v40 = vsel %vm979_vm11, %v6050_v51, %v2923_v48  ;;  %v1001_v56 = vmul.f32 0.0, %v2923_v48  ;;  %v6054_v51 = vunpack.i.l.bf16 %v4006_v52 }
 0x12d   :  { %v4238_v13 = vpop.permute.xlu2 %2971  ;;  %6051 = vst [vmem:[#allocation45_spill] sm:$0xff] %v4243_v40  ;;  %v1000_v60 = vmul.f32 %v4246_v45, %v4243_v40 }
 0x12e   :  { %v2973_v44 = vunpack.i.l.bf16 %v4238_v13  ;;  %v4264_v40 = vsel %vm608_vm5, %v6054_v51, %v2849_v50 }
 0x12f   :  { %v3020_v24 = vpack.i.bf16 %v1001_v56, %v1000_v60  ;;  %6055 = vst [vmem:[#allocation47_spill] sm:$0xff] %v4264_v40  ;;  %v5936_v60 = vunpack.i.l.bf16 %v4214_v23  ;;  %v958_v52 = vmul.f32 %v4196_v27, %v4264_v40  ;;  %v2963_v40 = vunpack.i.l.bf16 %v2962_v49 }
 0x130   :  { %v3040_v31 = vpack.i.bf16 %v2973_v44, %v3963_v18 }
 0x131   :  { %v4258_v48 = vpop.permute.xlu1 %2926  ;;  %3021 = vrot.lane.b32.xlu2 %v3020_v24, %s3670_s15  ;;  %v2974_v24 = vunpack.i.h.bf16 %v4238_v13  ;;  %v3025_v51 = vpack.i.bf16 %v959_v22, %v958_v52 }
 0x132   :  { %3041 = vrot.lane.b32.xlu0 %v3040_v31, %s3666_s7  ;;  %v5937_v14 = vunpack.i.h.bf16 %v4258_v48  ;;  %v5938_v31 = vunpack.i.l.bf16 %v4231_v41 }
 0x133   :  { %v4295_v13 = vsel %vm640_vm14, %v2973_v44, %v2974_v24 }
 0x134   :  { %v4281_v50 = vsel %vm704_vm8, %v5937_v14, %v5936_v60 }
 0x135   :  { %v4268_v56 = vpop.permute.xlu2 %2976  ;;  %v2982_v26 = vpop.permute.xlu0 %2981 }
 0x136   :  { %v2979_v7 = vunpack.i.h.bf16 %v4268_v56  ;;  %v2983_v38 = vunpack.i.l.bf16 %v2982_v26 }
 0x138   :  { %v4287_v62 = vsel %vm979_vm11, %v2979_v7, %v5938_v31  ;;  %v642_v14 = vsel %vm640_vm14, %v2964_v12, %v2983_v38  ;;  %v641_v7 = vsel %vm640_vm14, %v2963_v40, %v2964_v12 }
 0x139   :  { %v4289_v9 = vpop.permute.xlu1 %2941  ;;  %3026 = vrot.lane.b32.xlu2 %v3025_v51, %s3666_s7  ;;  %v3045_v52 = vpack.i.bf16 %v642_v14, %v641_v7  ;;  %v5945_v51 = vunpack.i.h.bf16 %v4231_v41  ;;  %v6056_v7 = vunpack.i.h.bf16 %v4184_v25  ;;  %v3574_v25 = vld [vmem:[#allocation2 + $0x18] sm:$0xff] }
 0x13a   :  { %v5944_v60 = vunpack.i.l.bf16 %v4289_v9 }
 0x13c   :  { %v4303_v22 = vsel %vm704_vm8, %v5943_v46, %v5944_v60  ;;  %v2918_v46 = vunpack.i.l.bf16 %v4229_v17 }
 0x13d   :  { %v2992_v14 = vpop.permute.xlu2 %2991 }
 0x13e   :  { %v4337_v60 = vsel %vm704_vm8, %v2918_v46, %v5958_v8  ;;  %v2993_v2 = vunpack.i.l.bf16 %v2992_v14  ;;  %v4353_v8 = vpop.permute.xlu0 %3006 }
 0x13f   :  { %6058 = vst [vmem:[#allocation49_spill] sm:$0xff] %v4337_v60 }
 0x141   :  { %v4306_v49 = vpop.permute.xlu1 %2951  ;;  %3046 = vrot.lane.b32.xlu2 %v3045_v52, %s3669_s14  ;;  %v4332_v52 = vsel %vm704_vm8, %v6056_v7, %v2918_v46  ;;  %v1382_v7 = vmul.f32 %v3574_v25, %v4337_v60  ;;  %v2994_v60 = vunpack.i.h.bf16 %v2992_v14 }
 0x142   :  { %v5952_v44 = vunpack.i.h.bf16 %v4306_v49  ;;  %v5946_v31 = vunpack.i.l.bf16 %v4306_v49  ;;  %6057 = vst [vmem:[#allocation48_spill] sm:$0xff] %v4332_v52 }
 0x144   :  { %v4320_v40 = vsel %vm979_vm11, %v5945_v51, %v5946_v31  ;;  %v4327_v12 = vsel %vm979_vm11, %v5952_v44, %v5951_v43  ;;  %v2984_v51 = vunpack.i.h.bf16 %v2982_v26  ;;  %v3573_v44 = vld [vmem:[#allocation2 + $0x10] sm:$0xff] }
 0x145   :  { %v1381_v37 = vmul.f32 %v3573_v44, %v4332_v52  ;;  %v4420_v63 = vpop.permute.xlu2 %3001 }
 0x146   :  { %v643_v30 = vsel %vm640_vm14, %v2983_v38, %v2984_v51 }
 0x147   :  { %v3065_v52 = vpack.i.bf16 %v1382_v7, %v1381_v37 }
 0x149   :  { %v2987_v31 = vpop.permute.xlu1 %2986  ;;  %3051 = vrot.lane.b32.xlu2 %v3931_v15, %s3669_s14 }
 0x14a   :  { %v2989_v58 = vunpack.i.h.bf16 %v2987_v31  ;;  %v2988_v43 = vunpack.i.l.bf16 %v2987_v31 }
 0x14c   :  { %v644_v5 = vsel %vm640_vm14, %v2984_v51, %v2988_v43  ;;  %v4346_v46 = vsel %vm640_vm14, %v2988_v43, %v2989_v58  ;;  %v4349_v26 = vsel %vm640_vm14, %v2989_v58, %v2993_v2  ;;  %v5966_v43 = vunpack.i.h.bf16 %v4236_v34 }
 0x14d   :  { %v3055_v15 = vpack.i.bf16 %v644_v5, %v643_v30  ;;  %v647_v58 = vsel %vm640_vm14, %v2993_v2, %v2994_v60 }
 0x14e   :  { %v3085_v30 = vpack.i.bf16 %v2994_v60, %v647_v58 }
 0x14f   :  { %3056 = vrot.lane.b32.xlu0 %v3055_v15, %s3669_s14 }
 0x151   :  { %v4356_v61 = vpop.permute.xlu1 %2996  ;;  %3066 = vrot.lane.b32.xlu2 %v3065_v52, %s3670_s15 }
 0x152   :  { %v5965_v38 = vunpack.i.l.bf16 %v4356_v61 }
 0x154   :  { %v4367_v5 = vsel %vm704_vm8, %v5966_v43, %v5965_v38 }
 0x157   :  { %1363 = vrot.lane.b32.xlu0 %v3889_v32, %s3669_s14  ;;  %v3012_v37 = vpop.permute.xlu0 %3011  ;;  %v2978_v32 = vunpack.i.l.bf16 %v4268_v56 }
 0x158   :  { %v3013_v51 = vunpack.i.l.bf16 %v3012_v37  ;;  %v3014_v7 = vunpack.i.h.bf16 %v3012_v37 }
 0x159   :  { %v3017_v14 = vpop.permute.xlu1 %3016  ;;  %3086 = vrot.lane.b32.xlu2 %v3085_v30, %s3669_s14 }
 0x15a   :  { %v4373_v52 = vsel %vm640_vm14, %v2974_v24, %v3013_v51  ;;  %v3018_v31 = vunpack.i.l.bf16 %v3017_v14  ;;  %v1028_v30 = vsel %vm640_vm14, %v3013_v51, %v3014_v7  ;;  %v4406_v51 = vsel %vm1328_vm13, %v6060_v57, %v6059_v11 }
 0x15b   :  { %6061 = vst [vmem:[#allocation50_spill] sm:$0xff] %v4406_v51  ;;  %v3019_v42 = vunpack.i.h.bf16 %v3017_v14  ;;  %v1387_v57 = vsel %vm608_vm5, %v3963_v18, %v4016_v59  ;;  %v2924_v14 = vunpack.i.h.bf16 %v4233_v53  ;;  %v2928_v53 = vunpack.i.l.bf16 %v4258_v48 }
 0x15c   :  { %v1029_v37 = vsel %vm640_vm14, %v3014_v7, %v3018_v31  ;;  %v1345_v7 = vmul.f32 %v3573_v44, %v4178_v29  ;;  %v3140_v11 = vpack.i.bf16 %v4016_v59, %v1387_v57  ;;  %v2968_v57 = vunpack.i.l.bf16 %v4236_v34 }
 0x15d   :  { %v3100_v43 = vpack.i.bf16 %v1029_v37, %v1028_v30 }
 0x15f   :  { %v4377_v15 = vpop.permute.xlu0 %3031 }
 0x160   :  { %v5971_v60 = vunpack.i.h.bf16 %v4377_v15  ;;  %v5977_v18 = vunpack.i.l.bf16 %v4377_v15 }
 0x161   :  { %v4379_v38 = vpop.permute.xlu1 %3036  ;;  %1419 = vrot.lane.b32.xlu2 %v3939_v0, %s3671_s16 }
 0x162   :  { %v5973_v24 = vunpack.i.h.bf16 %v4379_v38  ;;  %v5970_v58 = vunpack.i.l.bf16 %v4379_v38 }
 0x164   :  { %v4394_v2 = vsel %vm979_vm11, %v5971_v60, %v5970_v58  ;;  %v4399_v56 = vsel %vm979_vm11, %v5973_v24, %v2978_v32  ;;  %v1346_v58 = vmul.f32 %v3574_v25, %v4406_v51  ;;  %v1030_v32 = vsel %vm640_vm14, %v3018_v31, %v3019_v42 }
 0x165   :  { %v3009_v51 = vunpack.i.h.bf16 %v4353_v8 }
 0x166   :  { %v3105_v60 = vpack.i.bf16 %v1346_v58, %v1345_v7 }
 0x169   :  { %3101 = vrot.lane.b32.xlu2 %v3100_v43, %s3666_s7 }
 0x171   :  { %3106 = vrot.lane.b32.xlu2 %v3105_v60, %s3664_s2 }
 0x179   :  { %3121 = vrot.lane.b32.xlu2 %v3982_v39, %s3664_s2 }
 0x181   :  { %3141 = vrot.lane.b32.xlu2 %v3140_v11, %s3664_s2 }
 0x18b   :  { %v4422_v44 = vpop.permute.xlu2 %3021 }
 0x18c   :  { %v5976_v25 = vunpack.i.l.bf16 %v4422_v44 }
 0x18e   :  { %v1031_v39 = vsel %vm640_vm14, %v3019_v42, %v5976_v25  ;;  %v5980_v25 = vunpack.i.h.bf16 %v4227_v55 }
 0x18f   :  { %v3125_v43 = vpack.i.bf16 %v1031_v39, %v1030_v32  ;;  %v6062_v39 = vunpack.i.h.bf16 %v4258_v48 }
 0x193   :  { %v4428_v31 = vpop.permute.xlu2 %3026 }
 0x194   :  { %v5975_v60 = vunpack.i.h.bf16 %v4428_v31  ;;  %v5974_v58 = vunpack.i.l.bf16 %v4428_v31 }
 0x196   :  { %v4437_v30 = vsel %vm979_vm11, %v2924_v14, %v5974_v58  ;;  %v4444_v42 = vsel %vm979_vm11, %v5975_v60, %v5977_v18  ;;  %v712_v14 = vsel %vm704_vm8, %v2928_v53, %v6062_v39  ;;  %v6063_v58 = vunpack.i.h.bf16 %v4236_v34 }
 0x197   :  { %v6064_v34 = vunpack.i.h.bf16 %v4229_v17 }
 0x198   :  { %v705_v60 = vsel %vm704_vm8, %v2968_v57, %v6063_v58  ;;  %v3575_v57 = vld [vmem:[#allocation2 + $0x20] sm:$0xff] }
 0x19b   :  { %v3047_v37 = vpop.permute.xlu2 %3046 }
 0x19c   :  { %v3049_v7 = vunpack.i.h.bf16 %v3047_v37  ;;  %v3048_v32 = vunpack.i.l.bf16 %v3047_v37 }
 0x19e   :  { %v719_v11 = vsel %vm704_vm8, %v3048_v32, %v3049_v7 }
 0x19f   :  { %767 = vmatpush.msra.mxu0 %v719_v11 }
 0x1a1   :  { %768 = vmatpush.msra.mxu0 %v712_v14 }
 0x1a3   :  { %v3052_v18 = vpop.permute.xlu2 %3051  ;;  %769 = vmatpush.msra.mxu0 %v705_v60 }
 0x1a4   :  { %v4452_v24 = vpop.permute.xlu0 %3041  ;;  %v3054_v32 = vunpack.i.h.bf16 %v3052_v18  ;;  %v3053_v11 = vunpack.i.l.bf16 %v3052_v18  ;;  %2740 = vmatmul.msk.f32.vlgmr.msra.gmra.mxu0 %vm747_vm1, %v3939_v0  ;;  %v3576_v18 = vld [vmem:[#allocation2 + $0x28] sm:$0xff] }
 0x1a5   :  { %v3043_v37 = vunpack.i.l.bf16 %v4452_v24 }
 0x1a6   :  { %v4469_v58 = vsel %vm704_vm8, %v6064_v34, %v3053_v11  ;;  %v4472_v53 = vsel %vm704_vm8, %v3053_v11, %v3054_v32  ;;  %v1347_v34 = vmul.f32 %v3575_v57, %v4206_v10  ;;  %v6069_v10 = vunpack.i.l.bf16 %v4214_v23 }
 0x1a7   :  { %v4464_v48 = vsel %vm979_vm11, %v5980_v25, %v3043_v37  ;;  %6065 = vst [vmem:[#allocation51_spill] sm:$0xff] %v4469_v58  ;;  %v1383_v60 = vmul.f32 %v3575_v57, %v4469_v58  ;;  %v1384_v39 = vmul.f32 %v3576_v18, %v4472_v53 }
 0x1a8   :  { %6066 = vst [vmem:[#allocation52_spill] sm:$0xff] %v4472_v53 }
 0x1a9   :  { %v3070_v14 = vpack.i.bf16 %v1384_v39, %v1383_v60  ;;  %v1348_v60 = vmul.f32 %v3576_v18, %v4209_v19  ;;  %v3062_v18 = vpop.permute.xlu1 %3061 }
 0x1ab   :  { %v4476_v59 = vpop.permute.xlu2 %3066  ;;  %3071 = vrot.lane.b32.xlu0 %v3070_v14, %s3670_s15  ;;  %v3110_v14 = vpack.i.bf16 %v1348_v60, %v1347_v34  ;;  %v6068_v60 = vunpack.i.h.bf16 %v4214_v23  ;;  %v3008_v23 = vunpack.i.l.bf16 %v4353_v8 }
 0x1ac   :  { %v5985_v37 = vunpack.i.h.bf16 %v4476_v59  ;;  %v3068_v17 = vunpack.i.l.bf16 %v4476_v59  ;;  %2741 = vmatmul.msk.f32.gmra.mxu0 %vm747_vm1, %v3950_v3 }
 0x1ad   :  { %v714_v19 = vsel %vm704_vm8, %v6069_v10, %v6068_v60 }
 0x1ae   :  { %v4486_v11 = vsel %vm640_vm14, %v3068_v17, %v5985_v37 }
 0x1b3   :  { %1421 = vrot.lane.b32.xlu0 %v3950_v3, %s3671_s16  ;;  %v4492_v39 = vpop.permute.xlu2 %3086 }
 0x1b4   :  { %v6072_v10 = vunpack.i.l.bf16 %v4492_v39 }
 0x1bb   :  { %3111 = vrot.lane.b32.xlu0 %v3110_v14, %s3664_s2  ;;  %v4498_v58 = vpop.permute.xlu2 %1419 }
 0x1c1   :  { %v4495_v25 = vpop.permute.xlu0 %3056 }
 0x1c2   :  { %v3058_v53 = vunpack.i.l.bf16 %v4495_v25  ;;  %v5990_v57 = vunpack.i.h.bf16 %v4495_v25 }
 0x1c3   :  { %3126 = vrot.lane.b32.xlu0 %v3125_v43, %s3666_s7 }
 0x1c4   :  { %v720_v37 = vsel %vm704_vm8, %v3049_v7, %v3058_v53 }
 0x1c5   :  { %790 = vmatpush.msra.mxu1 %v720_v37  ;;  %2794 = vmatpush.msra.mxu2 %v720_v37  ;;  %v3089_v37 = vunpack.i.h.bf16 %v4492_v39 }
 0x1c7   :  { %791 = vmatpush.msra.mxu1 %v4281_v50  ;;  %2795 = vmatpush.msra.mxu2 %v4281_v50  ;;  %v721_v50 = vsel %vm704_vm8, %v3058_v53, %v5990_v57  ;;  %v2944_v53 = vunpack.i.h.bf16 %v4289_v9  ;;  %v4530_v57 = vpop.permute.xlu2 %3101  ;;  %v725_v60 = vsel %vm704_vm8, %v6072_v10, %v3089_v37  ;;  %v711_v37 = vsel %vm704_vm8, %v3008_v23, %v3009_v51 }
 0x1c8   :  { %v6077_v51 = vunpack.i.h.bf16 %v4377_v15  ;;  %v6079_v10 = vunpack.i.l.bf16 %v4157_v28  ;;  %v1350_v28 = vmul.f32 0.0, %v4194_v54  ;;  %v6081_v54 = vunpack.i.l.bf16 %v4422_v44 }
 0x1c9   :  { %v1364_v34 = vpop.permute.xlu0 %1363  ;;  %792 = vmatpush.msra.mxu1 %v4367_v5  ;;  %2796 = vmatpush.msra.mxu2 %v4367_v5 }
 0x1ca   :  { %v4509_v43 = vsel %vm704_vm8, %v3054_v32, %v1364_v34  ;;  %v1386_v7 = vmul.f32 0.0, %v1364_v34  ;;  %2742 = vmatmul.msk.f32.vlgmr.msra.gmra.mxu1 %vm747_vm1, %v3939_v0  ;;  %2743 = vmatmul.msk.f32.vlgmr.msra.gmra.mxu2 %vm747_vm1, %v3950_v3  ;;  %v3064_v32 = vunpack.i.h.bf16 %v3062_v18  ;;  %v3063_v34 = vunpack.i.l.bf16 %v3062_v18 }
 0x1cb   :  { %6067 = vst [vmem:[#allocation53_spill] sm:$0xff] %v4509_v43  ;;  %v1385_v14 = vmul.f32 %v4246_v45, %v4509_v43  ;;  %813 = vmatpush.msrb.mxu2 %v721_v50  ;;  %3131 = vrot.lane.b32.xlu0 %v3975_v35, %s3664_s2  ;;  %v6070_v43 = vunpack.i.h.bf16 %v4356_v61  ;;  %v6071_v50 = vunpack.i.l.bf16 %v4356_v61 }
 0x1cc   :  { %v1413_v18 = vsel %vm640_vm14, %v3064_v32, %v3068_v17  ;;  %v6073_v17 = vunpack.i.l.bf16 %v4289_v9 }
 0x1cd   :  { %v3075_v5 = vpack.i.bf16 %v1386_v7, %v1385_v14  ;;  %814 = vmatpush.msrb.mxu2 %v714_v19  ;;  %v707_v35 = vsel %vm704_vm8, %v6071_v50, %v6070_v43  ;;  %v3104_v19 = vunpack.i.h.bf16 %v4530_v57  ;;  %v3103_v7 = vunpack.i.l.bf16 %v4530_v57 }
 0x1ce   :  { %v1412_v43 = vsel %vm640_vm14, %v3063_v34, %v3064_v32  ;;  %v718_v14 = vsel %vm704_vm8, %v6073_v17, %v2944_v53  ;;  %v6075_v32 = vunpack.i.l.bf16 %v4306_v49  ;;  %v6076_v53 = vpack.i.bf16 %v4349_v26, %v4346_v46 }
 0x1cf   :  { %815 = vmatpush.msrb.mxu2 %v707_v35  ;;  %3076 = vrot.lane.b32.xlu1 %v3075_v5, %s3670_s15  ;;  %v3145_v50 = vpack.i.bf16 %v1413_v18, %v1412_v43  ;;  %v1110_v9 = vsel %vm979_vm11, %v3103_v7, %v3104_v19  ;;  %v6074_v5 = vunpack.i.h.bf16 %v4306_v49  ;;  %v6078_v35 = vunpack.i.l.bf16 %v4377_v15  ;;  %v3577_v49 = vld [vmem:[#allocation2 + $0x8] sm:$0xff] }
 0x1d0   :  { %v1344_v43 = vmul.f32 %v3577_v49, %v4172_v1  ;;  %v6080_v46 = vpack.i.bf16 %v4373_v52, %v4295_v13  ;;  %v6082_v52 = vunpack.i.h.bf16 %v4476_v59  ;;  %v6095_v57 = vunpack.i.h.bf16 %v4379_v38 }
 0x1d1   :  { %905 = vmatpush.msra.mxu2 %v725_v60  ;;  %v1103_v34 = vsel %vm979_vm11, %v6075_v32, %v6074_v5  ;;  %v1096_v18 = vsel %vm979_vm11, %v6078_v35, %v6077_v51  ;;  %v1343_v60 = vmul.f32 %v4196_v27, %v6079_v10  ;;  %v1349_v27 = vmul.f32 %v4246_v45, %v4201_v20 }
 0x1d2   :  { %2744 = vmatmul.msk.f32.vlgmr.msrb.gmra.mxu2 %vm747_vm1, %v3939_v0 }
 0x1d3   :  { %906 = vmatpush.msra.mxu2 %v718_v14  ;;  %3146 = vrot.lane.b32.xlu0 %v3145_v50, %s3664_s2  ;;  %v3090_v17 = vpack.i.bf16 %v1344_v43, %v1343_v60  ;;  %v3115_v26 = vpack.i.bf16 %v1350_v28, %v1349_v27  ;;  %v4612_v50 = vpop.permute.xlu2 %3106 }
 0x1d5   :  { %907 = vmatpush.msra.mxu2 %v711_v37 }
 0x1d7   :  { %1221 = vmatpush.msrb.mxu2 %v1110_v9  ;;  %3081 = vrot.lane.b32.xlu1 %v6076_v53, %s3669_s14 }
 0x1d9   :  { %1222 = vmatpush.msrb.mxu2 %v1103_v34 }
 0x1da   :  { %2745 = vmatmul.msk.f32.gmra.mxu2 %vm747_vm1, %v3950_v3 }
 0x1db   :  { %1223 = vmatpush.msrb.mxu2 %v1096_v18  ;;  %v4631_v35 = vpop.permute.xlu2 %3121 }
 0x1dc   :  { %v3123_v28 = vunpack.i.l.bf16 %v4631_v35 }
 0x1df   :  { %3091 = vrot.lane.b32.xlu1 %v3090_v17, %s3664_s2 }
 0x1e2   :  { %2752 = vmatmul.msk.f32.vlgmr.msra.gmra.mxu2 %vm747_vm1, %v3939_v0  ;;  %v3024_v0 = vunpack.i.h.bf16 %v4422_v44  ;;  %v3109_v44 = vunpack.i.h.bf16 %v4612_v50 }
 0x1e4   :  { %v1032_v45 = vsel %vm640_vm14, %v6081_v54, %v3024_v0 }
 0x1e7   :  { %3096 = vrot.lane.b32.xlu1 %v6080_v46, %s3666_s7  ;;  %v3124_v46 = vunpack.i.h.bf16 %v4631_v35 }
 0x1ea   :  { %2753 = vmatmul.msk.f32.gmra.mxu2 %vm747_vm1, %v3950_v3 }
 0x1ef   :  { %3116 = vrot.lane.b32.xlu1 %v3115_v26, %s3664_s2 }
 0x1f2   :  { %2760 = vmatmul.msk.f32.vlgmr.msrb.gmra.mxu2 %vm747_vm1, %v4113_v21 }
 0x1f7   :  { %3136 = vrot.lane.b32.xlu1 %v3977_v36, %s3664_s2 }
 0x1fa   :  { %2761 = vmatmul.msk.f32.gmra.mxu2 %vm747_vm1, %v4180_v47 }
 0x1ff   :  { %1091 = vrot.lane.b32.xlu1 %v1032_v45, %s3666_s7 }
 0x21d   :  { %v3072_v3 = vpop.permute.xlu0 %3071 }
 0x21e   :  { %v3073_v13 = vunpack.i.l.bf16 %v3072_v3  ;;  %v3074_v32 = vunpack.i.h.bf16 %v3072_v3 }
 0x220   :  { %v1415_v15 = vsel %vm640_vm14, %v6082_v52, %v3073_v13  ;;  %v1416_v10 = vsel %vm640_vm14, %v3073_v13, %v3074_v32  ;;  %v1486_v13 = vsel %vm559_vm3, %v3123_v28, %v3124_v46  ;;  %v3004_v52 = vunpack.i.h.bf16 %v4420_v63 }
 0x221   :  { %v3150_v14 = vpack.i.bf16 %v1415_v15, %v4486_v11  ;;  %v3003_v15 = vunpack.i.l.bf16 %v4420_v63  ;;  %v6088_v63 = vunpack.i.h.bf16 %v4356_v61  ;;  %v3108_v28 = vunpack.i.l.bf16 %v4612_v50  ;;  %v3578_v61 = vld [vmem:[%s5879_s1] sm:$0xff] }
 0x223   :  { %3151 = vrot.lane.b32.xlu1 %v3150_v14, %s3664_s2  ;;  %v6084_v14 = vunpack.i.h.bf16 %v4495_v25  ;;  %v708_v25 = vsel %vm704_vm8, %v6088_v63, %v3003_v15 }
 0x225   :  { %v4610_v36 = vpop.permute.xlu0 %1421 }
 0x22d   :  { %v4614_v37 = vpop.permute.xlu0 %3111 }
 0x22e   :  { %v3113_v9 = vunpack.i.l.bf16 %v4614_v37 }
 0x230   :  { %v4623_v59 = vsel %vm559_vm3, %v3109_v44, %v3113_v9 }
 0x235   :  { %v4625_v11 = vpop.permute.xlu0 %3126 }
 0x23d   :  { %v4627_v5 = vpop.permute.xlu0 %3131 }
 0x241   :  { %v3077_v34 = vpop.permute.xlu1 %3076 }
 0x242   :  { %v4629_v53 = vunpack.i.h.bf16 %v3077_v34  ;;  %v3078_v51 = vunpack.i.l.bf16 %v3077_v34 }
 0x244   :  { %6083 = vst [vmem:[#allocation54_spill] sm:$0xff] %v4629_v53  ;;  %v1418_v18 = vsel %vm640_vm14, %v3078_v51, %v4629_v53  ;;  %v1417_v60 = vsel %vm640_vm14, %v3074_v32, %v3078_v51  ;;  %v6085_v51 = vunpack.i.l.bf16 %v4492_v39  ;;  %v709_v39 = vsel %vm704_vm8, %v3003_v15, %v3004_v52 }
 0x245   :  { %v4637_v49 = vpop.permute.xlu0 %3146  ;;  %v3160_v43 = vpack.i.bf16 %v4629_v53, %v1418_v18  ;;  %v3155_v17 = vpack.i.bf16 %v1417_v60, %v1416_v10  ;;  %v6086_v10 = vunpack.i.h.bf16 %v4216_v16  ;;  %v6087_v60 = vunpack.i.l.bf16 %v4216_v16 }
 0x246   :  { %v3149_v27 = vunpack.i.h.bf16 %v4637_v49  ;;  %v3148_v26 = vunpack.i.l.bf16 %v4637_v49  ;;  %v710_v16 = vsel %vm704_vm8, %v3004_v52, %v3008_v23  ;;  %v6089_v15 = vunpack.i.h.bf16 %v4231_v41 }
 0x247   :  { %3161 = vrot.lane.b32.xlu0 %v3160_v43, %s3664_s2  ;;  %3156 = vrot.lane.b32.xlu2 %v3155_v17, %s3664_s2  ;;  %v716_v43 = vsel %vm704_vm8, %v6087_v60, %v6086_v10  ;;  %v3114_v60 = vunpack.i.h.bf16 %v4614_v37 }
 0x248   :  { %v1493_v0 = vsel %vm559_vm3, %v3148_v26, %v3149_v27 }
 0x249   :  { %v3082_v54 = vpop.permute.xlu1 %3081  ;;  %1538 = vmatpush.msra.mxu2 %v1493_v0  ;;  %v3044_v0 = vunpack.i.h.bf16 %v4452_v24 }
 0x24a   :  { %v3084_v45 = vunpack.i.h.bf16 %v3082_v54  ;;  %v3083_v3 = vunpack.i.l.bf16 %v3082_v54 }
 0x24b   :  { %1539 = vmatpush.msra.mxu2 %v1486_v13 }
 0x24c   :  { %v722_v32 = vsel %vm704_vm8, %v6084_v14, %v3083_v3  ;;  %v723_v34 = vsel %vm704_vm8, %v3083_v3, %v3084_v45  ;;  %v724_v18 = vsel %vm704_vm8, %v3084_v45, %v6085_v51  ;;  %v3579_v3 = vld [vmem:[%s5879_s1 + $0x8] sm:$0xff]  ;;  %v6090_v14 = vunpack.i.l.bf16 %v4231_v41 }
 0x24d   :  { %836 = vmatpush.msra.mxu3 %v722_v32  ;;  %859 = vmatpush.msrb.mxu0 %v723_v34  ;;  %v3129_v34 = vunpack.i.h.bf16 %v4625_v11  ;;  %v3128_v51 = vunpack.i.l.bf16 %v4625_v11 }
 0x24e   :  { %882 = vmatpush.msrb.mxu1 %v724_v18  ;;  %v1101_v32 = vsel %vm979_vm11, %v6090_v14, %v6089_v15  ;;  %v6092_v18 = vunpack.i.l.bf16 %v4428_v31  ;;  %v794_v14 = vpop.f32.mrf.mxu1 }
 0x24f   :  { %837 = vmatpush.msra.mxu3 %v4225_v33  ;;  %860 = vmatpush.msrb.mxu0 %v716_v43 }
 0x250   :  { %883 = vmatpush.msrb.mxu1 %v4303_v22 }
 0x251   :  { %v3092_v17 = vpop.permute.xlu1 %3091  ;;  %838 = vmatpush.msra.mxu3 %v708_v25  ;;  %861 = vmatpush.msrb.mxu0 %v709_v39  ;;  %v3133_v39 = vunpack.i.l.bf16 %v4627_v5 }
 0x252   :  { %v3094_v26 = vunpack.i.h.bf16 %v3092_v17  ;;  %v3093_v33 = vunpack.i.l.bf16 %v3092_v17  ;;  %884 = vmatpush.msrb.mxu1 %v710_v16  ;;  %2746 = vmatmul.msk.f32.vlgmr.msra.gmra.mxu3 %vm747_vm1, %v3578_v61  ;;  %v3142_v16 = vpop.permute.xlu2 %3141 }
 0x253   :  { %2748 = vmatmul.msk.f32.vlgmr.msrb.gmra.mxu0 %vm747_vm1, %v3578_v61  ;;  %2750 = vmatmul.msk.f32.vlgmr.msrb.gmra.mxu1 %vm747_vm1, %v3578_v61  ;;  %v3143_v37 = vunpack.i.l.bf16 %v3142_v16 }
 0x254   :  { %v1479_v22 = vsel %vm559_vm3, %v3093_v33, %v3094_v26  ;;  %v4686_v8 = vsel %vm559_vm3, %v3094_v26, %v3108_v28 }
 0x255   :  { %1540 = vmatpush.msra.mxu2 %v1479_v22  ;;  %v1483_v22 = vsel %vm559_vm3, %v3113_v9, %v3114_v60 }
 0x256   :  { %2768 = vmatmul.msk.f32.vlgmr.msra.gmra.mxu2 %vm747_vm1, %v4498_v58 }
 0x259   :  { %v3097_v23 = vpop.permute.xlu1 %3096 }
 0x25a   :  { %v3099_v54 = vunpack.i.h.bf16 %v3097_v23  ;;  %v3098_v45 = vunpack.i.l.bf16 %v3097_v23  ;;  %2747 = vmatmul.msk.f32.gmra.mxu3 %vm747_vm1, %v3579_v3  ;;  %v3144_v23 = vunpack.i.h.bf16 %v3142_v16 }
 0x25b   :  { %2749 = vmatmul.msk.f32.gmra.mxu0 %vm747_vm1, %v3579_v3  ;;  %2751 = vmatmul.msk.f32.gmra.mxu1 %vm747_vm1, %v3579_v3  ;;  %v771_v3 = vpop.f32.mrf.mxu0 }
 0x25c   :  { %v1107_v13 = vsel %vm979_vm11, %v3044_v0, %v3098_v45  ;;  %v1108_v52 = vsel %vm979_vm11, %v3098_v45, %v3099_v54  ;;  %v1109_v24 = vsel %vm979_vm11, %v3099_v54, %v3103_v7  ;;  %v6091_v7 = vunpack.i.h.bf16 %v4428_v31 }
 0x25d   :  { %1152 = vmatpush.msrb.mxu3 %v1107_v13  ;;  %1175 = vmatpush.msra.mxu0 %v1108_v52  ;;  %v1492_v52 = vsel %vm559_vm3, %v3143_v37, %v3144_v23 }
 0x25e   :  { %1198 = vmatpush.msra.mxu1 %v1109_v24  ;;  %2769 = vmatmul.msk.f32.gmra.mxu2 %vm747_vm1, %v4610_v36  ;;  %v1094_v41 = vsel %vm979_vm11, %v6092_v18, %v6091_v7 }
 0x25f   :  { %1153 = vmatpush.msrb.mxu3 %v4287_v62  ;;  %1176 = vmatpush.msra.mxu0 %v1101_v32  ;;  %v1111_v62 = vsel %vm979_vm11, %v3104_v19, %v3128_v51  ;;  %v6096_v19 = vunpack.i.l.bf16 %v4379_v38 }
 0x260   :  { %1199 = vmatpush.msra.mxu1 %v4320_v40  ;;  %v1112_v40 = vsel %vm979_vm11, %v3128_v51, %v3129_v34  ;;  %v797_v51 = vpop.f32.mrf.mxu2 }
 0x261   :  { %v4718_v10 = vpop.permute.xlu1 %3116  ;;  %1154 = vmatpush.msrb.mxu3 %v4437_v30  ;;  %1177 = vmatpush.msra.mxu0 %v1094_v41  ;;  %v6093_v30 = vunpack.i.h.bf16 %v4227_v55  ;;  %v1098_v63 = vsel %vm979_vm11, %v6096_v19, %v6095_v57 }
 0x262   :  { %v3118_v11 = vunpack.i.l.bf16 %v4718_v10  ;;  %1200 = vmatpush.msra.mxu1 %v4444_v42  ;;  %2754 = vmatmul.msk.f32.vlgmr.msrb.gmra.mxu3 %vm747_vm1, %v4113_v21  ;;  %v6094_v42 = vunpack.i.l.bf16 %v4227_v55 }
 0x263   :  { %2756 = vmatmul.msk.f32.vlgmr.msra.gmra.mxu0 %vm747_vm1, %v4113_v21  ;;  %2758 = vmatmul.msk.f32.vlgmr.msra.gmra.mxu1 %vm747_vm1, %v4113_v21  ;;  %v4833_v15 = vpop.f32.mrf.mxu0 }
 0x264   :  { %1244 = vmatpush.msra.mxu3 %v1111_v62  ;;  %1267 = vmatpush.msrb.mxu0 %v1112_v40  ;;  %v4739_v31 = vsel %vm559_vm3, %v3114_v60, %v3118_v11  ;;  %v1105_v43 = vsel %vm979_vm11, %v6094_v42, %v6093_v30 }
 0x266   :  { %1245 = vmatpush.msra.mxu3 %v4327_v12  ;;  %1268 = vmatpush.msrb.mxu0 %v1105_v43 }
 0x268   :  { %1246 = vmatpush.msra.mxu3 %v4394_v2  ;;  %1269 = vmatpush.msrb.mxu0 %v1098_v63  ;;  %v3134_v2 = vunpack.i.h.bf16 %v4627_v5  ;;  %v1481_v5 = vsel %vm559_vm3, %v3108_v28, %v3109_v44 }
 0x269   :  { %v4753_v25 = vpop.permute.xlu1 %3136 }
 0x26a   :  { %2755 = vmatmul.msk.f32.gmra.mxu3 %vm747_vm1, %v4180_v47  ;;  %v1488_v26 = vsel %vm559_vm3, %v3133_v39, %v3134_v2  ;;  %v3139_v49 = vunpack.i.h.bf16 %v4753_v25 }
 0x26b   :  { %2757 = vmatmul.msk.f32.gmra.mxu0 %vm747_vm1, %v4180_v47  ;;  %2759 = vmatmul.msk.f32.gmra.mxu1 %vm747_vm1, %v4180_v47 }
 0x26c   :  { %v1491_v13 = vsel %vm559_vm3, %v3139_v49, %v3143_v37 }
 0x271   :  { %v1092_v55 = vpop.permute.xlu1 %1091 }
 0x272   :  { %v1113_v12 = vsel %vm979_vm11, %v3129_v34, %v1092_v55  ;;  %2762 = vmatmul.msk.f32.vlgmr.msra.gmra.mxu3 %vm747_vm1, %v4113_v21 }
 0x273   :  { %2764 = vmatmul.msk.f32.vlgmr.msrb.gmra.mxu0 %vm747_vm1, %v4113_v21  ;;  %1290 = vmatpush.msrb.mxu1 %v1113_v12 }
 0x275   :  { %1291 = vmatpush.msrb.mxu1 %v4464_v48 }
 0x277   :  { %1292 = vmatpush.msrb.mxu1 %v4399_v56 }
 0x278   :  { %2766 = vmatmul.msk.f32.vlgmr.msrb.gmra.mxu1 %vm747_vm1, %v4113_v21 }
 0x27a   :  { %2763 = vmatmul.msk.f32.gmra.mxu3 %vm747_vm1, %v4180_v47 }
 0x27b   :  { %2765 = vmatmul.msk.f32.gmra.mxu0 %vm747_vm1, %v4180_v47 }
 0x280   :  { %2767 = vmatmul.msk.f32.gmra.mxu1 %vm747_vm1, %v4180_v47  ;;  %v1487_v47 = vsel %vm559_vm3, %v3124_v46, %v3133_v39  ;;  %v3138_v46 = vunpack.i.l.bf16 %v4753_v25 }
 0x282   :  { %v1489_v28 = vsel %vm559_vm3, %v3134_v2, %v3138_v46  ;;  %v1490_v61 = vsel %vm559_vm3, %v3138_v46, %v3139_v49  ;;  %v1728_v49 = vld [vmem:[%s5882_s4] sm:$0xff]  ;;  %s3672_s4 = smov 32  }
 0x283   :  { %1731 = vperm.xlu1 %3165, %v1728_v49  }
 0x295   :  { %v3152_v38 = vpop.permute.xlu1 %3151 }
 0x296   :  { %v3154_v48 = vunpack.i.h.bf16 %v3152_v38  ;;  %v3153_v17 = vunpack.i.l.bf16 %v3152_v38 }
 0x298   :  { %v1494_v21 = vsel %vm559_vm3, %v3149_v27, %v3153_v17  ;;  %v1495_v56 = vsel %vm559_vm3, %v3153_v17, %v3154_v48 }
 0x299   :  { %1561 = vmatpush.msrb.mxu3 %v1494_v21  ;;  %1584 = vmatpush.msra.mxu0 %v1495_v56 }
 0x29b   :  { %1562 = vmatpush.msrb.mxu3 %v1487_v47  ;;  %1585 = vmatpush.msra.mxu0 %v1488_v26 }
 0x29d   :  { %1563 = vmatpush.msrb.mxu3 %v4686_v8  ;;  %1586 = vmatpush.msra.mxu0 %v1481_v5  ;;  %v4862_v5 = vld [vmem:[#allocation5] sm:$0xff] }
 0x29e   :  { %2770 = vmatmul.msk.f32.vlgmr.msrb.gmra.mxu3 %vm747_vm1, %v4498_v58  ;;  %2772 = vmatmul.msk.f32.vlgmr.msra.gmra.mxu0 %vm747_vm1, %v4498_v58  ;;  %6097 = vst [vmem:[#allocation55_spill] sm:$0xff] %v4862_v5 }
 0x29f   :  { %2169 = vrot.lane.b32.xlu2 %v4862_v5, %s3671_s16 }
 0x2a1   :  { %v3157_v35 = vpop.permute.xlu2 %3156 }
 0x2a2   :  { %v3159_v27 = vunpack.i.h.bf16 %v3157_v35  ;;  %v3158_v33 = vunpack.i.l.bf16 %v3157_v35 }
 0x2a4   :  { %v1496_v50 = vsel %vm559_vm3, %v3154_v48, %v3158_v33  ;;  %v1497_v44 = vsel %vm559_vm3, %v3158_v33, %v3159_v27 }
 0x2a5   :  { %1607 = vmatpush.msra.mxu1 %v1496_v50  ;;  %1630 = vmatpush.msrb.mxu2 %v1497_v44 }
 0x2a6   :  { %2771 = vmatmul.msk.f32.gmra.mxu3 %vm747_vm1, %v4610_v36  ;;  %2773 = vmatmul.msk.f32.gmra.mxu0 %vm747_vm1, %v4610_v36 }
 0x2a7   :  { %1608 = vmatpush.msra.mxu1 %v1489_v28  ;;  %1631 = vmatpush.msrb.mxu2 %v1490_v61  ;;  %v916_v61 = vadd.f32 %v794_v14, %v3956_v4 }
 0x2a9   :  { %1609 = vmatpush.msra.mxu1 %v4623_v59  ;;  %1632 = vmatpush.msrb.mxu2 %v1483_v22  ;;  %v3119_v59 = vunpack.i.h.bf16 %v4718_v10  ;;  %v817_v10 = vpop.f32.mrf.mxu2 }
 0x2aa   :  { %2774 = vmatmul.msk.f32.vlgmr.msra.gmra.mxu1 %vm747_vm1, %v4498_v58  ;;  %2776 = vmatmul.msk.f32.vlgmr.msrb.gmra.mxu2 %vm747_vm1, %v4498_v58  ;;  %v917_v22 = vadd.f32 %v817_v10, %v3956_v4 }
 0x2ab   :  { %v1485_v24 = vsel %vm559_vm3, %v3118_v11, %v3119_v59 }
 0x2b1   :  { %v820_v62 = vpop.f32.mrf.mxu2 }
 0x2b2   :  { %2775 = vmatmul.msk.f32.gmra.mxu1 %vm747_vm1, %v4610_v36  ;;  %2777 = vmatmul.msk.f32.gmra.mxu2 %vm747_vm1, %v4610_v36 }
 0x2b9   :  { %v3162_v8 = vpop.permute.xlu0 %3161  ;;  %v909_v43 = vpop.f32.mrf.mxu2 }
 0x2ba   :  { %v3164_v0 = vunpack.i.h.bf16 %v3162_v8  ;;  %v3163_v9 = vunpack.i.l.bf16 %v3162_v8  ;;  %v921_v57 = vadd.f32 %v909_v43, %v3956_v4 }
 0x2bc   :  { %v1498_v54 = vsel %vm559_vm3, %v3159_v27, %v3163_v9  ;;  %v1499_v45 = vsel %vm559_vm3, %v3163_v9, %v3164_v0  ;;  %v915_v27 = vadd.f32 %v771_v3, %v3956_v4  ;;  %v924_v0 = vadd.f32 %v820_v62, %v3960_v6 }
 0x2bd   :  { %1653 = vmatpush.msra.mxu3 %v1498_v54  ;;  %1676 = vmatpush.msrb.mxu0 %v1499_v45  ;;  %v6098_v3 = vmov 0.0  }
 0x2be   :  { %v2723_v43 = vsel %vm309_vm7, 1.0, %v6098_v3  ;;  %vm2471_vm7 = vcmask 261120  }
 0x2bf   :  { %1654 = vmatpush.msra.mxu3 %v1491_v13  ;;  %1677 = vmatpush.msrb.mxu0 %v1492_v52 }
 0x2c1   :  { %1655 = vmatpush.msra.mxu3 %v4739_v31  ;;  %1678 = vmatpush.msrb.mxu0 %v1485_v24  ;;  %v912_v39 = vpop.f32.mrf.mxu2  ;;  %v2722_v24 = vsel %vm308_vm15, 1.0, %v6098_v3  ;;  %vm2001_vm15 = vcmask 392192  }
 0x2c2   :  { %2778 = vmatmul.msk.f32.vlgmr.msra.gmra.mxu3 %vm747_vm1, %v4498_v58  ;;  %2780 = vmatmul.msk.f32.vlgmr.msrb.gmra.mxu0 %vm747_vm1, %v4498_v58  ;;  %v928_v17 = vadd.f32 %v912_v39, %v3960_v6 }
 0x2c9   :  { %v1225_v35 = vpop.f32.mrf.mxu2 }
 0x2ca   :  { %2779 = vmatmul.msk.f32.gmra.mxu3 %vm747_vm1, %v4610_v36  ;;  %2781 = vmatmul.msk.f32.gmra.mxu0 %vm747_vm1, %v4610_v36 }
 0x2d0   :  { %v863_v32 = vpop.f32.mrf.mxu0  ;;  %v4839_v34 = vpop.f32.mrf.mxu1 }
 0x2d1   :  { %v919_v19 = vadd.f32 %v863_v32, %v3956_v4  ;;  %v1228_v46 = vpop.f32.mrf.mxu2 }
 0x2d5   :  { %v840_v7 = vpop.f32.mrf.mxu3 }
 0x2d6   :  { %v918_v59 = vadd.f32 %v840_v7, %v3956_v4 }
 0x2d8   :  { %v866_v18 = vpop.f32.mrf.mxu0  ;;  %v889_v41 = vpop.f32.mrf.mxu1  ;;  %v1303_v7 = vadd.f32 %v1225_v35, %v918_v59 }
 0x2d9   :  { %v927_v38 = vadd.f32 %v889_v41, %v3960_v6  ;;  %v926_v21 = vadd.f32 %v866_v18, %v3960_v6  ;;  %v1542_v50 = vpop.f32.mrf.mxu2  ;;  %v923_v41 = vadd.f32 %v797_v51, %v3960_v6 }
 0x2dd   :  { %v4841_v60 = vpop.f32.mrf.mxu3 }
 0x2de   :  { %v925_v39 = vadd.f32 %v4841_v60, %v3960_v6 }
 0x2e0   :  { %v1179_v58 = vpop.f32.mrf.mxu0  ;;  %v1202_v11 = vpop.f32.mrf.mxu1 }
 0x2e1   :  { %v1301_v8 = vadd.f32 %v1179_v58, %v916_v61  ;;  %v1302_v23 = vadd.f32 %v1202_v11, %v917_v22  ;;  %v4880_v10 = vpop.f32.mrf.mxu2  ;;  %v6105_v61 = vld [vmem:[#allocation25_spill] sm:$0xff] }
 0x2e5   :  { %v1156_v40 = vpop.f32.mrf.mxu3 }
 0x2e6   :  { %v1300_v33 = vadd.f32 %v1156_v40, %v915_v27 }
 0x2e8   :  { %v1182_v31 = vpop.f32.mrf.mxu0  ;;  %v1205_v30 = vpop.f32.mrf.mxu1  ;;  %v1686_v28 = vadd.f32 %v1542_v50, %v1300_v33 }
 0x2e9   :  { %v1309_v13 = vadd.f32 %v1205_v30, %v924_v0  ;;  %v1308_v40 = vadd.f32 %v1182_v31, %v923_v41  ;;  %v6116_v31 = vld [vmem:[#allocation42_spill] sm:$0xff] }
 0x2ea   :  { %v1700_v37 = vmax.f32 %v1686_v28, 0.0  ;;  %v1310_v28 = vadd.f32 %v1228_v46, %v925_v39  ;;  %v6109_v46 = vld [vmem:[#allocation24_spill] sm:$0xff] }
 0x2ec   :  { %v4877_v18 = vmul.f32 0.0, %v1700_v37  ;;  %v6107_v37 = vld [vmem:[#allocation29_spill] sm:$0xff] }
 0x2ed   :  { %v4843_v42 = vpop.f32.mrf.mxu3 }
 0x2f0   :  { %v4845_v36 = vpop.f32.mrf.mxu0 }
 0x2f5   :  { %v1248_v63 = vpop.f32.mrf.mxu3  ;;  %v1294_v25 = vpop.f32.mrf.mxu1 }
 0x2f6   :  { %v4849_v55 = vadd.f32 %v1248_v63, %v919_v19  ;;  %v4851_v12 = vadd.f32 %v1294_v25, %v921_v57  ;;  %v6102_v25 = vld [vmem:[#allocation18_spill] sm:$0xff] }
 0x2f7   :  { %v1734_v51 = vmul.f32 %v4877_v18, %v6102_v25 }
 0x2f8   :  { %v1274_v2 = vpop.f32.mrf.mxu0 }
 0x2f9   :  { %v4854_v48 = vadd.f32 %v1274_v2, %v927_v38  ;;  %v6103_v38 = vld [vmem:[#allocation28_spill] sm:$0xff] }
 0x2fd   :  { %v1251_v56 = vpop.f32.mrf.mxu3  ;;  %v1297_v16 = vpop.f32.mrf.mxu1 }
 0x2fe   :  { %v4858_v47 = vadd.f32 %v1251_v56, %v926_v21  ;;  %v4860_v26 = vadd.f32 %v1297_v16, %v928_v17  ;;  %v2724_v21 = vsel %vm310_vm9, 1.0, %v6098_v3 }
 0x31b   :  { %v1588_v44 = vpop.f32.mrf.mxu0 }
 0x31c   :  { %v1688_v54 = vadd.f32 %v1588_v44, %v1302_v23 }
 0x31e   :  { %v1702_v11 = vmax.f32 %v1688_v54, 0.0  ;;  %v922_v54 = vadd.f32 %v4833_v15, %v3960_v6 }
 0x320   :  { %v4898_v16 = vmul.f32 %v2723_v43, %v1702_v11  ;;  %v6111_v11 = vld [vmem:[#allocation17_spill] sm:$0xff] }
 0x321   :  { %v1565_v9 = vpop.f32.mrf.mxu3 }
 0x322   :  { %v1687_v45 = vadd.f32 %v1565_v9, %v1301_v8  ;;  %v1736_v0 = vmul.f32 %v4898_v16, %v6107_v37  ;;  %v6108_v9 = vld [vmem:[#allocation33_spill] sm:$0xff] }
 0x323   :  { %v1591_v32 = vpop.f32.mrf.mxu0 }
 0x324   :  { %v1701_v14 = vmax.f32 %v1687_v45, 0.0  ;;  %v1695_v58 = vadd.f32 %v1591_v32, %v1309_v13  ;;  %v2101_v13 = vmul.f32 %v6109_v46, %v4877_v18  ;;  %v6110_v32 = vld [vmem:[#allocation20_spill] sm:$0xff] }
 0x326   :  { %v4882_v62 = vmul.f32 %v2722_v24, %v1701_v14  ;;  %v1709_v17 = vmax.f32 %v1695_v58, 0.0 }
 0x327   :  { %v1611_v57 = vpop.f32.mrf.mxu1 }
 0x328   :  { %6100 = vst [vmem:[#allocation11_spill] sm:$0xff] %v4882_v62  ;;  %v1689_v19 = vadd.f32 %v1611_v57, %v1303_v7  ;;  %v3166_v63 = vpack.i.bf16 %v4882_v62, %v4877_v18  ;;  %v1735_v2 = vmul.f32 %v4882_v62, %v6103_v38  ;;  %v4904_v44 = vmul.f32 %v2723_v43, %v1709_v17  ;;  %v6113_v43 = vld [vmem:[#allocation21_spill] sm:$0xff] }
 0x329   :  { %v1568_v56 = vpop.f32.mrf.mxu3  ;;  %v2102_v22 = vmul.f32 %v4882_v62, %v6105_v61  ;;  %v1747_v14 = vmul.f32 %v4882_v62, %v6110_v32  ;;  %v1746_v7 = vmul.f32 %v4877_v18, %v6111_v11 }
 0x32a   :  { %v1703_v35 = vmax.f32 %v1689_v19, 0.0  ;;  %v1694_v49 = vadd.f32 %v1568_v56, %v1308_v40  ;;  %3167 = vrot.lane.b32.xlu2 %v3166_v63, %s3663_s28  ;;  %v3181_v27 = vpack.i.bf16 %v1735_v2, %v1734_v51  ;;  %v6112_v40 = vld [vmem:[#allocation35_spill] sm:$0xff]  ;;  %v4933_v15 = vmul.f32 %v4904_v44, %v6107_v37  ;;  %v6114_v19 = vld [vmem:[#allocation48_spill] sm:$0xff]  ;;  %v6115_v2 = vld [vmem:[#allocation34_spill] sm:$0xff] }
 0x32b   :  { %v3186_v58 = vpack.i.bf16 %v2102_v22, %v2101_v13  ;;  %v2103_v6 = vmul.f32 %v4898_v16, %v6112_v40  ;;  %v4938_v57 = vmul.f32 %v4904_v44, %v6113_v43  ;;  %v4942_v63 = vmul.f32 %v4904_v44, %v6114_v19  ;;  %v6118_v37 = vld [vmem:[#allocation27_spill] sm:$0xff] }
 0x32c   :  { %v4901_v33 = vmul.f32 %v2724_v21, %v1703_v35  ;;  %v1708_v50 = vmax.f32 %v1694_v49, 0.0  ;;  %3182 = vrot.lane.b32.xlu1 %v3181_v27, %s3669_s14  ;;  %v4946_v51 = vmul.f32 %v4904_v44, %v6112_v40  ;;  %v3176_v27 = vpack.i.bf16 %v1747_v14, %v1746_v7 }
 0x32d   :  { %v4906_v60 = vpop.f32.mrf.mxu2  ;;  %v4971_v22 = vmul.f32 %v4904_v44, %v4178_v29  ;;  %v1748_v40 = vmul.f32 %v4898_v16, %v6113_v43 }
 0x32e   :  { %v4910_v8 = vmul.f32 %v2722_v24, %v1708_v50  ;;  %v3171_v23 = vpack.i.bf16 %v4901_v33, %v4898_v16  ;;  %v1737_v59 = vmul.f32 %v4901_v33, %v6108_v9  ;;  %v2104_v39 = vmul.f32 %v4901_v33, %v6115_v2  ;;  %v6117_v50 = vld [vmem:[#allocation38_spill] sm:$0xff] }
 0x32f   :  { %v1614_v45 = vpop.f32.mrf.mxu1 }
 0x330   :  { %6106 = vst [vmem:[#allocation12_spill] sm:$0xff] %v4910_v8  ;;  %v1696_v52 = vadd.f32 %v1614_v45, %v1310_v28  ;;  %3172 = vrot.lane.b32.xlu0 %v3171_v23, %s3663_s28  ;;  %v3201_v24 = vpack.i.bf16 %v1737_v59, %v1736_v0  ;;  %v4952_v17 = vmul.f32 %v4910_v8, %v6110_v32  ;;  %v6120_v32 = vld [vmem:[#allocation50_spill] sm:$0xff] }
 0x331   :  { %v4956_v56 = vmul.f32 %v4910_v8, %v6116_v31  ;;  %v4960_v35 = vmul.f32 %v4910_v8, %v6105_v61  ;;  %v4967_v28 = vmul.f32 %v4904_v44, %v6117_v50  ;;  %v1749_v0 = vmul.f32 %v4901_v33, %v6118_v37  ;;  %v6125_v61 = vld [vmem:[#allocation51_spill] sm:$0xff] }
 0x332   :  { %v1710_v30 = vmax.f32 %v1696_v52, 0.0  ;;  %3202 = vrot.lane.b32.xlu2 %v3201_v24, %s3669_s14  ;;  %v6119_v52 = vld [vmem:[#allocation37_spill] sm:$0xff]  ;;  %v3206_v7 = vpack.i.bf16 %v2104_v39, %v2103_v6 }
 0x333   :  { %v3196_v39 = vpack.i.bf16 %v1749_v0, %v1748_v40 }
 0x334   :  { %v4962_v49 = vmul.f32 %v2724_v21, %v1710_v30  ;;  %3187 = vrot.lane.b32.xlu1 %v3186_v58, %s3670_s15  ;;  %v1307_v58 = vadd.f32 %v4843_v42, %v922_v54  ;;  %v2725_v42 = vsel %vm311_vm2, 1.0, %v6098_v3  ;;  %v6122_v54 = vld [vmem:[#allocation46_spill] sm:$0xff]  ;;  %v6124_v21 = vld [vmem:[#allocation49_spill] sm:$0xff] }
 0x335   :  { %v1637_v23 = vpop.f32.mrf.mxu2  ;;  %v2090_v6 = vmul.f32 %v4882_v62, %v6122_v54 }
 0x336   :  { %v1697_v45 = vadd.f32 %v1637_v23, %v4858_v47  ;;  %v4984_v13 = vmul.f32 %v4962_v49, %v6108_v9  ;;  %v4988_v24 = vmul.f32 %v4962_v49, %v6119_v52  ;;  %v4992_v14 = vmul.f32 %v4962_v49, %v6120_v32 }
 0x337   :  { %v2401_v23 = vmul.f32 %v4882_v62, %v6116_v31  ;;  %v5019_v59 = vmul.f32 %v4962_v49, %v6124_v21  ;;  %v5040_v40 = vmul.f32 %v4962_v49, %v6118_v37  ;;  %v2092_v47 = vmul.f32 %v4901_v33, %v6119_v52 }
 0x338   :  { %v1711_v30 = vmax.f32 %v1697_v45, 0.0  ;;  %3177 = vrot.lane.b32.xlu0 %v3176_v27, %s3670_s15  ;;  %v1693_v27 = vadd.f32 %v4880_v10, %v1307_v58  ;;  %v6123_v45 = vld [vmem:[#allocation47_spill] sm:$0xff]  ;;  %v5030_v10 = vmul.f32 %v4962_v49, %v6115_v2  ;;  %v1690_v2 = vadd.f32 %v4906_v60, %v4849_v55 }
 0x339   :  { %v2089_v9 = vmul.f32 %v4877_v18, %v6123_v45  ;;  %v6126_v18 = vld [vmem:[#allocation36_spill] sm:$0xff]  ;;  %v2091_v55 = vmul.f32 %v4898_v16, %v6117_v50  ;;  %v920_v60 = vadd.f32 %v4839_v34, %v3956_v4  ;;  %v2391_v50 = vmul.f32 %v4901_v33, %v6120_v32 }
 0x33a   :  { %v5009_v43 = vmul.f32 %v2725_v42, %v1711_v30  ;;  %3207 = vrot.lane.b32.xlu2 %v3206_v7, %s3670_s15  ;;  %v2402_v7 = vmul.f32 %v4898_v16, %v6114_v19  ;;  %v1704_v52 = vmax.f32 %v1690_v2, 0.0  ;;  %v1741_v4 = vmul.f32 %v4910_v8, %v6103_v38 }
 0x33b   :  { %v3191_v58 = vpack.i.bf16 %v2090_v6, %v2089_v9  ;;  %v1707_v6 = vmax.f32 %v1693_v27, 0.0  ;;  %v3211_v19 = vpack.i.bf16 %v2092_v47, %v2091_v55  ;;  %v1305_v37 = vadd.f32 %v4845_v36, %v920_v60  ;;  %v6132_v55 = vld [vmem:[#allocation40_spill] sm:$0xff] }
 0x33c   :  { %3197 = vrot.lane.b32.xlu1 %v3196_v39, %s3670_s15  ;;  %v5026_v0 = vmul.f32 %v5009_v43, %v6125_v61  ;;  %v5034_v31 = vmul.f32 %v5009_v43, %v6126_v18  ;;  %v6127_v39 = vld [vmem:[#allocation26_spill] sm:$0xff]  ;;  %v3216_v62 = vpack.i.bf16 %v2402_v7, %v2401_v23  ;;  %v5074_v34 = vmul.f32 %v2725_v42, %v1704_v52 }
 0x33d   :  { %v5044_v30 = vmul.f32 %v5009_v43, %v6127_v39  ;;  %v5063_v27 = vmul.f32 0.0, %v1707_v6  ;;  %v2096_v36 = vmul.f32 %v4910_v8, %v6122_v54  ;;  %v2726_v7 = vsel %vm312_vm12, 1.0, %v6098_v3 }
 0x33e   :  { %v5103_v60 = vmul.f32 %v5074_v34, %v6132_v55 }
 0x33f   :  { %v1680_v41 = vpop.f32.mrf.mxu0  ;;  %v1740_v2 = vmul.f32 %v5063_v27, %v6102_v25  ;;  %v2095_v54 = vmul.f32 %v5063_v27, %v6123_v45  ;;  %v6133_v45 = vld [vmem:[#allocation53_spill] sm:$0xff] }
 0x340   :  { %v1692_v5 = vadd.f32 %v1680_v41, %v4851_v12  ;;  %3192 = vrot.lane.b32.xlu0 %v3191_v58, %s3666_s7  ;;  %v2727_v41 = vsel %vm313_vm10, 1.0, %v6098_v3  ;;  %v6137_v58 = vld [vmem:[#allocation39_spill] sm:$0xff] }
 0x341   :  { %v3236_v3 = vpack.i.bf16 %v2096_v36, %v2095_v54 }
 0x342   :  { %3217 = vrot.lane.b32.xlu2 %v3216_v62, %s3670_s15  ;;  %v1706_v9 = vmax.f32 %v1692_v5, 0.0  ;;  %v2390_v5 = vmul.f32 %v4898_v16, %v4178_v29  ;;  %v6130_v29 = vpack.i.bf16 %v4904_v44, %v4910_v8  ;;  %v1750_v44 = vmul.f32 %v5074_v34, %v6127_v39  ;;  %v6136_v39 = vld [vmem:[#allocation30_spill] sm:$0xff] }
 0x344   :  { %3212 = vrot.lane.b32.xlu1 %v3211_v19, %s3666_s7  ;;  %v5080_v47 = vmul.f32 %v2727_v41, %v1706_v9  ;;  %v3221_v16 = vpack.i.bf16 %v2391_v50, %v2390_v5  ;;  %v3231_v9 = vpack.i.bf16 %v1741_v4, %v1740_v2  ;;  %v6134_v50 = vld [vmem:[#allocation23_spill] sm:$0xff]  ;;  %v6138_v2 = vld [vmem:[#allocation52_spill] sm:$0xff] }
 0x345   :  { %v1657_v23 = vpop.f32.mrf.mxu3 }
 0x346   :  { %v1691_v62 = vadd.f32 %v1657_v23, %v1305_v37  ;;  %v6131_v37 = vld [vmem:[#allocation32_spill] sm:$0xff]  ;;  %v5107_v52 = vmul.f32 %v5080_v47, %v6133_v45 }
 0x347   :  { %v1683_v32 = vpop.f32.mrf.mxu0  ;;  %v1738_v25 = vmul.f32 %v5074_v34, %v6131_v37 }
 0x348   :  { %v1705_v38 = vmax.f32 %v1691_v62, 0.0  ;;  %v1699_v42 = vadd.f32 %v1683_v32, %v4860_v26  ;;  %3227 = vrot.lane.b32.xlu0 %v6130_v29, %s3663_s28  ;;  %v2105_v26 = vmul.f32 %v5074_v34, %v6126_v18  ;;  %v6135_v18 = vld [vmem:[#allocation31_spill] sm:$0xff] }
 0x34a   :  { %v1719_v19 = vmul.f32 %v2726_v7, %v1705_v38  ;;  %v1713_v6 = vmax.f32 %v1699_v42, 0.0  ;;  %3222 = vrot.lane.b32.xlu2 %v3221_v16, %s3664_s2  ;;  %v6139_v42 = vld [vmem:[#allocation44_spill] sm:$0xff] }
 0x34c   :  { %v5109_v12 = vmul.f32 %v2727_v41, %v1713_v6  ;;  %3232 = vrot.lane.b32.xlu1 %v3231_v9, %s3669_s14  ;;  %v1739_v23 = vmul.f32 %v1719_v19, %v6134_v50  ;;  %v3271_v4 = vpack.i.bf16 %v1719_v19, %v5074_v34  ;;  %v2106_v62 = vmul.f32 %v1719_v19, %v6135_v18 }
 0x34d   :  { %v1660_v5 = vpop.f32.mrf.mxu3  ;;  %v1751_v36 = vmul.f32 %v1719_v19, %v6136_v39  ;;  %v2094_v32 = vmul.f32 %v1719_v19, %v6137_v58  ;;  %v2405_v38 = vmul.f32 %v1719_v19, %v6138_v2  ;;  %v5119_v29 = vmul.f32 %v1719_v19, %v6139_v42  ;;  %v6140_v58 = vld [vmem:[#allocation43_spill] sm:$0xff] }
 0x34e   :  { %v1698_v41 = vadd.f32 %v1660_v5, %v4854_v48  ;;  %v3286_v16 = vpack.i.bf16 %v1739_v23, %v1738_v25  ;;  %v3291_v54 = vpack.i.bf16 %v2106_v62, %v2105_v26  ;;  %v5124_v9 = vmul.f32 %v5080_v47, %v4201_v20  ;;  %v6144_v62 = vld [vmem:[#allocation22_spill] sm:$0xff] }
 0x34f   :  { %v3281_v6 = vpack.i.bf16 %v1751_v36, %v1750_v44  ;;  %v3296_v8 = vpack.i.bf16 %v2094_v32, %v5103_v60  ;;  %v3316_v1 = vpack.i.bf16 %v5107_v52, %v2405_v38  ;;  %v5133_v48 = vmul.f32 %v5074_v34, %v6140_v58  ;;  %v6142_v52 = vld [vmem:[#allocation45_spill] sm:$0xff] }
 0x350   :  { %v1712_v53 = vmax.f32 %v1698_v41, 0.0  ;;  %3237 = vrot.lane.b32.xlu0 %v3236_v3, %s3666_s7  ;;  %v5137_v25 = vmul.f32 %v5109_v12, %v4201_v20  ;;  %v6141_v44 = vpack.i.bf16 %v4984_v13, %v4933_v15  ;;  %v1744_v60 = vmul.f32 %v5009_v43, %v6131_v37  ;;  %v6155_v3 = vld [vmem:[#allocation41_spill] sm:$0xff] }
 0x351   :  { %v2114_v23 = vmul.f32 %v5109_v12, %v6142_v52  ;;  %v2412_v20 = vmul.f32 %v5109_v12, %v6133_v45  ;;  %v1759_v5 = vmul.f32 %v5109_v12, %v6144_v62  ;;  %v6148_v38 = vpack.i.bf16 %v4992_v14, %v4971_v22 }
 0x352   :  { %v5139_v26 = vmul.f32 %v2726_v7, %v1712_v53  ;;  %3247 = vrot.lane.b32.xlu2 %v6141_v44, %s3669_s14  ;;  %v6143_v53 = vpack.i.bf16 %v4938_v57, %v4952_v17  ;;  %v5171_v57 = vmul.f32 %v5009_v43, %v6140_v58  ;;  %v6147_v58 = vpack.i.bf16 %v4988_v24, %v4967_v28 }
 0x353   :  { %v2404_v28 = vmul.f32 %v5074_v34, %v6125_v61  ;;  %v2403_v22 = vmul.f32 %v4901_v33, %v6124_v21  ;;  %v1752_v14 = vmul.f32 %v5080_v47, %v6144_v62  ;;  %v1753_v61 = vmul.f32 %v5063_v27, %v6111_v11  ;;  %v5222_v33 = vpop.permute.xlu2 %2169 }
 0x354   :  { %3242 = vrot.lane.b32.xlu1 %v6143_v53, %s3670_s15  ;;  %v1745_v15 = vmul.f32 %v5139_v26, %v6134_v50  ;;  %v2113_v13 = vmul.f32 %v5139_v26, %v6135_v18  ;;  %v3326_v7 = vpack.i.bf16 %v5109_v12, %v5139_v26  ;;  %v2411_v37 = vmul.f32 %v5139_v26, %v6138_v2 }
 0x355   :  { %v1758_v45 = vmul.f32 %v5139_v26, %v6136_v39  ;;  %v5175_v17 = vmul.f32 %v5139_v26, %v6139_v42  ;;  %v6145_v39 = vpack.i.bf16 %v4942_v63, %v4956_v56  ;;  %v6146_v12 = vpack.i.bf16 %v4946_v51, %v4960_v35 }
 0x356   :  { %v3336_v50 = vpack.i.bf16 %v1745_v15, %v1744_v60  ;;  %v3356_v18 = vpack.i.bf16 %v2114_v23, %v2113_v13  ;;  %v3361_v36 = vpack.i.bf16 %v2412_v20, %v2411_v37  ;;  %v2107_v63 = vmul.f32 %v5080_v47, %v6142_v52 }
 0x357   :  { %v3351_v32 = vpack.i.bf16 %v1759_v5, %v1758_v45  ;;  %v3276_v51 = vpack.i.bf16 %v5063_v27, %v5080_v47  ;;  %v2108_v56 = vmul.f32 %v6109_v46, %v5063_v27  ;;  %v3301_v24 = vpack.i.bf16 %v2404_v28, %v2403_v22 }
 0x358   :  { %3262 = vrot.lane.b32.xlu0 %v6145_v39, %s3670_s15  ;;  %v6149_v46 = vpack.i.bf16 %v5009_v43, %v4962_v49  ;;  %v3306_v34 = vpack.i.bf16 %v1753_v61, %v1752_v14  ;;  %v6150_v21 = vpack.i.bf16 %v5026_v0, %v5019_v59  ;;  %v6151_v11 = vpack.i.bf16 %v5034_v31, %v5030_v10  ;;  %v5246_v0 = vpop.permute.xlu1 %1731 }
 0x359   :  { %v3311_v35 = vpack.i.bf16 %v2108_v56, %v2107_v63 }
 0x35a   :  { %3252 = vrot.lane.b32.xlu2 %v6146_v12, %s3670_s15 }
 0x35c   :  { %3257 = vrot.lane.b32.xlu1 %v6147_v58, %s3666_s7 }
 0x360   :  { %3287 = vrot.lane.b32.xlu0 %v3286_v16, %s3669_s14 }
 0x362   :  { %3267 = vrot.lane.b32.xlu2 %v6148_v38, %s3664_s2 }
 0x364   :  { %3272 = vrot.lane.b32.xlu1 %v3271_v4, %s3663_s28 }
 0x368   :  { %3292 = vrot.lane.b32.xlu0 %v3291_v54, %s3670_s15 }
 0x36a   :  { %3277 = vrot.lane.b32.xlu2 %v3276_v51, %s3663_s28 }
 0x36c   :  { %3312 = vrot.lane.b32.xlu1 %v3311_v35, %s3670_s15 }
 0x370   :  { %3302 = vrot.lane.b32.xlu0 %v3301_v24, %s3670_s15 }
 0x372   :  { %3282 = vrot.lane.b32.xlu2 %v3281_v6, %s3670_s15 }
 0x374   :  { %3322 = vrot.lane.b32.xlu1 %v6149_v46, %s3663_s28 }
 0x378   :  { %3307 = vrot.lane.b32.xlu0 %v3306_v34, %s3670_s15 }
 0x37a   :  { %3297 = vrot.lane.b32.xlu2 %v3296_v8, %s3666_s7 }
 0x37c   :  { %3347 = vrot.lane.b32.xlu1 %v6150_v21, %s3670_s15 }
 0x380   :  { %3337 = vrot.lane.b32.xlu0 %v3336_v50, %s3669_s14 }
 0x382   :  { %3317 = vrot.lane.b32.xlu2 %v3316_v1, %s3670_s15  ;;  %v6152_v1 = vpack.i.bf16 %v5044_v30, %v5040_v40 }
 0x384   :  { %v3168_v49 = vpop.permute.xlu2 %3167  ;;  %3357 = vrot.lane.b32.xlu1 %v3356_v18, %s3670_s15 }
 0x385   :  { %v3170_v4 = vunpack.i.h.bf16 %v3168_v49  ;;  %v3169_v42 = vunpack.i.l.bf16 %v3168_v49 }
 0x387   :  { %v1803_v6 = vsel %vm608_vm5, %v3169_v42, %v3170_v4 }
 0x388   :  { %3342 = vrot.lane.b32.xlu0 %v6151_v11, %s3670_s15 }
 0x38a   :  { %3327 = vrot.lane.b32.xlu2 %v3326_v7, %s3663_s28 }
 0x38c   :  { %v5236_v8 = vpop.permute.xlu2 %3202  ;;  %3362 = vrot.lane.b32.xlu1 %v3361_v36, %s3670_s15 }
 0x38d   :  { %v3204_v31 = vunpack.i.l.bf16 %v5236_v8 }
 0x390   :  { %3352 = vrot.lane.b32.xlu0 %v3351_v32, %s3670_s15 }
 0x392   :  { %3332 = vrot.lane.b32.xlu2 %v6152_v1, %s3670_s15 }
 0x394   :  { %v5244_v59 = vpop.permute.xlu2 %3207 }
 0x395   :  { %v3209_v51 = vunpack.i.l.bf16 %v5244_v59  ;;  %v3210_v11 = vunpack.i.h.bf16 %v5244_v59 }
 0x39c   :  { %v5248_v27 = vpop.permute.xlu2 %3217 }
 0x39e   :  { %v5250_v10 = vpop.permute.xlu1 %3182 }
 0x39f   :  { %v6006_v47 = vunpack.i.h.bf16 %v5250_v10 }
 0x3a1   :  { %v5257_v41 = vsel %vm704_vm8, %v6006_v47, %v3204_v31 }
 0x3a2   :  { %v5259_v30 = vpop.permute.xlu0 %3172 }
 0x3a3   :  { %v3175_v40 = vunpack.i.h.bf16 %v5259_v30  ;;  %v3174_v16 = vunpack.i.l.bf16 %v5259_v30 }
 0x3a4   :  { %v5263_v54 = vpop.permute.xlu2 %3222 }
 0x3a5   :  { %v5267_v44 = vsel %vm608_vm5, %v3170_v4, %v3174_v16  ;;  %v5272_v60 = vsel %vm608_vm5, %v3174_v16, %v3175_v40 }
 0x3a6   :  { %v3188_v52 = vpop.permute.xlu1 %3187  ;;  %v3366_v23 = vpack.i.bf16 %v5267_v44, %v1803_v6 }
 0x3a7   :  { %v3190_v12 = vunpack.i.h.bf16 %v3188_v52  ;;  %v3189_v58 = vunpack.i.l.bf16 %v3188_v52 }
 0x3a8   :  { %3367 = vrot.lane.b32.xlu1 %v3366_v23, %s3669_s14 }
 0x3a9   :  { %v2157_v28 = vsel %vm640_vm14, %v3189_v58, %v3190_v12  ;;  %v2158_v22 = vsel %vm640_vm14, %v3190_v12, %v3209_v51 }
 0x3aa   :  { %v3178_v20 = vpop.permute.xlu0 %3177  ;;  %v3381_v46 = vpack.i.bf16 %v2158_v22, %v2157_v28 }
 0x3ab   :  { %v3180_v37 = vunpack.i.h.bf16 %v3178_v20  ;;  %v3179_v45 = vunpack.i.l.bf16 %v3178_v20 }
 0x3ac   :  { %v5276_v53 = vpop.permute.xlu2 %3247 }
 0x3ad   :  { %v1857_v36 = vsel %vm640_vm14, %v3179_v45, %v3180_v37  ;;  %v3249_v61 = vunpack.i.l.bf16 %v5276_v53 }
 0x3ae   :  { %v3198_v15 = vpop.permute.xlu1 %3197 }
 0x3af   :  { %v3200_v13 = vunpack.i.h.bf16 %v3198_v15  ;;  %v3199_v7 = vunpack.i.l.bf16 %v3198_v15 }
 0x3b0   :  { %3372 = vrot.lane.b32.xlu1 %v3366_v23, %s3666_s7  ;;  %v2159_v23 = vsel %vm640_vm14, %v3209_v51, %v3210_v11 }
 0x3b1   :  { %v5280_v62 = vsel %vm640_vm14, %v3199_v7, %v3200_v13  ;;  %v1858_v50 = vsel %vm640_vm14, %v3180_v37, %v3199_v7 }
 0x3b2   :  { %v5282_v5 = vpop.permute.xlu0 %3192  ;;  %v3376_v39 = vpack.i.bf16 %v1858_v50, %v1857_v36 }
 0x3b3   :  { %v6004_v38 = vunpack.i.h.bf16 %v5282_v5 }
 0x3b4   :  { %v5285_v18 = vpop.permute.xlu2 %3252 }
 0x3b6   :  { %v3213_v32 = vpop.permute.xlu1 %3212 }
 0x3b7   :  { %v3214_v63 = vunpack.i.l.bf16 %v3213_v32 }
 0x3b8   :  { %3377 = vrot.lane.b32.xlu1 %v3376_v39, %s3669_s14 }
 0x3b9   :  { %v5294_v56 = vsel %vm979_vm11, %v6004_v38, %v3214_v63 }
 0x3ba   :  { %v3228_v35 = vpop.permute.xlu0 %3227 }
 0x3bb   :  { %v3230_v1 = vunpack.i.h.bf16 %v3228_v35  ;;  %v3229_v31 = vunpack.i.l.bf16 %v3228_v35  ;;  %v3205_v35 = vunpack.i.h.bf16 %v5236_v8 }
 0x3bc   :  { %v5298_v24 = vpop.permute.xlu2 %3267 }
 0x3bd   :  { %v1810_v52 = vsel %vm608_vm5, %v3229_v31, %v3230_v1 }
 0x3be   :  { %v5300_v14 = vpop.permute.xlu1 %3232 }
 0x3bf   :  { %v6007_v34 = vunpack.i.h.bf16 %v5300_v14 }
 0x3c0   :  { %3382 = vrot.lane.b32.xlu1 %v3381_v46, %s3666_s7  ;;  %v3215_v46 = vunpack.i.h.bf16 %v3213_v32 }
 0x3c1   :  { %v5308_v21 = vsel %vm704_vm8, %v6007_v34, %v3249_v61 }
 0x3c2   :  { %v5310_v49 = vpop.permute.xlu0 %3237 }
 0x3c3   :  { %v6005_v36 = vunpack.i.h.bf16 %v5310_v49 }
 0x3c4   :  { %v5313_v4 = vpop.permute.xlu2 %3277 }
 0x3c5   :  { %v3280_v42 = vunpack.i.h.bf16 %v5313_v4 }
 0x3c6   :  { %v5316_v16 = vpop.permute.xlu1 %3242 }
 0x3c7   :  { %v1809_v6 = vsel %vm608_vm5, %v3280_v42, %v3229_v31 }
 0x3c8   :  { %v3391_v20 = vpack.i.bf16 %v1810_v52, %v1809_v6  ;;  %v3386_v15 = vpack.i.bf16 %v1809_v6, %v2159_v23 }
 0x3ca   :  { %v5323_v7 = vpop.permute.xlu0 %3262  ;;  %3392 = vrot.lane.b32.xlu1 %v3391_v20, %s3669_s14  ;;  %3387 = vrot.lane.b32.xlu2 %v3386_v15, %s3666_s7  ;;  %v3254_v20 = vunpack.i.l.bf16 %v5285_v18 }
 0x3cc   :  { %v5327_v37 = vpop.permute.xlu2 %3282 }
 0x3cd   :  { %v3284_v45 = vunpack.i.l.bf16 %v5327_v37 }
 0x3ce   :  { %v5330_v50 = vpop.permute.xlu1 %3257 }
 0x3cf   :  { %v3259_v39 = vunpack.i.l.bf16 %v5330_v50  ;;  %v1860_v12 = vsel %vm640_vm14, %v3200_v13, %v3284_v45 }
 0x3d0   :  { %v3446_v58 = vpack.i.bf16 %v1860_v12, %v5280_v62 }
 0x3d1   :  { %v5341_v63 = vsel %vm979_vm11, %v6005_v36, %v3259_v39  ;;  %v2099_v39 = vmul.f32 %v5009_v43, %v6132_v55 }
 0x3d2   :  { %v5343_v51 = vpop.permute.xlu0 %3287 }
 0x3d3   :  { %v6003_v28 = vunpack.i.l.bf16 %v5343_v51 }
 0x3d4   :  { %v5347_v22 = vpop.permute.xlu2 %3297 }
 0x3d5   :  { %v6002_v61 = vunpack.i.l.bf16 %v5347_v22  ;;  %v5353_v13 = vsel %vm704_vm8, %v3205_v35, %v6003_v28  ;;  %v3244_v28 = vunpack.i.l.bf16 %v5316_v16 }
 0x3d6   :  { %v3273_v62 = vpop.permute.xlu1 %3272 }
 0x3d7   :  { %v3274_v31 = vunpack.i.l.bf16 %v3273_v62  ;;  %v5358_v42 = vsel %vm979_vm11, %v3215_v46, %v6002_v61  ;;  %v3245_v61 = vunpack.i.h.bf16 %v5316_v16 }
 0x3d9   :  { %v1806_v8 = vsel %vm608_vm5, %v3175_v40, %v3274_v31 }
 0x3da   :  { %v5363_v6 = vpop.permute.xlu0 %3292  ;;  %v3426_v32 = vpack.i.bf16 %v1806_v8, %v5272_v60 }
 0x3de   :  { %v5366_v23 = vpop.permute.xlu1 %3312 }
 0x3df   :  { %v3315_v15 = vunpack.i.h.bf16 %v5366_v23 }
 0x3e1   :  { %v2163_v12 = vsel %vm640_vm14, %v3315_v15, %v3254_v20 }
 0x3e2   :  { %v5373_v35 = vpop.permute.xlu0 %3302  ;;  %v3396_v30 = vpack.i.bf16 %v2163_v12, %v2099_v39  ;;  %v1864_v39 = vsel %vm640_vm14, %v3244_v28, %v3245_v61 }
 0x3e4   :  { %3397 = vrot.lane.b32.xlu2 %v3396_v30, %s3666_s7  ;;  %v3275_v30 = vunpack.i.h.bf16 %v3273_v62 }
 0x3e6   :  { %v5376_v40 = vpop.permute.xlu1 %3322  ;;  %v5397_v34 = vsel %vm608_vm5, %v3274_v31, %v3275_v30  ;;  %v3255_v31 = vunpack.i.h.bf16 %v5285_v18 }
 0x3e7   :  { %v3324_v46 = vunpack.i.l.bf16 %v5376_v40  ;;  %v3431_v62 = vpack.i.bf16 %v5397_v34, %v1806_v8 }
 0x3e8   :  { %v2164_v18 = vsel %vm640_vm14, %v3254_v20, %v3255_v31 }
 0x3e9   :  { %v1811_v38 = vsel %vm608_vm5, %v3230_v1, %v3324_v46 }
 0x3ea   :  { %v5382_v36 = vpop.permute.xlu0 %3307  ;;  %v3401_v43 = vpack.i.bf16 %v1811_v38, %v1810_v52  ;;  %v3250_v52 = vunpack.i.h.bf16 %v5276_v53  ;;  %v3294_v53 = vunpack.i.l.bf16 %v5363_v6 }
 0x3eb   :  { %v3310_v55 = vunpack.i.h.bf16 %v5382_v36 }
 0x3ec   :  { %3427 = vrot.lane.b32.xlu2 %v3426_v32, %s3669_s14  ;;  %3402 = vrot.lane.b32.xlu0 %v3401_v43, %s3666_s7 }
 0x3ed   :  { %v1863_v15 = vsel %vm640_vm14, %v3310_v55, %v3244_v28  ;;  %v3295_v55 = vunpack.i.h.bf16 %v5363_v6  ;;  %v6009_v6 = vunpack.i.l.bf16 %v5313_v4 }
 0x3ee   :  { %v3411_v12 = vpack.i.bf16 %v1864_v39, %v1863_v15  ;;  %v5420_v8 = vpop.permute.xlu1 %3347 }
 0x3ef   :  { %v2161_v39 = vsel %vm640_vm14, %v3294_v53, %v3295_v55 }
 0x3f0   :  { %3412 = vrot.lane.b32.xlu1 %v3411_v12, %s3669_s14  ;;  %v5418_v12 = vpop.permute.xlu2 %3317 }
 0x3f2   :  { %v5392_v1 = vpop.permute.xlu0 %3337 }
 0x3f3   :  { %v6008_v47 = vunpack.i.l.bf16 %v5392_v1 }
 0x3f4   :  { %3437 = vrot.lane.b32.xlu2 %v3426_v32, %s3664_s2  ;;  %3407 = vrot.lane.b32.xlu0 %v3401_v43, %s3664_s2  ;;  %v2160_v43 = vsel %vm640_vm14, %v3210_v11, %v3294_v53  ;;  %v3320_v11 = vunpack.i.h.bf16 %v5418_v12  ;;  %v3349_v53 = vunpack.i.l.bf16 %v5420_v8 }
 0x3f5   :  { %v5404_v28 = vsel %vm704_vm8, %v3250_v52, %v6008_v47  ;;  %v5433_v47 = vsel %vm608_vm5, %v3275_v30, %v6009_v6  ;;  %v3325_v30 = vunpack.i.h.bf16 %v5376_v40 }
 0x3f7   :  { %v1812_v19 = vsel %vm608_vm5, %v3324_v46, %v3325_v30  ;;  %v3350_v46 = vunpack.i.h.bf16 %v5420_v8 }
 0x3f8   :  { %3432 = vrot.lane.b32.xlu1 %v3431_v62, %s3666_s7  ;;  %v3451_v62 = vpack.i.bf16 %v2161_v39, %v2160_v43  ;;  %v3264_v43 = vunpack.i.l.bf16 %v5323_v7  ;;  %v3481_v6 = vpack.i.bf16 %v1812_v19, %v1811_v38  ;;  %v3219_v38 = vunpack.i.l.bf16 %v5248_v27 }
 0x3fa   :  { %v5411_v15 = vpop.permute.xlu0 %3342 }
 0x3fb   :  { %v3344_v32 = vunpack.i.l.bf16 %v5411_v15 }
 0x3fc   :  { %3447 = vrot.lane.b32.xlu2 %v3446_v58, %s3669_s14  ;;  %v6153_v58 = vld [vmem:[#allocation39_spill] sm:$0xff] }
 0x3fd   :  { %v2165_v52 = vsel %vm640_vm14, %v3255_v31, %v3344_v32  ;;  %v2100_v20 = vmul.f32 %v5139_v26, %v6153_v58  ;;  %v3265_v31 = vunpack.i.h.bf16 %v5323_v7  ;;  %v5452_v7 = vpop.permute.xlu2 %3327 }
 0x3fe   :  { %v3416_v59 = vpack.i.bf16 %v2165_v52, %v2164_v18  ;;  %v6154_v18 = vld [vmem:[#allocation54_spill] sm:$0xff] }
 0x3ff   :  { %v3461_v39 = vpack.i.bf16 %v2100_v20, %v5433_v47  ;;  %v2458_v52 = vsel %vm640_vm14, %v3320_v11, %v6154_v18  ;;  %v2459_v26 = vsel %vm640_vm14, %v3264_v43, %v3265_v31  ;;  %v3305_v43 = vunpack.i.h.bf16 %v5373_v35 }
 0x400   :  { %3452 = vrot.lane.b32.xlu1 %v3451_v62, %s3666_s7  ;;  %3417 = vrot.lane.b32.xlu0 %v3416_v59, %s3666_s7  ;;  %v2460_v62 = vsel %vm640_vm14, %v3265_v31, %v3349_v53  ;;  %v6156_v59 = vld [vmem:[#allocation11_spill] sm:$0xff]  ;;  %v3441_v31 = vpack.i.bf16 %v5433_v47, %v5397_v34 }
 0x401   :  { %v2389_v2 = vmul.f32 %v6156_v59, %v6155_v3  ;;  %v3421_v20 = vpack.i.bf16 %v2460_v62, %v2459_v26  ;;  %v3314_v59 = vunpack.i.l.bf16 %v5366_v23 }
 0x402   :  { %v3353_v40 = vpop.permute.xlu0 %3352 }
 0x403   :  { %v3476_v58 = vpack.i.bf16 %v2389_v2, %v2458_v52  ;;  %v3491_v2 = vpack.i.bf16 %v5267_v44, %v1812_v19  ;;  %v3220_v52 = vunpack.i.h.bf16 %v5248_v27  ;;  %v2162_v23 = vsel %vm640_vm14, %v3295_v55, %v3314_v59  ;;  %v5474_v44 = vpop.permute.xlu1 %3357 }
 0x404   :  { %3462 = vrot.lane.b32.xlu2 %v3461_v39, %s3666_s7  ;;  %v3304_v39 = vunpack.i.l.bf16 %v5373_v35 }
 0x405   :  { %v5468_v62 = vpop.permute.xlu2 %3332  ;;  %v2453_v27 = vsel %vm640_vm14, %v3219_v38, %v3220_v52 }
 0x406   :  { %v2454_v26 = vsel %vm640_vm14, %v3220_v52, %v3304_v39  ;;  %v3335_v35 = vunpack.i.h.bf16 %v5468_v62  ;;  %v6157_v52 = vld [vmem:[#allocation19_spill] sm:$0xff] }
 0x408   :  { %3477 = vrot.lane.b32.xlu1 %v3476_v58, %s3664_s2  ;;  %3422 = vrot.lane.b32.xlu0 %v3421_v20, %s3664_s2  ;;  %v3334_v58 = vunpack.i.l.bf16 %v5468_v62  ;;  %v2461_v20 = vsel %vm640_vm14, %v3349_v53, %v3350_v46  ;;  %v3285_v53 = vunpack.i.h.bf16 %v5327_v37 }
 0x409   :  { %v3511_v55 = vpack.i.bf16 %v2453_v27, %v2461_v20  ;;  %v3319_v27 = vunpack.i.l.bf16 %v5418_v12  ;;  %v6159_v12 = vunpack.i.l.bf16 %v5313_v4  ;;  %v6161_v4 = vpack.i.bf16 %v5124_v9, %v5119_v29 }
 0x40a   :  { %v1865_v62 = vsel %vm640_vm14, %v3245_v61, %v3334_v58  ;;  %v1861_v16 = vsel %vm640_vm14, %v3284_v45, %v3285_v53  ;;  %v6158_v45 = vld [vmem:[#allocation12_spill] sm:$0xff] }
 0x40c   :  { %3482 = vrot.lane.b32.xlu2 %v3481_v6, %s3669_s14  ;;  %v3486_v6 = vpack.i.bf16 %v1812_v19, %v2162_v23  ;;  %v3330_v19 = vunpack.i.h.bf16 %v5452_v7  ;;  %v1866_v23 = vsel %vm640_vm14, %v3334_v58, %v3335_v35 }
 0x40e   :  { %v2416_v38 = vsel %vm608_vm5, %v3330_v19, %v6157_v52 }
 0x40f   :  { %v3526_v61 = vpack.i.bf16 %v5397_v34, %v2416_v38  ;;  %v2456_v34 = vsel %vm640_vm14, %v3305_v43, %v3319_v27 }
 0x410   :  { %3492 = vrot.lane.b32.xlu1 %v3491_v2, %s3664_s2  ;;  %3442 = vrot.lane.b32.xlu0 %v3441_v31, %s3669_s14  ;;  %v2455_v2 = vsel %vm640_vm14, %v3304_v39, %v3305_v43  ;;  %v3309_v31 = vunpack.i.l.bf16 %v5382_v36  ;;  %v3501_v39 = vpack.i.bf16 %v1866_v23, %v1865_v62  ;;  %v6160_v43 = vld [vmem:[#allocation55_spill] sm:$0xff]  ;;  %v3355_v23 = vunpack.i.h.bf16 %v3353_v40 }
 0x411   :  { %v3456_v59 = vpack.i.bf16 %v2455_v2, %v2454_v26  ;;  %v5498_v26 = vpop.permute.xlu1 %3362 }
 0x412   :  { %v1862_v36 = vsel %vm640_vm14, %v3285_v53, %v3309_v31  ;;  %v3365_v2 = vunpack.i.h.bf16 %v5498_v26  ;;  %v3354_v53 = vunpack.i.l.bf16 %v3353_v40 }
 0x413   :  { %v3466_v58 = vpack.i.bf16 %v1862_v36, %v1861_v16 }
 0x414   :  { %3487 = vrot.lane.b32.xlu2 %v3486_v6, %s3666_s7  ;;  %v3345_v6 = vunpack.i.h.bf16 %v5411_v15  ;;  %v2464_v37 = vsel %vm640_vm14, %v3365_v2, %v6154_v18  ;;  %v2395_v15 = vmul.f32 %v6158_v45, %v6155_v3 }
 0x416   :  { %v2166_v20 = vsel %vm640_vm14, %v3344_v32, %v3345_v6  ;;  %v3329_v32 = vunpack.i.l.bf16 %v5452_v7  ;;  %v3546_v31 = vpack.i.bf16 %v2395_v15, %v2464_v37 }
 0x418   :  { %3512 = vrot.lane.b32.xlu1 %v3511_v55, %s3664_s2  ;;  %3457 = vrot.lane.b32.xlu0 %v3456_v59, %s3664_s2  ;;  %v3506_v55 = vpack.i.bf16 %v2166_v20, %v5272_v60  ;;  %v2457_v59 = vsel %vm640_vm14, %v3319_v27, %v3320_v11  ;;  %v1813_v60 = vsel %vm608_vm5, %v3325_v30, %v3329_v32 }
 0x419   :  { %v3471_v62 = vpack.i.bf16 %v2457_v59, %v2456_v34  ;;  %v1814_v3 = vsel %vm608_vm5, %v3329_v32, %v3330_v19  ;;  %v2415_v11 = vsel %vm608_vm5, %v6159_v12, %v6157_v52  ;;  %v6162_v52 = vpack.i.bf16 %v5175_v17, %v5171_v57 }
 0x41a   :  { %v3516_v18 = vpack.i.bf16 %v1814_v3, %v1813_v60  ;;  %v3551_v7 = vpack.i.bf16 %v2415_v11, %v5433_v47  ;;  %v5537_v30 = vpop.permute.xlu1 %3367  ;;  %v1867_v47 = vsel %vm640_vm14, %v3335_v35, %v3354_v53  ;;  %v2414_v35 = vld [vmem:[#allocation5 + $0x8] sm:$0xff]  ;;  %v3360_v57 = vunpack.i.h.bf16 %v5474_v44 }
 0x41b   :  { %v3359_v17 = vunpack.i.l.bf16 %v5474_v44  ;;  %v3364_v34 = vunpack.i.l.bf16 %v5498_v26  ;;  %v6163_v26 = vpack.i.bf16 %v5133_v48, %v5137_v25  ;;  %v3370_v48 = vunpack.i.h.bf16 %v5537_v30 }
 0x41c   :  { %3502 = vrot.lane.b32.xlu2 %v3501_v39, %s3669_s14  ;;  %v1868_v39 = vsel %vm640_vm14, %v3354_v53, %v3355_v23  ;;  %v3369_v25 = vunpack.i.l.bf16 %v5537_v30  ;;  %v3234_v53 = vunpack.i.l.bf16 %v5300_v14  ;;  %v6164_v30 = vunpack.i.h.bf16 %v5300_v14 }
 0x41d   :  { %v3531_v38 = vpack.i.bf16 %v1868_v39, %v1867_v47  ;;  %v2167_v27 = vsel %vm640_vm14, %v3345_v6, %v3359_v17  ;;  %v2462_v15 = vsel %vm640_vm14, %v3350_v46, %v3364_v34  ;;  %v2463_v32 = vsel %vm640_vm14, %v3364_v34, %v3365_v2 }
 0x41e   :  { %v3541_v44 = vpack.i.bf16 %v2463_v32, %v2462_v15 }
 0x420   :  { %3527 = vrot.lane.b32.xlu1 %v3526_v61, %s3664_s2  ;;  %3467 = vrot.lane.b32.xlu0 %v3466_v58, %s3669_s14  ;;  %v3260_v61 = vunpack.i.h.bf16 %v5330_v50  ;;  %v2168_v50 = vsel %vm640_vm14, %v3359_v17, %v3360_v57  ;;  %v6165_v17 = vunpack.i.h.bf16 %v5250_v10 }
 0x422   :  { %v5553_v36 = vpop.permute.xlu1 %3372 }
 0x424   :  { %3507 = vrot.lane.b32.xlu2 %v3506_v55, %s3666_s7  ;;  %v5540_v19 = vpop.permute.xlu2 %3387  ;;  %v3536_v55 = vpack.i.bf16 %v2168_v50, %v2167_v27  ;;  %v5623_v50 = vld [vmem:[#allocation5] sm:$0xff] }
 0x428   :  { %3547 = vrot.lane.b32.xlu1 %v3546_v31, %s3664_s2  ;;  %3472 = vrot.lane.b32.xlu0 %v3471_v62, %s3664_s2 }
 0x42a   :  { %v5565_v20 = vpop.permute.xlu1 %3377 }
 0x42b   :  { %v3380_v2 = vunpack.i.h.bf16 %v5565_v20  ;;  %v3379_v3 = vunpack.i.l.bf16 %v5565_v20 }
 0x42c   :  { %3517 = vrot.lane.b32.xlu2 %v3516_v18, %s3666_s7 }
 0x42d   :  { %v1969_v23 = vsel %vm704_vm8, %v3379_v3, %v3380_v2 }
 0x430   :  { %3552 = vrot.lane.b32.xlu1 %v3551_v7, %s3664_s2  ;;  %3497 = vrot.lane.b32.xlu0 %v3516_v18, %s3669_s14 }
 0x432   :  { %v5575_v45 = vpop.permute.xlu1 %3382 }
 0x434   :  { %2467 = vrot.lane.b32.xlu2 %v6160_v43, %s3672_s4 }
 0x438   :  { %3567 = vrot.lane.b32.xlu1 %v6161_v4, %s3664_s2  ;;  %3522 = vrot.lane.b32.xlu0 %v3516_v18, %s3664_s2 }
 0x43c   :  { %3557 = vrot.lane.b32.xlu2 %v6162_v52, %s3664_s2  ;;  %v3393_v6 = vpop.permute.xlu1 %3392  ;;  %v3184_v52 = vunpack.i.l.bf16 %v5250_v10 }
 0x43d   :  { %v3395_v11 = vunpack.i.h.bf16 %v3393_v6  ;;  %v3394_v7 = vunpack.i.l.bf16 %v3393_v6 }
 0x43e   :  { %v5555_v16 = vpop.permute.xlu2 %3397  ;;  %v1953_v27 = vsel %vm704_vm8, %v3184_v52, %v6165_v17  ;;  %v3374_v52 = vunpack.i.l.bf16 %v5553_v36  ;;  %v3194_v17 = vunpack.i.l.bf16 %v5282_v5 }
 0x43f   :  { %v3399_v29 = vunpack.i.l.bf16 %v5555_v16  ;;  %v1965_v4 = vsel %vm704_vm8, %v3394_v7, %v3395_v11 }
 0x440   :  { %3532 = vrot.lane.b32.xlu0 %v3531_v38, %s3669_s14 }
 0x441   :  { %v5561_v9 = vsel %vm979_vm11, %v3260_v61, %v3399_v29 }
 0x446   :  { %v5563_v58 = vpop.permute.xlu2 %3427 }
 0x447   :  { %v3429_v3 = vunpack.i.l.bf16 %v5563_v58 }
 0x448   :  { %2469 = vrot.lane.b32.xlu0 %v2414_v35, %s3672_s4  ;;  %v1957_v35 = vsel %vm704_vm8, %v3234_v53, %v6164_v30  ;;  %v3385_v53 = vunpack.i.h.bf16 %v5575_v45 }
 0x44e   :  { %v5571_v37 = vpop.permute.xlu2 %3437 }
 0x450   :  { %3537 = vrot.lane.b32.xlu0 %v3536_v55, %s3666_s7 }
 0x456   :  { %v5581_v59 = vpop.permute.xlu2 %3447 }
 0x458   :  { %3542 = vrot.lane.b32.xlu0 %v3541_v44, %s3664_s2  ;;  %v3449_v44 = vunpack.i.l.bf16 %v5581_v59 }
 0x45e   :  { %v3463_v31 = vpop.permute.xlu2 %3462  ;;  %v5584_v60 = vpop.permute.xlu0 %3402 }
 0x45f   :  { %v3465_v62 = vunpack.i.h.bf16 %v3463_v31  ;;  %v3464_v38 = vunpack.i.l.bf16 %v3463_v31 }
 0x460   :  { %3562 = vrot.lane.b32.xlu0 %v6163_v26, %s3664_s2 }
 0x461   :  { %v5591_v8 = vsel %vm979_vm11, %v3399_v29, %v3465_v62  ;;  %v1961_v29 = vsel %vm704_vm8, %v3369_v25, %v3370_v48 }
 0x462   :  { %v3413_v46 = vpop.permute.xlu1 %3412 }
 0x463   :  { %v3415_v18 = vunpack.i.h.bf16 %v3413_v46  ;;  %v3414_v12 = vunpack.i.l.bf16 %v3413_v46 }
 0x465   :  { %v1973_v40 = vsel %vm704_vm8, %v3414_v12, %v3415_v18  ;;  %v1970_v12 = vsel %vm704_vm8, %v3380_v2, %v3449_v44  ;;  %v3400_v2 = vunpack.i.h.bf16 %v5555_v16  ;;  %v3239_v16 = vunpack.i.l.bf16 %v5310_v49 }
 0x466   :  { %2015 = vmatpush.msrb.mxu1 %v1973_v40  ;;  %v5596_v43 = vpop.permute.xlu2 %3482  ;;  %v5603_v47 = vpop.permute.xlu0 %3407  ;;  %v1962_v40 = vsel %vm704_vm8, %v3370_v48, %v3429_v3 }
 0x467   :  { %v3484_v31 = vunpack.i.l.bf16 %v5596_v43 }
 0x468   :  { %2016 = vmatpush.msrb.mxu1 %v1969_v23 }
 0x469   :  { %v1966_v7 = vsel %vm704_vm8, %v3395_v11, %v3484_v31  ;;  %v3404_v11 = vunpack.i.l.bf16 %v5584_v60 }
 0x46a   :  { %v5605_v39 = vpop.permute.xlu1 %3432  ;;  %2017 = vmatpush.msrb.mxu1 %v1965_v4  ;;  %v3384_v4 = vunpack.i.l.bf16 %v5575_v45 }
 0x46b   :  { %v3435_v61 = vunpack.i.h.bf16 %v5605_v39 }
 0x46c   :  { %2018 = vmatpush.msrb.mxu1 %v1961_v29 }
 0x46d   :  { %v5616_v20 = vsel %vm979_vm11, %v3435_v61, %v3464_v38  ;;  %v3390_v38 = vunpack.i.h.bf16 %v5540_v19 }
 0x46e   :  { %2019 = vmatpush.msrb.mxu1 %v1957_v35  ;;  %v5618_v57 = vpop.permute.xlu2 %3487 }
 0x46f   :  { %v3489_v34 = vunpack.i.l.bf16 %v5618_v57  ;;  %v2267_v29 = vsel %vm979_vm11, %v3390_v38, %v3404_v11  ;;  %v6010_v38 = vunpack.i.l.bf16 %v5571_v37 }
 0x470   :  { %2020 = vmatpush.msrb.mxu1 %v1953_v27 }
 0x471   :  { %2782 = vmatmul.msk.f32.vlgmr.msrb.gmra.mxu1 %vm2001_vm15, %v5623_v50 }
 0x472   :  { %v5627_v14 = vpop.permute.xlu1 %3452  ;;  %v5629_v55 = vpop.permute.xlu0 %3417 }
 0x473   :  { %v3455_v15 = vunpack.i.h.bf16 %v5627_v14  ;;  %v3419_v25 = vunpack.i.l.bf16 %v5629_v55 }
 0x475   :  { %v5636_v10 = vsel %vm979_vm11, %v3455_v15, %v3489_v34  ;;  %v2275_v48 = vsel %vm979_vm11, %v3400_v2, %v3419_v25 }
 0x476   :  { %v5638_v32 = vpop.permute.xlu2 %3502 }
 0x477   :  { %v3504_v6 = vunpack.i.l.bf16 %v5638_v32 }
 0x479   :  { %v1974_v62 = vsel %vm704_vm8, %v3415_v18, %v3504_v6  ;;  %v6166_v6 = vunpack.i.h.bf16 %v5310_v49 }
 0x47a   :  { %v5644_v26 = vpop.permute.xlu1 %3477  ;;  %2035 = vmatpush.msra.mxu2 %v1974_v62  ;;  %v5646_v46 = vpop.permute.xlu0 %3422 }
 0x47b   :  { %v6015_v34 = vunpack.i.h.bf16 %v5646_v46  ;;  %v3424_v44 = vunpack.i.l.bf16 %v5646_v46  ;;  %v2259_v31 = vsel %vm979_vm11, %v3239_v16, %v6166_v6 }
 0x47c   :  { %2036 = vmatpush.msra.mxu2 %v1970_v12  ;;  %v6167_v12 = vunpack.i.h.bf16 %v5282_v5 }
 0x47d   :  { %v2577_v49 = vsel %vm559_vm3, %v3424_v44, %v6015_v34  ;;  %v3480_v44 = vunpack.i.h.bf16 %v5644_v26 }
 0x47e   :  { %2037 = vmatpush.msra.mxu2 %v1966_v7  ;;  %v2255_v7 = vsel %vm979_vm11, %v3194_v17, %v6167_v12 }
 0x480   :  { %2038 = vmatpush.msra.mxu2 %v1962_v40  ;;  %v6011_v40 = vunpack.i.h.bf16 %v5603_v47 }
 0x482   :  { %v5653_v23 = vpop.permute.xlu1 %3492  ;;  %2039 = vmatpush.msra.mxu2 %v5308_v21  ;;  %v5656_v18 = vpop.permute.xlu0 %3442  ;;  %v3375_v21 = vunpack.i.h.bf16 %v5553_v36 }
 0x483   :  { %v3495_v5 = vunpack.i.h.bf16 %v5653_v23  ;;  %v3445_v34 = vunpack.i.h.bf16 %v5656_v18 }
 0x484   :  { %2040 = vmatpush.msra.mxu2 %v5257_v41  ;;  %v2271_v41 = vsel %vm979_vm11, %v3384_v4, %v3385_v53  ;;  %v2263_v27 = vsel %vm979_vm11, %v3374_v52, %v3375_v21  ;;  %v3409_v4 = vunpack.i.l.bf16 %v5603_v47 }
 0x485   :  { %2783 = vmatmul.msk.f32.vlgmr.msra.gmra.mxu2 %vm2001_vm15, %v5623_v50  ;;  %v2565_v16 = vsel %vm559_vm3, %v3495_v5, %v6010_v38 }
 0x486   :  { %2315 = vmatpush.msrb.mxu2 %v2275_v48 }
 0x488   :  { %2316 = vmatpush.msrb.mxu2 %v2271_v41  ;;  %v2569_v41 = vsel %vm559_vm3, %v3409_v4, %v6011_v40  ;;  %v5730_v4 = vpop.permute.xlu2 %3507 }
 0x48a   :  { %2317 = vmatpush.msrb.mxu2 %v2267_v29  ;;  %v5678_v30 = vpop.permute.xlu1 %3512  ;;  %v5680_v35 = vpop.permute.xlu0 %3457 }
 0x48b   :  { %v3515_v62 = vunpack.i.h.bf16 %v5678_v30  ;;  %v6013_v3 = vunpack.i.l.bf16 %v5680_v35 }
 0x48c   :  { %2318 = vmatpush.msrb.mxu2 %v2263_v27  ;;  %v6012_v27 = vunpack.i.l.bf16 %v5298_v24 }
 0x48d   :  { %v2573_v52 = vsel %vm559_vm3, %v3515_v62, %v6013_v3 }
 0x48e   :  { %2319 = vmatpush.msrb.mxu2 %v2259_v31  ;;  %v6014_v31 = vunpack.i.l.bf16 %v5263_v54 }
 0x490   :  { %2320 = vmatpush.msrb.mxu2 %v2255_v7  ;;  %v2557_v12 = vsel %vm559_vm3, %v3480_v44, %v6014_v31  ;;  %v5734_v5 = vpop.permute.xlu2 %3517  ;;  %v3485_v31 = vunpack.i.h.bf16 %v5596_v43 }
 0x491   :  { %2786 = vmatmul.msk.f32.vlgmr.msrb.gmra.mxu2 %vm2001_vm15, %v5222_v33  ;;  %v3520_v45 = vunpack.i.h.bf16 %v5734_v5 }
 0x492   :  { %2617 = vmatpush.msra.mxu2 %v2577_v49  ;;  %v5703_v2 = vpop.permute.xlu1 %3527  ;;  %v3468_v48 = vpop.permute.xlu0 %3467 }
 0x493   :  { %v3469_v38 = vunpack.i.l.bf16 %v3468_v48 }
 0x494   :  { %2618 = vmatpush.msra.mxu2 %v2573_v52  ;;  %v3505_v52 = vunpack.i.h.bf16 %v5638_v32  ;;  %v3444_v32 = vunpack.i.l.bf16 %v5656_v18  ;;  %v3290_v18 = vunpack.i.h.bf16 %v5343_v51 }
 0x496   :  { %2619 = vmatpush.msra.mxu2 %v2569_v41 }
 0x498   :  { %2620 = vmatpush.msra.mxu2 %v2565_v16  ;;  %v3470_v16 = vunpack.i.h.bf16 %v3468_v48 }
 0x49a   :  { %v5716_v29 = vpop.permute.xlu1 %3547  ;;  %v5718_v17 = vpop.permute.xlu0 %3472 }
 0x49b   :  { %v3550_v6 = vunpack.i.h.bf16 %v5716_v29 }
 0x49d   :  { %v2561_v62 = vsel %vm559_vm3, %v3550_v6, %v6012_v27 }
 0x49e   :  { %2621 = vmatpush.msra.mxu2 %v2561_v62  ;;  %v3450_v62 = vunpack.i.h.bf16 %v5581_v59  ;;  %v3340_v59 = vunpack.i.h.bf16 %v5392_v1 }
 0x4a0   :  { %2622 = vmatpush.msra.mxu2 %v2557_v12  ;;  %v1971_v48 = vsel %vm704_vm8, %v3450_v62, %v3469_v38 }
 0x4a2   :  { %v3498_v7 = vpop.permute.xlu0 %3497 }
 0x4a3   :  { %v3500_v27 = vunpack.i.h.bf16 %v3498_v7  ;;  %v3499_v3 = vunpack.i.l.bf16 %v3498_v7  ;;  %v3430_v7 = vunpack.i.h.bf16 %v5563_v58  ;;  %v3420_v58 = vunpack.i.h.bf16 %v5629_v55 }
 0x4a5   :  { %v1968_v43 = vsel %vm704_vm8, %v3499_v3, %v3500_v27 }
 0x4aa   :  { %v5732_v49 = vpop.permute.xlu0 %3522 }
 0x4b2   :  { %v3533_v41 = vpop.permute.xlu0 %3532 }
 0x4b3   :  { %v3535_v40 = vunpack.i.h.bf16 %v3533_v41  ;;  %v3534_v6 = vunpack.i.l.bf16 %v3533_v41  ;;  %v1972_v41 = vsel %vm704_vm8, %v3469_v38, %v3470_v16  ;;  %v1963_v38 = vsel %vm704_vm8, %v3430_v7, %v3444_v32 }
 0x4b4   :  { %v1964_v16 = vsel %vm704_vm8, %v3444_v32, %v3445_v34  ;;  %v3389_v34 = vunpack.i.l.bf16 %v5540_v19  ;;  %v3510_v19 = vunpack.i.h.bf16 %v5730_v4  ;;  %v3509_v32 = vunpack.i.l.bf16 %v5730_v4 }
 0x4b5   :  { %v1975_v44 = vsel %vm704_vm8, %v3505_v52, %v3534_v6  ;;  %v1976_v12 = vsel %vm704_vm8, %v3534_v6, %v3535_v40  ;;  %v1967_v40 = vsel %vm704_vm8, %v3485_v31, %v3499_v3  ;;  %v2468_v52 = vpop.permute.xlu2 %2467  ;;  %v6168_v3 = vunpack.i.l.bf16 %v5392_v1 }
 0x4b6   :  { %2055 = vmatpush.msrb.mxu3 %v1975_v44  ;;  %2075 = vmatpush.msra.mxu1 %v1976_v12  ;;  %v6169_v31 = vunpack.i.l.bf16 %v5343_v51  ;;  %v3405_v12 = vunpack.i.h.bf16 %v5584_v60  ;;  %v2276_v1 = vsel %vm979_vm11, %v3419_v25, %v3420_v58  ;;  %v3454_v51 = vunpack.i.l.bf16 %v5627_v14 }
 0x4b7   :  { %v1960_v27 = vsel %vm704_vm8, %v6168_v3, %v3340_v59  ;;  %v3490_v4 = vunpack.i.h.bf16 %v5618_v57  ;;  %v2264_v7 = vsel %vm979_vm11, %v3375_v21, %v3509_v32  ;;  %v3460_v21 = vunpack.i.h.bf16 %v5680_v35 }
 0x4b8   :  { %2056 = vmatpush.msrb.mxu3 %v1971_v48  ;;  %2076 = vmatpush.msra.mxu1 %v1972_v41  ;;  %v1956_v44 = vsel %vm704_vm8, %v6169_v31, %v3290_v18  ;;  %v2268_v55 = vsel %vm979_vm11, %v3404_v11, %v3405_v12  ;;  %v2273_v60 = vsel %vm979_vm11, %v3454_v51, %v3455_v15  ;;  %v3514_v11 = vunpack.i.l.bf16 %v5678_v30  ;;  %v5805_v30 = vpop.permute.xlu1 %3552 }
 0x4b9   :  { %v3300_v15 = vunpack.i.h.bf16 %v5347_v22  ;;  %v3270_v18 = vunpack.i.h.bf16 %v5298_v24  ;;  %v3529_v3 = vunpack.i.l.bf16 %v5703_v2 }
 0x4ba   :  { %v2470_v6 = vpop.permute.xlu0 %2469  ;;  %2057 = vmatpush.msrb.mxu3 %v1967_v40  ;;  %2077 = vmatpush.msra.mxu1 %v1968_v43  ;;  %v3440_v43 = vunpack.i.h.bf16 %v5571_v37 }
 0x4bb   :  { %v5750_v62 = vsel %vm2471_vm7, %v2468_v52, %v2470_v6  ;;  %v3549_v52 = vunpack.i.l.bf16 %v5716_v29  ;;  %v6172_v6 = vunpack.i.l.bf16 %v5347_v22 }
 0x4bc   :  { %2058 = vmatpush.msrb.mxu3 %v1963_v38  ;;  %2078 = vmatpush.msra.mxu1 %v1964_v16  ;;  %v3225_v38 = vunpack.i.h.bf16 %v5263_v54  ;;  %v6174_v16 = vunpack.i.l.bf16 %v5571_v37  ;;  %v6175_v37 = vunpack.i.l.bf16 %v5298_v24 }
 0x4bd   :  { %2790 = vmatmul.msk.f32.vlgmr.msra.gmra.mxu2 %vm2001_vm15, %v5750_v62 }
 0x4be   :  { %2059 = vmatpush.msrb.mxu3 %v5404_v28  ;;  %2079 = vmatpush.msra.mxu1 %v1960_v27  ;;  %v2566_v58 = vsel %vm559_vm3, %v6174_v16, %v3440_v43  ;;  %v2562_v12 = vsel %vm559_vm3, %v6175_v37, %v3270_v18 }
 0x4c0   :  { %2060 = vmatpush.msrb.mxu3 %v5353_v13  ;;  %2080 = vmatpush.msra.mxu1 %v1956_v44  ;;  %v2272_v13 = vsel %vm979_vm11, %v3385_v53, %v3389_v34  ;;  %v3434_v53 = vunpack.i.l.bf16 %v5605_v39  ;;  %v3530_v44 = vunpack.i.h.bf16 %v5703_v2  ;;  %v3555_v34 = vunpack.i.h.bf16 %v5805_v30 }
 0x4c1   :  { %2784 = vmatmul.msk.f32.vlgmr.msrb.gmra.mxu3 %vm2001_vm15, %v5623_v50  ;;  %2785 = vmatmul.msk.f32.vlgmr.msra.gmra.mxu1 %vm2001_vm15, %v5623_v50  ;;  %v3519_v50 = vunpack.i.l.bf16 %v5734_v5  ;;  %v6176_v2 = vunpack.i.l.bf16 %v5263_v54 }
 0x4c2   :  { %2335 = vmatpush.msra.mxu3 %v2276_v1  ;;  %v3538_v28 = vpop.permute.xlu0 %3537  ;;  %v2265_v14 = vsel %vm979_vm11, %v3434_v53, %v3435_v61 }
 0x4c3   :  { %v3540_v48 = vunpack.i.h.bf16 %v3538_v28  ;;  %v3539_v41 = vunpack.i.l.bf16 %v3538_v28  ;;  %v2269_v5 = vsel %vm979_vm11, %v3490_v4, %v3519_v50  ;;  %v2270_v36 = vsel %vm979_vm11, %v3519_v50, %v3520_v45  ;;  %v3568_v28 = vpop.permute.xlu1 %3567 }
 0x4c4   :  { %2336 = vmatpush.msra.mxu3 %v2272_v13  ;;  %v3570_v50 = vunpack.i.h.bf16 %v3568_v28 }
 0x4c5   :  { %v2277_v25 = vsel %vm979_vm11, %v3510_v19, %v3539_v41  ;;  %v2278_v59 = vsel %vm979_vm11, %v3539_v41, %v3540_v48  ;;  %v2558_v48 = vsel %vm559_vm3, %v6176_v2, %v3225_v38 }
 0x4c6   :  { %2337 = vmatpush.msra.mxu3 %v2268_v55  ;;  %2355 = vmatpush.msra.mxu0 %v2277_v25  ;;  %v3569_v55 = vunpack.i.l.bf16 %v3568_v28 }
 0x4c7   :  { %2375 = vmatpush.msrb.mxu1 %v2278_v59 }
 0x4c8   :  { %2338 = vmatpush.msra.mxu3 %v2264_v7  ;;  %2356 = vmatpush.msra.mxu0 %v2273_v60  ;;  %v2560_v53 = vsel %vm559_vm3, %v3569_v55, %v3570_v50 }
 0x4c9   :  { %2376 = vmatpush.msrb.mxu1 %v5636_v10  ;;  %v6170_v10 = vunpack.i.h.bf16 %v5646_v46  ;;  %v3474_v46 = vunpack.i.l.bf16 %v5718_v17 }
 0x4ca   :  { %2339 = vmatpush.msra.mxu3 %v5341_v63  ;;  %v3543_v57 = vpop.permute.xlu0 %3542  ;;  %2357 = vmatpush.msra.mxu0 %v2269_v5  ;;  %v3494_v63 = vunpack.i.l.bf16 %v5653_v23 }
 0x4cb   :  { %2377 = vmatpush.msrb.mxu1 %v2270_v36  ;;  %v2578_v39 = vsel %vm559_vm3, %v6170_v10, %v3514_v11  ;;  %v3545_v40 = vunpack.i.h.bf16 %v3543_v57  ;;  %v3544_v61 = vunpack.i.l.bf16 %v3543_v57 }
 0x4cc   :  { %2340 = vmatpush.msra.mxu3 %v5294_v56  ;;  %2358 = vmatpush.msra.mxu0 %v2265_v14  ;;  %v6171_v56 = vunpack.i.l.bf16 %v5680_v35  ;;  %v6173_v35 = vunpack.i.h.bf16 %v5603_v47  ;;  %v3558_v47 = vpop.permute.xlu2 %3557 }
 0x4cd   :  { %2787 = vmatmul.msk.f32.vlgmr.msra.gmra.mxu3 %vm2001_vm15, %v5222_v33  ;;  %2378 = vmatpush.msrb.mxu1 %v5616_v20  ;;  %v3475_v20 = vunpack.i.h.bf16 %v5718_v17  ;;  %v3525_v17 = vunpack.i.h.bf16 %v5732_v49  ;;  %v2579_v22 = vsel %vm559_vm3, %v3544_v61, %v3545_v40  ;;  %v3560_v1 = vunpack.i.h.bf16 %v3558_v47 }
 0x4ce   :  { %2637 = vmatpush.msrb.mxu3 %v2578_v39  ;;  %2359 = vmatpush.msra.mxu0 %v5561_v9  ;;  %v2574_v23 = vsel %vm559_vm3, %v6171_v56, %v3460_v21  ;;  %v2258_v9 = vsel %vm979_vm11, %v6172_v6, %v3300_v15  ;;  %v2570_v29 = vsel %vm559_vm3, %v6173_v35, %v3494_v63  ;;  %v3559_v51 = vunpack.i.l.bf16 %v3558_v47 }
 0x4cf   :  { %2379 = vmatpush.msrb.mxu1 %v5591_v8  ;;  %v3479_v8 = vunpack.i.l.bf16 %v5644_v26  ;;  %v2580_v26 = vsel %vm559_vm3, %v3545_v40, %v3549_v52  ;;  %v2572_v19 = vsel %vm559_vm3, %v3525_v17, %v3529_v3 }
 0x4d0   :  { %2638 = vmatpush.msrb.mxu3 %v2574_v23  ;;  %2360 = vmatpush.msra.mxu0 %v5358_v42  ;;  %v3524_v42 = vunpack.i.l.bf16 %v5732_v49  ;;  %v3554_v49 = vunpack.i.l.bf16 %v5805_v30  ;;  %v2563_v59 = vsel %vm559_vm3, %v3559_v51, %v3560_v1 }
 0x4d1   :  { %2380 = vmatpush.msrb.mxu1 %v2258_v9  ;;  %2788 = vmatmul.msk.f32.vlgmr.msra.gmra.mxu0 %vm2001_vm15, %v5222_v33  ;;  %v2576_v31 = vsel %vm559_vm3, %v3475_v20, %v3479_v8 }
 0x4d2   :  { %2639 = vmatpush.msrb.mxu3 %v2570_v29  ;;  %2789 = vmatmul.msk.f32.vlgmr.msrb.gmra.mxu1 %vm2001_vm15, %v5222_v33  ;;  %v3563_v27 = vpop.permute.xlu0 %3562  ;;  %v2575_v33 = vsel %vm559_vm3, %v3474_v46, %v3475_v20  ;;  %v2571_v13 = vsel %vm559_vm3, %v3524_v42, %v3525_v17  ;;  %v2567_v24 = vsel %vm559_vm3, %v3530_v44, %v3554_v49 }
 0x4d3   :  { %2657 = vmatpush.msrb.mxu0 %v2579_v22  ;;  %2677 = vmatpush.msra.mxu1 %v2580_v26  ;;  %v3564_v32 = vunpack.i.l.bf16 %v3563_v27  ;;  %v3565_v41 = vunpack.i.h.bf16 %v3563_v27  ;;  %v2568_v25 = vsel %vm559_vm3, %v3554_v49, %v3555_v34 }
 0x4d4   :  { %2640 = vmatpush.msrb.mxu3 %v2566_v58 }
 0x4d5   :  { %2658 = vmatpush.msrb.mxu0 %v2575_v33  ;;  %2678 = vmatpush.msra.mxu1 %v2576_v31  ;;  %v2564_v54 = vsel %vm559_vm3, %v3560_v1, %v3564_v32  ;;  %v2559_v45 = vsel %vm559_vm3, %v3565_v41, %v3569_v55 }
 0x4d6   :  { %2641 = vmatpush.msrb.mxu3 %v2562_v12 }
 0x4d7   :  { %2659 = vmatpush.msrb.mxu0 %v2571_v13  ;;  %2679 = vmatpush.msra.mxu1 %v2572_v19 }
 0x4d8   :  { %2642 = vmatpush.msrb.mxu3 %v2558_v48 }
 0x4d9   :  { %2791 = vmatmul.msk.f32.vlgmr.msrb.gmra.mxu3 %vm2001_vm15, %v5750_v62  ;;  %2660 = vmatpush.msrb.mxu0 %v2567_v24 }
 0x4da   :  { %2680 = vmatpush.msra.mxu1 %v2568_v25 }
 0x4db   :  { %2661 = vmatpush.msrb.mxu0 %v2563_v59 }
 0x4dc   :  { %2681 = vmatpush.msra.mxu1 %v2564_v54 }
 0x4dd   :  { %2662 = vmatpush.msrb.mxu0 %v2559_v45 }
 0x4de   :  { %2682 = vmatpush.msra.mxu1 %v2560_v53  ;;  %2792 = vmatmul.msk.f32.vlgmr.msrb.gmra.mxu0 %vm2001_vm15, %v5750_v62 }
 0x4df   :  { %2793 = vmatmul.msk.f32.vlgmr.msra.gmra.mxu1 %vm2001_vm15, %v5750_v62 }
 0x4ee   :  { %v2022_v60 = vpop.f32.mrf.mxu1 }
 0x4ef   :  { %v2085_v11 = vadd.f32 %v2022_v60, %v5246_v0 }
 0x508   :  { %v2042_v4 = vpop.f32.mrf.mxu2 }
 0x509   :  { %v2086_v39 = vadd.f32 %v2042_v4, %v5246_v0 }
 0x514   :  { %v2322_v7 = vpop.f32.mrf.mxu2 }
 0x515   :  { %v2385_v5 = vadd.f32 %v2322_v7, %v2085_v11 }
 0x53e   :  { %v2082_v21 = vpop.f32.mrf.mxu1 }
 0x53f   :  { %v2088_v62 = vadd.f32 %v2082_v21, %v5246_v0 }
 0x540   :  { %v2624_v57 = vpop.f32.mrf.mxu2 }
 0x541   :  { %v2687_v36 = vadd.f32 %v2624_v57, %v2385_v5 }
 0x543   :  { %2691 = vst [vmem:[#allocation7] sm:$0xff] %v2687_v36 }
 0x544   :  { %v2062_v14 = vpop.f32.mrf.mxu3 }
 0x545   :  { %v2087_v10 = vadd.f32 %v2062_v14, %v5246_v0 }
 0x54e   :  { %v2362_v15 = vpop.f32.mrf.mxu0 }
 0x54f   :  { %v2382_v30 = vpop.f32.mrf.mxu1  ;;  %v2387_v40 = vadd.f32 %v2362_v15, %v2087_v10 }
 0x550   :  { %v2342_v63 = vpop.f32.mrf.mxu3  ;;  %v2388_v61 = vadd.f32 %v2382_v30, %v2088_v62 }
 0x551   :  { %v2386_v43 = vadd.f32 %v2342_v63, %v2086_v39 }
 0x55b   :  { %v2664_v56 = vpop.f32.mrf.mxu0 }
 0x55c   :  { %v2689_v23 = vadd.f32 %v2664_v56, %v2387_v40  ;;  %v2684_v52 = vpop.f32.mrf.mxu1  ;;  %v2644_v20 = vpop.f32.mrf.mxu3 }
 0x55d   :  { %v2690_v46 = vadd.f32 %v2684_v52, %v2388_v61  ;;  %v2688_v6 = vadd.f32 %v2644_v20, %v2386_v43 }
 0x55e   :  { %2694 = vst [vmem:[#allocation7 + $0x10] sm:$0xff] %v2689_v23 }
 0x55f   :  { %2695 = vst [vmem:[#allocation7 + $0x18] sm:$0xff] %v2690_v46 }
 0x560   :  { %2692 = vst [vmem:[#allocation7 + $0x8] sm:$0xff] %v2688_v6 }
 0x561   :  { %2708 = dma.vmem_to_hbm [thread:$0]  %s2701_s23, 512, %s2703_s26, [#allocation4], %s3674_s27, %s3674_s27, %s3675_s0  }
 0x562   :  { %3657 = dma.done.wait [#allocation4], 512  }
 0x563   :  { %3658 = vsyncadd [#allocation4], 4294966784 }
 0x564   :  { %2713 = vsyncpa [#allocation3], 1 }
 0x565   :  { %2714 = vsyncpa [#allocation6], 1 }
 0x566   :  { %2715 = vsyncpa [#allocation4], 1 }

</bundles_post_ra>
